<compile_context>
chip_gen: v7x
topology: tpu7x:2x2x1
jax: 0.10.0
libtpu: 0.0.40
codegen_flags: <defaults>
</compile_context>

<pallas_src>
import functools
import math
import numpy as np

import jax
import jax.numpy as jnp
from jax.experimental import pallas as pl
from jax.experimental.pallas import tpu as pltpu

# ---------------- constants (ArcMarginProduct s=40, m=0.7) ----------------
_ARC_S = 40.0
_ARC_M = 0.7
_COS_M = math.cos(_ARC_M)
_SIN_M = math.sin(_ARC_M)
_TH = math.cos(math.pi - _ARC_M)
_MM = math.sin(math.pi - _ARC_M) * _ARC_M

_N_MELS = 128
_INV_LN10 = 1.0 / math.log(10.0)


def _round_up(x, m):
    return (x + m - 1) // m * m


def _full_spec(shape):
    zeros = (0,) * len(shape)
    return pl.BlockSpec(shape, lambda *_: zeros)


# =========================================================================
# Kernel 1: front-end (MelSpectrogram power + 10*log10, SeparableConv1d
# "wavegram"), tiled over rows; one fused [cos|sin|wave] MXU matmul per tile.
# =========================================================================
def _frontend_kernel(fr_ref, rhs_ref, fb_ref, bpw_ref, logmel_ref, wav_ref):
    nfp = (rhs_ref.shape[1] - _N_MELS) // 2          # padded FFT-bin count
    # One MXU matmul: [re | im | wavegram] (bf16 operands, f32 accumulation).
    y = jnp.dot(fr_ref[...], rhs_ref[...], preferred_element_type=jnp.float32)
    re = y[:, :nfp]
    im = y[:, nfp:2 * nfp]
    power = (re * re + im * im).astype(jnp.bfloat16)  # |STFT|^2, bf16 for MXU
    mel = jnp.dot(power, fb_ref[...], preferred_element_type=jnp.float32)
    logmel_ref[...] = (10.0 * _INV_LN10) * jnp.log(mel + 1e-8)  # 10*log10(x+1e-8)
    # SeparableConv1d(1,128,1024,stride=512,pad=512): rank-1 depthwise x
    # pointwise folded into the RHS columns above; just add the bias here.
    wav_ref[...] = y[:, 2 * nfp:] + bpw_ref[...]


def frontend_apply(fr, rhs, fb, bpw, *, tm=512):
    bt, n_fft = fr.shape
    tm = min(tm, _round_up(bt, 8))
    bt_pad = _round_up(bt, tm)
    if bt_pad != bt:
        fr = jnp.pad(fr, ((0, bt_pad - bt), (0, 0)))

    row_in = pl.BlockSpec((tm, n_fft), lambda i: (i, 0))
    row_out = pl.BlockSpec((tm, _N_MELS), lambda i: (i, 0))
    consts = (rhs, fb, bpw)

    logmel, wav = pl.pallas_call(
        _frontend_kernel,
        out_shape=(jax.ShapeDtypeStruct((bt_pad, _N_MELS), jnp.float32),
                   jax.ShapeDtypeStruct((bt_pad, _N_MELS), jnp.float32)),
        grid=(bt_pad // tm,),
        in_specs=[row_in] + [_full_spec(c.shape) for c in consts],
        out_specs=(row_out, row_out),
        # Working set at tm=512 (~10 MiB incl. double-buffered constants) fits
        # the default scoped VMEM on v5e/v6e/v7x.
        compiler_params=pltpu.CompilerParams(
            dimension_semantics=("parallel",)),
    )(fr, *consts)
    # TODO(synk): for long clips, frame inside the kernel with pl.ds on the
    #             padded waveform instead of the XLA gather in the wrapper.
    return logmel[:bt], wav[:bt]


# =========================================================================
# Kernel 2: heatmap branch (3 separable 2-D convs + BN + ELU + Sigmoid),
# attention multiply, GAP pooling, classifier stand-in head and ArcMargin,
# frame-tiled so VMEM is bounded independent of clip length.
# =========================================================================
def _heatmap_head_kernel(x_ref,
                         dw1_ref, pw1_ref, bn1b_ref,
                         dw2_ref, pw2_ref, bn2b_ref,
                         pw3_ref, b3_ref,
                         w1_ref, b1_ref, w2_ref, b2_ref, wn_ref, oh_ref,
                         hm_ref, feat_ref, out_ref, arc_ref,
                         pooled_ref, *, tf, t_real):
    t_idx = pl.program_id(1)
    nc = tf * _N_MELS                    # core (output) width of this tile
    nh1 = nc + 2 * _N_MELS               # layer-1 output width (+1 frame halo)
    nht = nc + 4 * _N_MELS               # input tile width (+2 frame halos)

    x0 = x_ref[0, 0]                      # (2, NHT) f32, frame-major lanes

    @pl.when(t_idx == 0)
    def _():
        pooled_ref[...] = jnp.zeros_like(pooled_ref)

    # Mel-boundary masks ('same' zero pad along the mel axis), built once at
    # full tile width and sliced per layer (slices are vreg-aligned).
    lane = jax.lax.broadcasted_iota(jnp.int32, (1, nht), 1)
    hmel = lane % _N_MELS
    mask_up = (hmel >= 1).astype(jnp.float32)          # valid for source mel h-1
    mask_dn = (hmel <= _N_MELS - 2).astype(jnp.float32)  # valid for source mel h+1

    def dwconv3x3(xfull, wts, out_w):
        # xfull (C, Win) with Win >= out_w + 2*128; output frames correspond to
        # input frames [1, 1+out_w/128).  Mel +-1 shifts: 1-lane rolls + masks
        # (2 rolls total); frame +-1 shifts: vreg-aligned static slices.
        w_in = xfull.shape[1]
        mu = mask_up[:, :w_in]
        md = mask_dn[:, :w_in]
        xm = (pltpu.roll(xfull, 1, axis=1) * mu,          # source mel h-1
              xfull,                                      # source mel h
              pltpu.roll(xfull, w_in - 1, axis=1) * md)   # source mel h+1
        acc = None
        for dh in (-1, 0, 1):
            for dw in (-1, 0, 1):
                off = (1 + dw) * _N_MELS
                k = (dh + 1) * 3 + (dw + 1)
                term = xm[dh + 1][:, off:off + out_w] * wts[:, k:k + 1]
                acc = term if acc is None else acc + term
        return acc

    def elu(v):
        # TODO(synk): expm1 would be preferable for small |v|; exp kept for
        #             lowering safety, argument clamped so the dead lane of the
        #             select never overflows.
        return jnp.where(v > 0.0, v, jnp.exp(jnp.minimum(v, 0.0)) - 1.0)

    # ---- layer 1: SeparableConv2d(2,16,3x3) + BN + ELU ----------------------
    t0 = dwconv3x3(x0, dw1_ref[...], nh1)                       # (2, NH1)
    # K=2 pointwise on the VPU (MXU would be weight-push latency only); BN
    # scale is folded into pw1 on the host, only the BN bias remains.
    w1p = pw1_ref[...]
    a1 = elu(w1p[:, 0:1] * t0[0:1, :] + w1p[:, 1:2] * t0[1:2, :]
             + bn1b_ref[...])                                   # (16, NH1)

    # The model's 'same' conv zero-pads layer-1 activations outside the real
    # clip; halo/padded frames here are nonzero (bias/ELU + neighbours), so
    # re-zero anything outside [0, t_real) before layer 2.
    f1 = jax.lax.broadcasted_iota(jnp.int32, (1, nh1), 1) // _N_MELS
    g1 = t_idx * tf - 1 + f1                                    # global frame
    a1 = a1 * ((g1 >= 0) & (g1 < t_real)).astype(jnp.float32)

    # ---- layer 2: SeparableConv2d(16,64,3x3) + BN + ELU ---------------------
    t2 = dwconv3x3(a1, dw2_ref[...], nc)                        # (16, NC)
    a2 = elu(jnp.dot(pw2_ref[...], t2.astype(jnp.bfloat16),
                     preferred_element_type=jnp.float32)
             + bn2b_ref[...])                                   # (64, NC)

    # ---- layer 3: SeparableConv2d(64,2,1x1) (dw3 folded into pw3) + Sigmoid -
    t3 = jnp.dot(pw3_ref[...], a2.astype(jnp.bfloat16),
                 preferred_element_type=jnp.float32) + b3_ref[...]   # (2, NC)
    hm = pl.reciprocal(1.0 + jnp.exp(-t3), approx=True)         # sigmoid via EUP
    hm_ref[0] = hm

    # ---- fused attention multiply + per-tile GAP partial sum ----------------
    x_core = x0[:, 2 * _N_MELS:2 * _N_MELS + nc]                # (2, NC)
    acc = x_core * hm                                           # never hits HBM
    w = nc
    while w > _N_MELS:                                          # log2(TF) fold
        w //= 2
        acc = acc[:, :w] + acc[:, w:2 * w]
    pooled_ref[...] += acc

    # ---- classifier stand-in head + ArcMargin on the last frame tile --------
    @pl.when(t_idx == pl.num_programs(1) - 1)
    def _():
        pooled = pooled_ref[...] * (1.0 / t_real)               # mean over frames
        f = (jnp.dot(pooled[0:1, :], w1_ref[0],
                     preferred_element_type=jnp.float32)
             + jnp.dot(pooled[1:2, :], w1_ref[1],
                       preferred_element_type=jnp.float32)
             + b1_ref[...])                                     # (1, h)
        feat_ref[0] = f
        out_ref[0] = jnp.dot(f, w2_ref[...],
                             preferred_element_type=jnp.float32) + b2_ref[...]
        # ArcMarginProduct (s=40, m=0.7), W pre-normalized in the wrapper.
        fn = f * jax.lax.rsqrt(
            jnp.maximum(jnp.sum(f * f, axis=1, keepdims=True), 1e-24))
        cos = jnp.clip(jnp.dot(fn, wn_ref[...],
                               preferred_element_type=jnp.float32), -1.0, 1.0)
        sin = jnp.sqrt(jnp.clip(1.0 - cos * cos, 0.0, 1.0))
        phi = cos * _COS_M - sin * _SIN_M
        phi = jnp.where(cos > _TH, phi, cos - _MM)
        oh = oh_ref[0]
        arc_ref[0] = _ARC_S * (oh * phi + (1.0 - oh) * cos)


def heatmap_head_apply(x_flat, hm_params, head_consts, one_hot, *, tf=8):
    b, c, n = x_flat.shape
    t_real = n // _N_MELS
    assert tf >= 1 and (tf & (tf - 1)) == 0, "frame tile must be a power of 2"
    nt = -(-t_real // tf)
    t_pad = nt * tf
    nht = (tf + 4) * _N_MELS
    h_feat = head_consts[0].shape[-1]

    # Zero halo frames (2 per side for the stacked 3x3 receptive field) and
    # pad the frame axis up to a whole number of tiles; overlapping tile
    # windows are materialized once in the wrapper (cheap: +4 frames / tile).
    x_pad = jnp.pad(x_flat, ((0, 0), (0, 0),
                             (2 * _N_MELS, (t_pad - t_real + 2) * _N_MELS)))
    starts = jnp.arange(nt) * (tf * _N_MELS)
    win = starts[:, None] + jnp.arange(nht)[None, :]
    x_tiles = jnp.transpose(x_pad[:, :, win], (0, 2, 1, 3))     # (B,NT,2,NHT)

    xspec = pl.BlockSpec((1, 1, c, nht), lambda bb, tt: (bb, tt, 0, 0))
    hmspec = pl.BlockSpec((1, c, tf * _N_MELS), lambda bb, tt: (bb, 0, tt))

    def per_b(k):
        return pl.BlockSpec((1, 1, k), lambda bb, tt: (bb, 0, 0))

    in_specs = ([xspec]
                + [_full_spec(p.shape) for p in hm_params]
                + [_full_spec(p.shape) for p in head_consts]
                + [per_b(one_hot.shape[-1])])
    out_shape = (jax.ShapeDtypeStruct((b, c, t_pad * _N_MELS), jnp.float32),
                 jax.ShapeDtypeStruct((b, 1, h_feat), jnp.float32),
                 jax.ShapeDtypeStruct((b, 1, 12), jnp.float32),
                 jax.ShapeDtypeStruct((b, 1, 12), jnp.float32))
    out_specs = (hmspec, per_b(h_feat), per_b(12), per_b(12))

    kernel = functools.partial(_heatmap_head_kernel, tf=tf, t_real=t_real)
    hm_pad, feat3, out3, arc3 = pl.pallas_call(
        kernel,
        out_shape=out_shape,
        grid=(b, nt),
        in_specs=in_specs,
        out_specs=out_specs,
        scratch_shapes=[pltpu.VMEM((c, _N_MELS), jnp.float32)],  # pooled acc
        compiler_params=pltpu.CompilerParams(
            dimension_semantics=("parallel", "arbitrary")),
    )(x_tiles, *hm_params, *head_consts, one_hot)
    return hm_pad[:, :, :n], feat3, out3, arc3


# =========================================================================
# Deterministic parameter / basis construction (glue, numpy/JAX).
# =========================================================================
def build_dft_and_mel(n_fft=1024, sr=16000, n_mels=128, lane=128):
    n = np.arange(n_fft)
    n_freqs = n_fft // 2 + 1
    f = np.arange(n_freqs)
    win = 0.5 - 0.5 * np.cos(2.0 * np.pi * n / n_fft)          # periodic Hann
    ang = 2.0 * np.pi * np.outer(n, f) / n_fft
    cosb = (np.cos(ang) * win[:, None]).astype(np.float32)     # window folded in
    sinb = (np.sin(ang) * win[:, None]).astype(np.float32)

    # torchaudio melscale_fbanks(mel_scale='htk', norm='slaney')
    all_freqs = np.linspace(0.0, sr // 2, n_freqs)

    def hz_to_mel(x):
        return 2595.0 * np.log10(1.0 + x / 700.0)

    def mel_to_hz(m):
        return 700.0 * (10.0 ** (m / 2595.0) - 1.0)

    m_pts = np.linspace(hz_to_mel(0.0), hz_to_mel(float(sr // 2)), n_mels + 2)
    f_pts = mel_to_hz(m_pts)
    f_diff = f_pts[1:] - f_pts[:-1]
    slopes = f_pts[None, :] - all_freqs[:, None]
    down = -slopes[:, :-2] / f_diff[:-1]
    up = slopes[:, 2:] / f_diff[1:]
    fb = np.maximum(0.0, np.minimum(down, up))                 # (n_freqs, n_mels)
    enorm = 2.0 / (f_pts[2:n_mels + 2] - f_pts[:n_mels])       # slaney norm
    fb = (fb * enorm[None, :]).astype(np.float32)

    # Pad the FFT-bin axis to a lane multiple (513 -> 640) and concatenate
    # cos|sin into a single MXU RHS (one weight push covers the whole STFT).
    n_pad = _round_up(n_freqs, lane) - n_freqs
    cosb = np.pad(cosb, ((0, 0), (0, n_pad)))
    sinb = np.pad(sinb, ((0, 0), (0, n_pad)))
    fb = np.pad(fb, ((0, n_pad), (0, 0)))
    cs = np.concatenate([cosb, sinb], axis=1)
    return (jnp.asarray(cs, dtype=jnp.bfloat16),
            jnp.asarray(fb, dtype=jnp.bfloat16))


if __name__ == "__main__":
    B, L, H_FEAT = 2, 4096, 32
    SR, N_FFT, HOP = 16000, 1024, 512
    PAD = N_FFT // 2
    T = L // HOP + 1                    # frames (center STFT == conv output len)
    N_FLAT = T * _N_MELS

    key = jax.random.PRNGKey(0)
    ks = jax.random.split(key, 20)

    # inputs
    x = 0.1 * jax.random.normal(ks[0], (B, L), jnp.float32)
    metadata = jnp.array([3, 7], dtype=jnp.int32)

    # wavegram (SeparableConv1d 1->128, k=1024, stride=512, pad=512) params;
    # depthwise (1024,) x pointwise (128,) is rank-1 -> one (1024,128) weight.
    w_dw1d = 0.02 * jax.random.normal(ks[1], (1, N_FFT), jnp.float32)
    w_pw1d = 0.5 * jax.random.normal(ks[2], (1, _N_MELS), jnp.float32)
    b_pw1d = 0.1 * jax.random.normal(ks[3], (1, _N_MELS), jnp.float32)
    w_wave_f32 = w_dw1d.reshape(N_FFT, 1) * w_pw1d

    # heatmap params (BN folded to eval-mode affine; BN scale folded into the
    # pointwise weights, dw3 folded into pw3).
    dw1 = (0.1 * jax.random.normal(ks[4], (2, 3, 3), jnp.float32)).reshape(2, 9)
    pw1 = 0.1 * jax.random.normal(ks[5], (16, 2), jnp.float32)
    bn1s = (1.0 + 0.1 * jax.random.normal(ks[6], (16,), jnp.float32)).reshape(16, 1)
    bn1b = (0.1 * jax.random.normal(ks[7], (16,), jnp.float32)).reshape(16, 1)
    dw2 = (0.1 * jax.random.normal(ks[8], (16, 3, 3), jnp.float32)).reshape(16, 9)
    pw2 = 0.1 * jax.random.normal(ks[9], (64, 16), jnp.float32)
    bn2s = (1.0 + 0.1 * jax.random.normal(ks[10], (64,), jnp.float32)).reshape(64, 1)
    bn2b = (0.1 * jax.random.normal(ks[11], (64,), jnp.float32)).reshape(64, 1)
    dw3 = (0.2 * jax.random.normal(ks[12], (64,), jnp.float32)).reshape(1, 64)
    pw3 = 0.1 * jax.random.normal(ks[13], (2, 64), jnp.float32)
    b3 = (0.1 * jax.random.normal(ks[14], (2,), jnp.float32)).reshape(2, 1)

    pw1_eff = pw1 * bn1s                                   # BN1 scale folded
    pw2_eff = (pw2 * bn2s).astype(jnp.bfloat16)            # BN2 scale folded
    pw3_eff = (pw3 * dw3).astype(jnp.bfloat16)             # dw3 folded into pw3
    hm_params = [dw1, pw1_eff, bn1b, dw2, pw2_eff, bn2b, pw3_eff, b3]

    # classifier stand-in + arcface params (W_arc pre-normalized; w1 reshaped
    # to (channel, mel, h) to match the in-kernel pooled layout)
    w1 = 0.05 * jax.random.normal(ks[15], (2 * _N_MELS, H_FEAT), jnp.float32)
    b1 = 0.05 * jax.random.normal(ks[16], (1, H_FEAT), jnp.float32)
    w2 = 0.1 * jax.random.normal(ks[17], (H_FEAT, 12), jnp.float32)
    b2 = 0.05 * jax.random.normal(ks[18], (1, 12), jnp.float32)
    w_arc = 0.1 * jax.random.normal(ks[19], (12, H_FEAT), jnp.float32)
    w_arc_t = w_arc.T                                            # (h, 12)
    wn_t = w_arc_t / jnp.maximum(
        jnp.sqrt(jnp.sum(w_arc_t * w_arc_t, axis=0, keepdims=True)), 1e-12)
    w1_3d = w1.reshape(2, _N_MELS, H_FEAT)
    head_consts = [w1_3d, b1, w2, b2, wn_t]

    cs, melfb = build_dft_and_mel(N_FFT, SR, _N_MELS)
    rhs = jnp.concatenate([cs, jnp.asarray(w_wave_f32, jnp.bfloat16)], axis=1)

    # ---- glue: STFT framing (reflect pad).  The wavegram shares the same
    # frames / matmul; reflect- and zero-padding differ only in the first and
    # last frame per clip, which are fixed up below with a tiny XLA matmul. ----
    x_bf = x.astype(jnp.bfloat16)
    pad_r = jnp.pad(x_bf, ((0, 0), (PAD, PAD)), mode="reflect")
    idx = jnp.arange(T)[:, None] * HOP + jnp.arange(N_FFT)[None, :]
    fr = pad_r[:, idx].reshape(B * T, N_FFT)
    # TODO(synk): for long clips, frame in-kernel (pl.ds on the padded
    #             waveform) instead of this XLA gather (frames duplicate it 2x).

    # ---- front-end kernel (log-mel + wavegram rows) ----
    logmel_rows, wav_rows = frontend_apply(fr, rhs, melfb, b_pw1d)

    # wavegram boundary fix-up (zero-pad vs reflect-pad differs only here)
    pad_z = jnp.pad(x, ((0, 0), (PAD, PAD)))
    fz_ends = jnp.stack([pad_z[:, :N_FFT],
                         pad_z[:, (T - 1) * HOP:(T - 1) * HOP + N_FFT]], axis=1)
    wav_ends = jnp.einsum("bfn,nm->bfm", fz_ends, w_wave_f32) + b_pw1d
    wav_bt = wav_rows.reshape(B, T, _N_MELS)
    wav_bt = wav_bt.at[:, 0].set(wav_ends[:, 0]).at[:, T - 1].set(wav_ends[:, 1])

    # Rows are already frame-major / mel-minor: build the heatmap input
    # directly, no transpose round trip through HBM.
    x_flat = jnp.stack([logmel_rows.reshape(B, N_FLAT),
                        wav_bt.reshape(B, N_FLAT)], axis=1)      # (B,2,T*128)

    # ---- fused, frame-tiled heatmap + attention-pool + head + ArcMargin ----
    one_hot = jax.nn.one_hot(metadata, 12, dtype=jnp.float32).reshape(B, 1, 12)
    hm_flat, feat3, out3, arc3 = heatmap_head_apply(
        x_flat, hm_params, head_consts, one_hot, tf=8)

    # NCHW module outputs (transpose applied once, only for the returned views)
    reppr = x_flat.reshape(B, 2, T, _N_MELS).transpose(0, 1, 3, 2)    # (B,2,128,T)
    heatmap = hm_flat.reshape(B, 2, T, _N_MELS).transpose(0, 1, 3, 2)
    features = feat3.reshape(B, H_FEAT)
    out_logits = out3.reshape(B, 12)
    arc_out = arc3.reshape(B, 12)

    results = (arc_out, out_logits, reppr, features, heatmap)
    jax.block_until_ready(results)
    assert arc_out.shape == (B, 12) and out_logits.shape == (B, 12)
    assert reppr.shape == (B, 2, _N_MELS, T) and heatmap.shape == (B, 2, _N_MELS, T)
    assert features.shape == (B, H_FEAT)
    assert bool(jnp.all(jnp.isfinite(arc_out)))
    assert bool(jnp.all(jnp.isfinite(heatmap)))
    print("KERNEL_OK")
</pallas_src>

<mosaic_0001>
module attributes {stable_mosaic.version = 11 : i64} {
  func.func @_frontend_kernel(%arg0: i32, %arg1: memref<24x1024xbf16, #tpu.memory_space<vmem>>, %arg2: memref<1024x1408xbf16, #tpu.memory_space<vmem>>, %arg3: memref<640x128xbf16, #tpu.memory_space<vmem>>, %arg4: memref<1x128xf32, #tpu.memory_space<vmem>>, %arg5: memref<24x128xf32, #tpu.memory_space<vmem>>, %arg6: memref<24x128xf32, #tpu.memory_space<vmem>>) attributes {dimension_semantics = [#tpu.dimension_semantics<parallel>], iteration_bounds = array<i64: 1>, scalar_prefetch = 0 : i64, scratch_operands = 0 : i64, tpu.core_type = #tpu.core_type<tc>, window_params = [{transform_indices = @transform_0, window_bounds = array<i64: 24, 1024>}, {pipeline_mode = #tpu.pipeline_mode<synchronous>, transform_indices = @transform_1, window_bounds = array<i64: 1024, 1408>}, {pipeline_mode = #tpu.pipeline_mode<synchronous>, transform_indices = @transform_2, window_bounds = array<i64: 640, 128>}, {pipeline_mode = #tpu.pipeline_mode<synchronous>, transform_indices = @transform_3, window_bounds = array<i64: 1, 128>}, {transform_indices = @transform_4, window_bounds = array<i64: 24, 128>}, {transform_indices = @transform_5, window_bounds = array<i64: 24, 128>}]} {
    %c0 = arith.constant 0 : index
    %c0_0 = arith.constant 0 : index
    %0 = vector.load %arg1[%c0, %c0_0] : memref<24x1024xbf16, #tpu.memory_space<vmem>>, vector<24x1024xbf16>
    %c0_1 = arith.constant 0 : index
    %c0_2 = arith.constant 0 : index
    %1 = vector.load %arg2[%c0_1, %c0_2] : memref<1024x1408xbf16, #tpu.memory_space<vmem>>, vector<1024x1408xbf16>
    %cst = arith.constant dense<0.000000e+00> : vector<24x1408xf32>
    %2 = tpu.matmul %0, %1, %cst {dimension_numbers = #tpu.dot_dimension_numbers<[1], [0], [0], [1], [0, 0, 1, 1], [], []>} : vector<24x1024xbf16>, vector<1024x1408xbf16>, vector<24x1408xf32> -> vector<24x1408xf32>
    %3 = vector.extract_strided_slice %2 {offsets = [0, 0], sizes = [24, 640], strides = [1, 1]} : vector<24x1408xf32> to vector<24x640xf32>
    %4 = vector.extract_strided_slice %2 {offsets = [0, 640], sizes = [24, 640], strides = [1, 1]} : vector<24x1408xf32> to vector<24x640xf32>
    %5 = arith.mulf %3, %3 : vector<24x640xf32>
    %6 = arith.mulf %4, %4 : vector<24x640xf32>
    %7 = arith.addf %5, %6 : vector<24x640xf32>
    %8 = arith.truncf %7 : vector<24x640xf32> to vector<24x640xbf16>
    %c0_3 = arith.constant 0 : index
    %c0_4 = arith.constant 0 : index
    %9 = vector.load %arg3[%c0_3, %c0_4] : memref<640x128xbf16, #tpu.memory_space<vmem>>, vector<640x128xbf16>
    %cst_5 = arith.constant dense<0.000000e+00> : vector<24x128xf32>
    %10 = tpu.matmul %8, %9, %cst_5 {dimension_numbers = #tpu.dot_dimension_numbers<[1], [0], [0], [1], [0, 0, 1, 1], [], []>} : vector<24x640xbf16>, vector<640x128xbf16>, vector<24x128xf32> -> vector<24x128xf32>
    %cst_6 = arith.constant 9.99999993E-9 : f32
    %11 = vector.broadcast %cst_6 : f32 to vector<24x128xf32>
    %12 = arith.addf %10, %11 : vector<24x128xf32>
    %13 = math.log %12 : vector<24x128xf32>
    %cst_7 = arith.constant 4.34294462 : f32
    %14 = vector.broadcast %cst_7 : f32 to vector<24x128xf32>
    %15 = arith.mulf %14, %13 : vector<24x128xf32>
    %c0_8 = arith.constant 0 : index
    %c0_9 = arith.constant 0 : index
    %16 = vector.load %arg5[%c0_8, %c0_9] : memref<24x128xf32, #tpu.memory_space<vmem>>, vector<24x128xf32>
    tpu.vector_store %arg5[%c0_8, %c0_9], %15 {strides = array<i32>} : memref<24x128xf32, #tpu.memory_space<vmem>>, vector<24x128xf32>,
    %17 = vector.extract_strided_slice %2 {offsets = [0, 1280], sizes = [24, 128], strides = [1, 1]} : vector<24x1408xf32> to vector<24x128xf32>
    %c0_10 = arith.constant 0 : index
    %c0_11 = arith.constant 0 : index
    %18 = vector.load %arg4[%c0_10, %c0_11] : memref<1x128xf32, #tpu.memory_space<vmem>>, vector<1x128xf32>
    %19 = vector.broadcast %18 : vector<1x128xf32> to vector<24x128xf32>
    %20 = arith.addf %17, %19 : vector<24x128xf32>
    %c0_12 = arith.constant 0 : index
    %c0_13 = arith.constant 0 : index
    %21 = vector.load %arg6[%c0_12, %c0_13] : memref<24x128xf32, #tpu.memory_space<vmem>>, vector<24x128xf32>
    tpu.vector_store %arg6[%c0_12, %c0_13], %20 {strides = array<i32>} : memref<24x128xf32, #tpu.memory_space<vmem>>, vector<24x128xf32>,
    return
  }
  func.func @transform_0(%arg0: i32) -> (i32, i32) {
    %c0_i32 = arith.constant 0 : i32
    %c0_i32_0 = arith.constant 0 : i32
    return %arg0, %c0_i32 : i32, i32
  }
  func.func @transform_1(%arg0: i32) -> (i32, i32) {
    %c0_i32 = arith.constant 0 : i32
    %c0_i32_0 = arith.constant 0 : i32
    %c0_i32_1 = arith.constant 0 : i32
    return %c0_i32, %c0_i32_0 : i32, i32
  }
  func.func @transform_2(%arg0: i32) -> (i32, i32) {
    %c0_i32 = arith.constant 0 : i32
    %c0_i32_0 = arith.constant 0 : i32
    %c0_i32_1 = arith.constant 0 : i32
    return %c0_i32, %c0_i32_0 : i32, i32
  }
  func.func @transform_3(%arg0: i32) -> (i32, i32) {
    %c0_i32 = arith.constant 0 : i32
    %c0_i32_0 = arith.constant 0 : i32
    %c0_i32_1 = arith.constant 0 : i32
    return %c0_i32, %c0_i32_0 : i32, i32
  }
  func.func @transform_4(%arg0: i32) -> (i32, i32) {
    %c0_i32 = arith.constant 0 : i32
    %c0_i32_0 = arith.constant 0 : i32
    return %arg0, %c0_i32 : i32, i32
  }
  func.func @transform_5(%arg0: i32) -> (i32, i32) {
    %c0_i32 = arith.constant 0 : i32
    %c0_i32_0 = arith.constant 0 : i32
    return %arg0, %c0_i32 : i32, i32
  }
}

</mosaic_0001>

<bundles_post_ra>
// kernel: tpu_custom_call.1
= control target key start
LH: loop header
LB: loop body
LE: loop exit
PB: predicated region body
PF: predicated region fallthrough
CT: control target
= control target key end

     0   :  { %11 = vsyncpa [#allocation3], 0  ;;  %s8967_s0 = inlined_call_operand.hbm [shape: bf16[24,1024], index: 0, kind: input, shape index: {}]   ;;  %s8968_s1 = inlined_call_operand.hbm [shape: bf16[1024,1408], index: 1, kind: input, shape index: {}]   ;;  %s8969_s2 = inlined_call_operand.hbm [shape: bf16[640,128], index: 2, kind: input, shape index: {}]   ;;  %s8970_s3 = inlined_call_operand.hbm [shape: f32[1,128], index: 3, kind: input, shape index: {}]   ;;  %s8971_s4 = inlined_call_operand.hbm [shape: f32[24,128], index: 4, kind: output, shape index: {0}]   ;;  %s8972_s5 = inlined_call_operand.hbm [shape: f32[24,128], index: 5, kind: output, shape index: {1}]  }
   0x1   :  { %12 = vsyncpa [#allocation6], 0 }
   0x2   :  { %13 = vsyncpa [#allocation9], 0 }
   0x3   :  { %14 = vsyncpa [#allocation4], 0 }
   0x4   :  { %15 = vsyncpa [#allocation12], 0  ;;  %s8611_s18 = smov [#allocation5]   ;;  %s8469_s22 = scalar_lea.hbm %s8968_s1, 90112 }
   0x5   :  { %s33_s19 = sshll.u32 %s8611_s18, 4  ;;  %p8470_p0 = scmp.ne.s32.totalorder %s8968_s1, %s8469_s22  ;;  %s34_s19 = int_to_ptr.vmem [resolvable:$true] %s33_s19 }
   0x6   :  { %p8473_p1 = scmp.lt.u32.totalorder %s8469_s22, %s8968_s1 }
   0x8   :  { %p8475_p2 = pnand %p8473_p1, %p8470_p0 }
   0xa   :  { %8478 = shalt.err (!%p8475_p2)
}
   0xb   :  { %s8479_s27 = scalar_lea.vmem %s34_s19, 90112  ;;  %p8484_p4 = scmp.lt.s32.totalorder %s34_s19, %s34_s19 }
   0xc   :  { %p8480_p3 = scmp.ne.s32.totalorder %s34_s19, %s8479_s27  ;;  %p8485_p5 = scmp.lt.s32.totalorder %s8479_s27, %s8479_s27 }
   0xe   :  { %p8486_p6 = por %p8485_p5, %p8484_p4 }
  0x10   :  { %p8487_p7 = pnand %p8486_p6, %p8480_p3 }
  0x12   :  { %8490 = shalt.err (!%p8487_p7)
}
  0x13   :  { %s8612_s28 = smov 704   ;;  %s8613_s29 = smov 44  }
  0x14   :  { %39 = dma.hbm_to_vmem [thread:$0]  %s8968_s1, 90112, %s34_s19, [#allocation6], %s8612_s28, %s8612_s28, %s8613_s29  }
  0x15   :  { %s8614_s7 = smov [#allocation2]   ;;  %s8491_s11 = scalar_lea.hbm %s8967_s0, 1536 }
  0x16   :  { %s21_s8 = sshll.u32 %s8614_s7, 4  ;;  %p8492_p8 = scmp.ne.s32.totalorder %s8967_s0, %s8491_s11  ;;  %s22_s8 = int_to_ptr.vmem [resolvable:$true] %s21_s8 }
  0x17   :  { %p8495_p9 = scmp.lt.u32.totalorder %s8491_s11, %s8967_s0 }
  0x19   :  { %p8497_p10 = pnand %p8495_p9, %p8492_p8 }
  0x1b   :  { %8500 = shalt.err (!%p8497_p10)
}
  0x1c   :  { %s8501_s16 = scalar_lea.vmem %s22_s8, 1536  ;;  %p8506_p12 = scmp.lt.s32.totalorder %s22_s8, %s22_s8 }
  0x1d   :  { %p8502_p11 = scmp.ne.s32.totalorder %s22_s8, %s8501_s16  ;;  %p8507_p13 = scmp.lt.s32.totalorder %s8501_s16, %s8501_s16 }
  0x1f   :  { %p8508_p0 = por %p8507_p13, %p8506_p12 }
  0x21   :  { %p8509_p1 = pnand %p8508_p0, %p8502_p11 }
  0x23   :  { %8512 = shalt.err (!%p8509_p1)
}
  0x24   :  { %s8615_s1 = smov 512   ;;  %s8616_s17 = smov 32  }
  0x25   :  { %27 = dma.hbm_to_vmem [thread:$0]  %s8967_s0, 1536, %s22_s8, [#allocation3], %s8615_s1, %s8615_s1, %s8616_s17  }
  0x26   :  { %s8617_s20 = smov [#allocation7]   ;;  %s8513_s24 = scalar_lea.hbm %s8969_s2, 5120 }
  0x27   :  { %s45_s21 = sshll.u32 %s8617_s20, 4  ;;  %p8514_p2 = scmp.ne.s32.totalorder %s8969_s2, %s8513_s24  ;;  %s46_s21 = int_to_ptr.vmem [resolvable:$true] %s45_s21 }
  0x28   :  { %p8517_p3 = scmp.lt.u32.totalorder %s8513_s24, %s8969_s2 }
  0x2a   :  { %p8519_p4 = pnand %p8517_p3, %p8514_p2 }
  0x2c   :  { %8522 = shalt.err (!%p8519_p4)
}
  0x2d   :  { %s8523_s29 = scalar_lea.vmem %s46_s21, 5120  ;;  %p8528_p6 = scmp.lt.s32.totalorder %s46_s21, %s46_s21 }
  0x2e   :  { %p8524_p5 = scmp.ne.s32.totalorder %s46_s21, %s8523_s29  ;;  %p8529_p7 = scmp.lt.s32.totalorder %s8523_s29, %s8523_s29 }
  0x30   :  { %p8530_p8 = por %p8529_p7, %p8528_p6 }
  0x32   :  { %p8531_p9 = pnand %p8530_p8, %p8524_p5 }
  0x34   :  { %8534 = shalt.err (!%p8531_p9)
}
  0x35   :  { %s8618_s0 = smov 64   ;;  %s8619_s30 = smov 4  }
  0x36   :  { %51 = dma.hbm_to_vmem [thread:$0]  %s8969_s2, 5120, %s46_s21, [#allocation6], %s8618_s0, %s8618_s0, %s8619_s30  }
  0x37   :  { %s8620_s8 = smov [#allocation8]   ;;  %s8535_s12 = scalar_lea.hbm %s8970_s3, 16 }
  0x38   :  { %s58_s9 = sshll.u32 %s8620_s8, 4  ;;  %p8536_p10 = scmp.ne.s32.totalorder %s8970_s3, %s8535_s12  ;;  %s59_s9 = int_to_ptr.vmem [resolvable:$true] %s58_s9 }
  0x39   :  { %p8539_p11 = scmp.lt.u32.totalorder %s8535_s12, %s8970_s3 }
  0x3b   :  { %p8541_p12 = pnand %p8539_p11, %p8536_p10 }
  0x3d   :  { %8544 = shalt.err (!%p8541_p12)
}
  0x3e   :  { %s8545_s1 = scalar_lea.vmem %s59_s9, 16  ;;  %s8549_s2 = scalar_lea.vmem %s59_s9, 32 }
  0x3f   :  { %p8546_p13 = scmp.ne.s32.totalorder %s59_s9, %s8545_s1  ;;  %p8550_p0 = scmp.lt.s32.totalorder %s59_s9, %s59_s9 }
  0x40   :  { %p8551_p1 = scmp.lt.s32.totalorder %s8549_s2, %s8545_s1 }
  0x42   :  { %p8552_p2 = por %p8551_p1, %p8550_p0 }
  0x44   :  { %p8553_p3 = pnand %p8552_p2, %p8546_p13 }
  0x46   :  { %8556 = shalt.err (!%p8553_p3)
}
  0x47   :  { %61 = dma.hbm_to_vmem [thread:$0]  %s8970_s3, 16, %s59_s9, [#allocation9]  }
  0x48   :  { %8601 = dma.done.wait [#allocation3], 1536  }
  0x49   :  { %8602 = vsyncadd [#allocation3], 4294965760 }
  0x4a   :  { %8603 = dma.done.wait [#allocation6], 95232  }
  0x4b   :  { %8604 = vsyncadd [#allocation6], 4294872064 }
  0x4c   :  { %8605 = dma.done.wait [#allocation9], 16  }
  0x4d   :  { %8606 = vsyncadd [#allocation9], 4294967280  ;;  %v7391_v0 = vld [vmem:[#allocation5 + $0x4] ss:$44 sps:$4 sm:$0xff]   ;;  %v7393_v1 = vld [vmem:[#allocation5 + $0xc] ss:$44 sps:$4 sm:$0xff]  }
  0x4e   :  { %4507 = vmatprep.subr.bf16.mxu0 %v7391_v0  ;;  %v7395_v2 = vld [vmem:[#allocation5] ss:$44 sps:$4 sm:$0xff]   ;;  %v7396_v3 = vld [vmem:[#allocation5 + $0x8] ss:$44 sps:$4 sm:$0xff]   ;;  %4711 = vmatprep.subr.bf16.mxu1 %v7393_v1  ;;  %v7399_v5 = vld [vmem:[#allocation5 + $0x64] ss:$44 sps:$4 sm:$0xff]  }
  0x4f   :  { %v7397_v4 = vld [vmem:[#allocation5 + $0x5c] ss:$44 sps:$4 sm:$0xff]   ;;  %4508 = vmatpush1.bf16.msra.mxu0 %v7395_v2  ;;  %4712 = vmatpush1.bf16.msra.mxu1 %v7396_v3  ;;  %v7401_v6 = vld [vmem:[#allocation5 + $0x58] ss:$44 sps:$4 sm:$0xff]   ;;  %v7402_v7 = vld [vmem:[#allocation5 + $0x60] ss:$44 sps:$4 sm:$0xff]  }
  0x50   :  { %4509 = vmatprep.subr.bf16.mxu0 %v7397_v4  ;;  %4713 = vmatprep.subr.bf16.mxu1 %v7399_v5  ;;  %v7403_v8 = vld [vmem:[#allocation5 + $0xb4] ss:$44 sps:$4 sm:$0xff]   ;;  %v7405_v9 = vld [vmem:[#allocation5 + $0xbc] ss:$44 sps:$4 sm:$0xff]   ;;  %v7408_v11 = vld [vmem:[#allocation5 + $0xb8] ss:$44 sps:$4 sm:$0xff]  }
  0x51   :  { %v7407_v10 = vld [vmem:[#allocation5 + $0xb0] ss:$44 sps:$4 sm:$0xff]   ;;  %v7409_v12 = vld [vmem:[#allocation5 + $0x10c] ss:$44 sps:$4 sm:$0xff]   ;;  %v7411_v13 = vld [vmem:[#allocation5 + $0x114] ss:$44 sps:$4 sm:$0xff]  }
  0x52   :  { %v7413_v14 = vld [vmem:[#allocation5 + $0x108] ss:$44 sps:$4 sm:$0xff]   ;;  %v7414_v15 = vld [vmem:[#allocation5 + $0x110] ss:$44 sps:$4 sm:$0xff]   ;;  %v7417_v17 = vld [vmem:[#allocation5 + $0x16c] ss:$44 sps:$4 sm:$0xff]  }
  0x53   :  { %4510 = vmatpush1.bf16.msra.mxu0 %v7401_v6  ;;  %4714 = vmatpush1.bf16.msra.mxu1 %v7402_v7  ;;  %v7415_v16 = vld [vmem:[#allocation5 + $0x164] ss:$44 sps:$4 sm:$0xff]   ;;  %v7419_v18 = vld [vmem:[#allocation5 + $0x160] ss:$44 sps:$4 sm:$0xff]   ;;  %v7420_v19 = vld [vmem:[#allocation5 + $0x168] ss:$44 sps:$4 sm:$0xff]  }
  0x54   :  { %4511 = vmatprep.subr.bf16.mxu0 %v7403_v8  ;;  %4715 = vmatprep.subr.bf16.mxu1 %v7405_v9  ;;  %v7421_v20 = vld [vmem:[#allocation5 + $0x1bc] ss:$44 sps:$4 sm:$0xff]   ;;  %v7423_v21 = vld [vmem:[#allocation5 + $0x1c4] ss:$44 sps:$4 sm:$0xff]   ;;  %v7426_v23 = vld [vmem:[#allocation5 + $0x1c0] ss:$44 sps:$4 sm:$0xff]  }
  0x55   :  { %v7425_v22 = vld [vmem:[#allocation5 + $0x1b8] ss:$44 sps:$4 sm:$0xff]   ;;  %v7427_v24 = vld [vmem:[#allocation5 + $0x214] ss:$44 sps:$4 sm:$0xff]   ;;  %v7429_v25 = vld [vmem:[#allocation5 + $0x21c] ss:$44 sps:$4 sm:$0xff]  }
  0x56   :  { %v7431_v26 = vld [vmem:[#allocation5 + $0x210] ss:$44 sps:$4 sm:$0xff]   ;;  %v7432_v27 = vld [vmem:[#allocation5 + $0x218] ss:$44 sps:$4 sm:$0xff]   ;;  %v7435_v29 = vld [vmem:[#allocation5 + $0x274] ss:$44 sps:$4 sm:$0xff]  }
  0x57   :  { %4512 = vmatpush1.bf16.msra.mxu0 %v7407_v10  ;;  %4716 = vmatpush1.bf16.msra.mxu1 %v7408_v11  ;;  %v7433_v28 = vld [vmem:[#allocation5 + $0x26c] ss:$44 sps:$4 sm:$0xff]   ;;  %v7437_v30 = vld [vmem:[#allocation5 + $0x268] ss:$44 sps:$4 sm:$0xff]   ;;  %v7438_v31 = vld [vmem:[#allocation5 + $0x270] ss:$44 sps:$4 sm:$0xff]  }
  0x58   :  { %4513 = vmatprep.subr.bf16.mxu0 %v7409_v12  ;;  %4717 = vmatprep.subr.bf16.mxu1 %v7411_v13  ;;  %v7439_v32 = vld [vmem:[#allocation5 + $0x2c4] ss:$44 sps:$4 sm:$0xff]   ;;  %v7441_v33 = vld [vmem:[#allocation5 + $0x2cc] ss:$44 sps:$4 sm:$0xff]   ;;  %v7444_v35 = vld [vmem:[#allocation5 + $0x2c8] ss:$44 sps:$4 sm:$0xff]  }
  0x59   :  { %v7443_v34 = vld [vmem:[#allocation5 + $0x2c0] ss:$44 sps:$4 sm:$0xff]   ;;  %v7445_v36 = vld [vmem:[#allocation5 + $0x31c] ss:$44 sps:$4 sm:$0xff]   ;;  %v7447_v37 = vld [vmem:[#allocation5 + $0x324] ss:$44 sps:$4 sm:$0xff]  }
  0x5a   :  { %v7449_v38 = vld [vmem:[#allocation5 + $0x318] ss:$44 sps:$4 sm:$0xff]   ;;  %v7450_v39 = vld [vmem:[#allocation5 + $0x320] ss:$44 sps:$4 sm:$0xff]   ;;  %v7453_v41 = vld [vmem:[#allocation5 + $0x37c] ss:$44 sps:$4 sm:$0xff]  }
  0x5b   :  { %4514 = vmatpush1.bf16.msra.mxu0 %v7413_v14  ;;  %4718 = vmatpush1.bf16.msra.mxu1 %v7414_v15  ;;  %v7451_v40 = vld [vmem:[#allocation5 + $0x374] ss:$44 sps:$4 sm:$0xff]   ;;  %v7455_v42 = vld [vmem:[#allocation5 + $0x370] ss:$44 sps:$4 sm:$0xff]   ;;  %v7456_v43 = vld [vmem:[#allocation5 + $0x378] ss:$44 sps:$4 sm:$0xff]  }
  0x5c   :  { %4515 = vmatprep.subr.bf16.mxu0 %v7415_v16  ;;  %4719 = vmatprep.subr.bf16.mxu1 %v7417_v17  ;;  %v7457_v44 = vld [vmem:[#allocation5 + $0x3cc] ss:$44 sps:$4 sm:$0xff]   ;;  %v7459_v45 = vld [vmem:[#allocation5 + $0x3d4] ss:$44 sps:$4 sm:$0xff]   ;;  %v7462_v49 = vld [vmem:[#allocation5 + $0x3d0] ss:$44 sps:$4 sm:$0xff]  }
  0x5d   :  { %v75_v46 = vld [vmem:[#allocation2] sm:$0xff]  ;;  %v7461_v48 = vld [vmem:[#allocation5 + $0x3c8] ss:$44 sps:$4 sm:$0xff]   ;;  %v7465_v52 = vld [vmem:[#allocation5 + $0x42c] ss:$44 sps:$4 sm:$0xff]   ;;  %s8621_s3 = smov [#allocation11]  }
  0x5e   :  { %v79_v47 = vld [vmem:[#allocation2 + $0x20] sm:$0xff]  ;;  %v7468_v54 = vld [vmem:[#allocation5 + $0x428] ss:$44 sps:$4 sm:$0xff]   ;;  %v7479_v61 = vld [vmem:[#allocation5 + $0x4d0] ss:$44 sps:$4 sm:$0xff]   ;;  %s6280_s19 = sshll.u32 %s8621_s3, 4  ;;  %s6281_s19 = int_to_ptr.vmem [resolvable:$true] %s6280_s19 }
  0x5f   :  { %4516 = vmatpush1.bf16.msra.mxu0 %v7419_v18  ;;  %4720 = vmatpush1.bf16.msra.mxu1 %v7420_v19  ;;  %v8703_v50 = vcombine.high %v75_v46, %v79_v47  ;;  %v7463_v51 = vld [vmem:[#allocation5 + $0x424] ss:$44 sps:$4 sm:$0xff]   ;;  %v7467_v53 = vld [vmem:[#allocation5 + $0x420] ss:$44 sps:$4 sm:$0xff]   ;;  %v7469_v55 = vld [vmem:[#allocation5 + $0x47c] ss:$44 sps:$4 sm:$0xff]   ;;  %v8707_v5 = vcombine.low %v75_v46, %v79_v47  ;;  %p8562_p5 = scmp.lt.s32.totalorder %s6281_s19, %s6281_s19 }
  0x60   :  { %4517 = vmatprep.subr.bf16.mxu0 %v7421_v20  ;;  %4721 = vmatprep.subr.bf16.mxu1 %v7423_v21  ;;  %v7471_v56 = vld [vmem:[#allocation5 + $0x484] ss:$44 sps:$4 sm:$0xff]   ;;  %v7474_v58 = vld [vmem:[#allocation5 + $0x480] ss:$44 sps:$4 sm:$0xff]   ;;  %v7477_v60 = vld [vmem:[#allocation5 + $0x4dc] ss:$44 sps:$4 sm:$0xff]  }
  0x61   :  { %4539 = vmatprep.mubr.bf16.mxu0 %v8703_v50  ;;  %4743 = vmatprep.mubr.bf16.mxu1 %v8703_v50  ;;  %v7473_v57 = vld [vmem:[#allocation5 + $0x478] ss:$44 sps:$4 sm:$0xff]   ;;  %v7475_v59 = vld [vmem:[#allocation5 + $0x4d4] ss:$44 sps:$4 sm:$0xff]   ;;  %v7486_v2 = vld [vmem:[#allocation5 + $0x530] ss:$44 sps:$4 sm:$0xff]  }
  0x62   :  { %v7480_v62 = vld [vmem:[#allocation5 + $0x4d8] ss:$44 sps:$4 sm:$0xff]   ;;  %v7483_v0 = vld [vmem:[#allocation5 + $0x534] ss:$44 sps:$4 sm:$0xff]   ;;  %v7495_v8 = vld [vmem:[#allocation5 + $0x5dc] ss:$44 sps:$4 sm:$0xff]  }
  0x63   :  { %4518 = vmatpush1.bf16.msra.mxu0 %v7425_v22  ;;  %4722 = vmatpush1.bf16.msra.mxu1 %v7426_v23  ;;  %v7481_v63 = vld [vmem:[#allocation5 + $0x52c] ss:$44 sps:$4 sm:$0xff]   ;;  %v7485_v1 = vld [vmem:[#allocation5 + $0x528] ss:$44 sps:$4 sm:$0xff]   ;;  %v7489_v3 = vld [vmem:[#allocation5 + $0x584] ss:$44 sps:$4 sm:$0xff]  }
  0x64   :  { %4519 = vmatprep.subr.bf16.mxu0 %v7427_v24  ;;  %4723 = vmatprep.subr.bf16.mxu1 %v7429_v25  ;;  %v7492_v4 = vld [vmem:[#allocation5 + $0x58c] ss:$44 sps:$4 sm:$0xff]   ;;  %v7490_v7 = vld [vmem:[#allocation5 + $0x588] ss:$44 sps:$4 sm:$0xff]   ;;  %v7498_v9 = vld [vmem:[#allocation5 + $0x5e4] ss:$44 sps:$4 sm:$0xff]  }
  0x65   :  { %v7487_v6 = vld [vmem:[#allocation5 + $0x580] ss:$44 sps:$4 sm:$0xff]   ;;  %v7493_v10 = vld [vmem:[#allocation5 + $0x5d8] ss:$44 sps:$4 sm:$0xff]   ;;  %v7504_v13 = vld [vmem:[#allocation5 + $0x63c] ss:$44 sps:$4 sm:$0xff]  }
  0x66   :  { %v7496_v11 = vld [vmem:[#allocation5 + $0x5e0] ss:$44 sps:$4 sm:$0xff]   ;;  %v7499_v14 = vld [vmem:[#allocation5 + $0x630] ss:$44 sps:$4 sm:$0xff]   ;;  %v7502_v15 = vld [vmem:[#allocation5 + $0x638] ss:$44 sps:$4 sm:$0xff]  }
  0x67   :  { %4520 = vmatpush1.bf16.msra.mxu0 %v7431_v26  ;;  %4724 = vmatpush1.bf16.msra.mxu1 %v7432_v27  ;;  %v7501_v12 = vld [vmem:[#allocation5 + $0x634] ss:$44 sps:$4 sm:$0xff]   ;;  %v7507_v16 = vld [vmem:[#allocation5 + $0x68c] ss:$44 sps:$4 sm:$0xff]   ;;  %v7508_v19 = vld [vmem:[#allocation5 + $0x690] ss:$44 sps:$4 sm:$0xff]  }
  0x68   :  { %4521 = vmatprep.subr.bf16.mxu0 %v7433_v28  ;;  %4725 = vmatprep.subr.bf16.mxu1 %v7435_v29  ;;  %v7510_v17 = vld [vmem:[#allocation5 + $0x694] ss:$44 sps:$4 sm:$0xff]   ;;  %v7513_v20 = vld [vmem:[#allocation5 + $0x6e4] ss:$44 sps:$4 sm:$0xff]   ;;  %v7516_v21 = vld [vmem:[#allocation5 + $0x6ec] ss:$44 sps:$4 sm:$0xff]  }
  0x69   :  { %v7505_v18 = vld [vmem:[#allocation5 + $0x688] ss:$44 sps:$4 sm:$0xff]   ;;  %v7511_v22 = vld [vmem:[#allocation5 + $0x6e0] ss:$44 sps:$4 sm:$0xff]   ;;  %v7522_v26 = vld [vmem:[#allocation5 + $0x744] ss:$44 sps:$4 sm:$0xff]  }
  0x6a   :  { %v7514_v23 = vld [vmem:[#allocation5 + $0x6e8] ss:$44 sps:$4 sm:$0xff]   ;;  %v83_v25 = vld [vmem:[#allocation2 + $0x40] sm:$0xff]  ;;  %s8557_s20 = scalar_lea.vmem %s6281_s19, 384 }
  0x6b   :  { %4522 = vmatpush1.bf16.msra.mxu0 %v7437_v30  ;;  %4726 = vmatpush1.bf16.msra.mxu1 %v7438_v31  ;;  %v7519_v24 = vld [vmem:[#allocation5 + $0x73c] ss:$44 sps:$4 sm:$0xff]   ;;  %v8711_v27 = vcombine.high %v83_v25, %v83_v25  ;;  %v8713_v28 = vcombine.low %v83_v25, %v83_v25  ;;  %v7517_v29 = vld [vmem:[#allocation5 + $0x738] ss:$44 sps:$4 sm:$0xff]   ;;  %v7520_v30 = vld [vmem:[#allocation5 + $0x740] ss:$44 sps:$4 sm:$0xff]   ;;  %p8558_p4 = scmp.ne.s32.totalorder %s6281_s19, %s8557_s20  ;;  %p8563_p6 = scmp.lt.s32.totalorder %s8557_s20, %s8557_s20 }
  0x6c   :  { %4523 = vmatprep.subr.bf16.mxu0 %v7439_v32  ;;  %4727 = vmatprep.subr.bf16.mxu1 %v7441_v33  ;;  %v7525_v31 = vld [vmem:[#allocation5 + $0x794] ss:$44 sps:$4 sm:$0xff]   ;;  %v7528_v32 = vld [vmem:[#allocation5 + $0x79c] ss:$44 sps:$4 sm:$0xff]   ;;  %v7546_v47 = vld [vmem:[#allocation5 + $0x8a4] ss:$44 sps:$4 sm:$0xff]  }
  0x6d   :  { %v8719_v33 = vld [vmem:[#allocation2 + $0x8] sm:$0xff]  ;;  %v7597_v25 = vld [vmem:[#allocation5 + $0xbb0] ss:$44 sps:$4 sm:$0xff]   ;;  %p8564_p7 = por %p8563_p6, %p8562_p5 }
  0x6e   :  { %v7543_v46 = vld [vmem:[#allocation5 + $0x89c] ss:$44 sps:$4 sm:$0xff]  }
  0x6f   :  { %4524 = vmatpush1.bf16.msra.mxu0 %v7443_v34  ;;  %4728 = vmatpush1.bf16.msra.mxu1 %v7444_v35  ;;  %v8721_v34 = vld [vmem:[#allocation2 + $0x28] sm:$0xff]  ;;  %v7523_v35 = vld [vmem:[#allocation5 + $0x790] ss:$44 sps:$4 sm:$0xff]   ;;  %p8565_p8 = pnand %p8564_p7, %p8558_p4 }
  0x70   :  { %4525 = vmatprep.subr.bf16.mxu0 %v7445_v36  ;;  %4729 = vmatprep.subr.bf16.mxu1 %v7447_v37  ;;  %v8725_v36 = vcombine.high %v8719_v33, %v8721_v34  ;;  %v7526_v37 = vld [vmem:[#allocation5 + $0x798] ss:$44 sps:$4 sm:$0xff]  }
  0x73   :  { %4526 = vmatpush1.bf16.msra.mxu0 %v7449_v38  ;;  %4730 = vmatpush1.bf16.msra.mxu1 %v7450_v39  ;;  %v7531_v38 = vld [vmem:[#allocation5 + $0x7ec] ss:$44 sps:$4 sm:$0xff]   ;;  %v7534_v39 = vld [vmem:[#allocation5 + $0x7f4] ss:$44 sps:$4 sm:$0xff]  }
  0x74   :  { %4527 = vmatprep.subr.bf16.mxu0 %v7451_v40  ;;  %4731 = vmatprep.subr.bf16.mxu1 %v7453_v41  ;;  %v7529_v40 = vld [vmem:[#allocation5 + $0x7e8] ss:$44 sps:$4 sm:$0xff]   ;;  %v7532_v41 = vld [vmem:[#allocation5 + $0x7f0] ss:$44 sps:$4 sm:$0xff]  }
  0x77   :  { %4528 = vmatpush1.bf16.msra.mxu0 %v7455_v42  ;;  %4732 = vmatpush1.bf16.msra.mxu1 %v7456_v43  ;;  %v7537_v42 = vld [vmem:[#allocation5 + $0x844] ss:$44 sps:$4 sm:$0xff]   ;;  %v7540_v43 = vld [vmem:[#allocation5 + $0x84c] ss:$44 sps:$4 sm:$0xff]  }
  0x78   :  { %4529 = vmatprep.subr.bf16.mxu0 %v7457_v44  ;;  %4733 = vmatprep.subr.bf16.mxu1 %v7459_v45  ;;  %v7535_v44 = vld [vmem:[#allocation5 + $0x840] ss:$44 sps:$4 sm:$0xff]   ;;  %v7538_v45 = vld [vmem:[#allocation5 + $0x848] ss:$44 sps:$4 sm:$0xff]  }
  0x7b   :  { %4530 = vmatpush1.bf16.msra.mxu0 %v7461_v48  ;;  %4734 = vmatpush1.bf16.msra.mxu1 %v7462_v49  ;;  %v7541_v48 = vld [vmem:[#allocation5 + $0x898] ss:$44 sps:$4 sm:$0xff]   ;;  %v7544_v49 = vld [vmem:[#allocation5 + $0x8a0] ss:$44 sps:$4 sm:$0xff]  }
  0x7c   :  { %4531 = vmatprep.subr.bf16.mxu0 %v7463_v51  ;;  %4735 = vmatprep.subr.bf16.mxu1 %v7465_v52  ;;  %v7549_v51 = vld [vmem:[#allocation5 + $0x8f4] ss:$44 sps:$4 sm:$0xff]   ;;  %v7552_v52 = vld [vmem:[#allocation5 + $0x8fc] ss:$44 sps:$4 sm:$0xff]  }
  0x7f   :  { %4532 = vmatpush1.bf16.msra.mxu0 %v7467_v53  ;;  %4736 = vmatpush1.bf16.msra.mxu1 %v7468_v54  ;;  %v7547_v53 = vld [vmem:[#allocation5 + $0x8f0] ss:$44 sps:$4 sm:$0xff]   ;;  %v7550_v54 = vld [vmem:[#allocation5 + $0x8f8] ss:$44 sps:$4 sm:$0xff]  }
  0x80   :  { %4533 = vmatprep.subr.bf16.mxu0 %v7469_v55  ;;  %4737 = vmatprep.subr.bf16.mxu1 %v7471_v56  ;;  %v7555_v55 = vld [vmem:[#allocation5 + $0x94c] ss:$44 sps:$4 sm:$0xff]   ;;  %v7558_v56 = vld [vmem:[#allocation5 + $0x954] ss:$44 sps:$4 sm:$0xff]  }
  0x83   :  { %4534 = vmatpush1.bf16.msra.mxu0 %v7473_v57  ;;  %4738 = vmatpush1.bf16.msra.mxu1 %v7474_v58  ;;  %v7553_v57 = vld [vmem:[#allocation5 + $0x948] ss:$44 sps:$4 sm:$0xff]   ;;  %v7556_v58 = vld [vmem:[#allocation5 + $0x950] ss:$44 sps:$4 sm:$0xff]  }
  0x84   :  { %4535 = vmatprep.subr.bf16.mxu0 %v7475_v59  ;;  %4739 = vmatprep.subr.bf16.mxu1 %v7477_v60  ;;  %v7561_v59 = vld [vmem:[#allocation5 + $0x9a4] ss:$44 sps:$4 sm:$0xff]   ;;  %v7564_v60 = vld [vmem:[#allocation5 + $0x9ac] ss:$44 sps:$4 sm:$0xff]  }
  0x87   :  { %4536 = vmatpush1.bf16.msra.mxu0 %v7479_v61  ;;  %4740 = vmatpush1.bf16.msra.mxu1 %v7480_v62  ;;  %v7559_v61 = vld [vmem:[#allocation5 + $0x9a0] ss:$44 sps:$4 sm:$0xff]   ;;  %v7562_v62 = vld [vmem:[#allocation5 + $0x9a8] ss:$44 sps:$4 sm:$0xff]  }
  0x88   :  { %4537 = vmatprep.subr.bf16.mxu0 %v7481_v63  ;;  %4741 = vmatprep.subr.bf16.mxu1 %v7483_v0  ;;  %v7567_v63 = vld [vmem:[#allocation5 + $0x9fc] ss:$44 sps:$4 sm:$0xff]   ;;  %v7570_v0 = vld [vmem:[#allocation5 + $0xa04] ss:$44 sps:$4 sm:$0xff]  }
  0x8b   :  { %4538 = vmatpush1.bf16.msra.mxu0 %v7485_v1  ;;  %4742 = vmatpush1.bf16.msra.mxu1 %v7486_v2  ;;  %v7565_v1 = vld [vmem:[#allocation5 + $0x9f8] ss:$44 sps:$4 sm:$0xff]   ;;  %v7568_v2 = vld [vmem:[#allocation5 + $0xa00] ss:$44 sps:$4 sm:$0xff]  }
  0x8c   :  { %4558 = vmatprep.subr.bf16.mxu0 %v7489_v3  ;;  %4762 = vmatprep.subr.bf16.mxu1 %v7492_v4  ;;  %v7574_v3 = vld [vmem:[#allocation5 + $0xa54] ss:$44 sps:$4 sm:$0xff]   ;;  %v7577_v4 = vld [vmem:[#allocation5 + $0xa5c] ss:$44 sps:$4 sm:$0xff]  }
  0x8e   :  { %4540 = vmatmul.mubr.bf16.vlgmr.msra.gmra.mrb[0].mxu0 %v8707_v5  ;;  %4744 = vmatmul.mubr.bf16.vlgmr.msra.gmra.mrb[0].mxu1 %v8707_v5 }
  0x8f   :  { %4559 = vmatpush1.bf16.msra.mxu0 %v7487_v6  ;;  %4763 = vmatpush1.bf16.msra.mxu1 %v7490_v7  ;;  %v7572_v6 = vld [vmem:[#allocation5 + $0xa50] ss:$44 sps:$4 sm:$0xff]   ;;  %v7575_v7 = vld [vmem:[#allocation5 + $0xa58] ss:$44 sps:$4 sm:$0xff]  }
  0x90   :  { %4560 = vmatprep.subr.bf16.mxu0 %v7495_v8  ;;  %4764 = vmatprep.subr.bf16.mxu1 %v7498_v9  ;;  %v7581_v8 = vld [vmem:[#allocation5 + $0xaac] ss:$44 sps:$4 sm:$0xff]   ;;  %v7584_v9 = vld [vmem:[#allocation5 + $0xab4] ss:$44 sps:$4 sm:$0xff]  }
  0x91   :  { %4549 = vmatprep.mubr.bf16.mxu0 %v8711_v27  ;;  %4753 = vmatprep.mubr.bf16.mxu1 %v8711_v27 }
  0x93   :  { %4561 = vmatpush1.bf16.msra.mxu0 %v7493_v10  ;;  %4765 = vmatpush1.bf16.msra.mxu1 %v7496_v11  ;;  %v7579_v10 = vld [vmem:[#allocation5 + $0xaa8] ss:$44 sps:$4 sm:$0xff]   ;;  %v7582_v11 = vld [vmem:[#allocation5 + $0xab0] ss:$44 sps:$4 sm:$0xff]  }
  0x94   :  { %4562 = vmatprep.subr.bf16.mxu0 %v7501_v12  ;;  %4766 = vmatprep.subr.bf16.mxu1 %v7504_v13  ;;  %v7587_v12 = vld [vmem:[#allocation5 + $0xb04] ss:$44 sps:$4 sm:$0xff]   ;;  %v7590_v13 = vld [vmem:[#allocation5 + $0xb0c] ss:$44 sps:$4 sm:$0xff]  }
  0x96   :  { %4550 = vmatmul.mubr.bf16.gmra.mrb[4].mxu0 %v8713_v28  ;;  %4754 = vmatmul.mubr.bf16.gmra.mrb[4].mxu1 %v8713_v28 }
  0x97   :  { %4563 = vmatpush1.bf16.msra.mxu0 %v7499_v14  ;;  %4767 = vmatpush1.bf16.msra.mxu1 %v7502_v15  ;;  %v8731_v14 = vcombine.low %v8719_v33, %v8721_v34  ;;  %v84_v15 = vld [vmem:[#allocation2 + $0x48] sm:$0xff]  ;;  %v7608_v33 = vld [vmem:[#allocation5 + $0xc14] ss:$44 sps:$4 sm:$0xff]  }
  0x98   :  { %4564 = vmatprep.subr.bf16.mxu0 %v7507_v16  ;;  %4768 = vmatprep.subr.bf16.mxu1 %v7510_v17  ;;  %v7585_v16 = vld [vmem:[#allocation5 + $0xb00] ss:$44 sps:$4 sm:$0xff]   ;;  %v7588_v17 = vld [vmem:[#allocation5 + $0xb08] ss:$44 sps:$4 sm:$0xff]  }
  0x99   :  { %4590 = vmatprep.mubr.bf16.mxu0 %v8725_v36  ;;  %4794 = vmatprep.mubr.bf16.mxu1 %v8725_v36 }
  0x9b   :  { %4565 = vmatpush1.bf16.msra.mxu0 %v7505_v18  ;;  %4769 = vmatpush1.bf16.msra.mxu1 %v7508_v19  ;;  %v7593_v18 = vld [vmem:[#allocation5 + $0xb5c] ss:$44 sps:$4 sm:$0xff]   ;;  %v7596_v19 = vld [vmem:[#allocation5 + $0xb64] ss:$44 sps:$4 sm:$0xff]  }
  0x9c   :  { %4566 = vmatprep.subr.bf16.mxu0 %v7513_v20  ;;  %4770 = vmatprep.subr.bf16.mxu1 %v7516_v21  ;;  %v8733_v20 = vcombine.high %v84_v15, %v84_v15  ;;  %v7591_v21 = vld [vmem:[#allocation5 + $0xb58] ss:$44 sps:$4 sm:$0xff]  }
  0x9f   :  { %4567 = vmatpush1.bf16.msra.mxu0 %v7511_v22  ;;  %4771 = vmatpush1.bf16.msra.mxu1 %v7514_v23  ;;  %v7594_v22 = vld [vmem:[#allocation5 + $0xb60] ss:$44 sps:$4 sm:$0xff]  }
  0xa0   :  { %4568 = vmatprep.subr.bf16.mxu0 %v7519_v24  ;;  %4772 = vmatprep.subr.bf16.mxu1 %v7522_v26  ;;  %v7599_v23 = vld [vmem:[#allocation5 + $0xbb4] ss:$44 sps:$4 sm:$0xff]   ;;  %v7602_v24 = vld [vmem:[#allocation5 + $0xbbc] ss:$44 sps:$4 sm:$0xff]   ;;  %v7600_v26 = vld [vmem:[#allocation5 + $0xbb8] ss:$44 sps:$4 sm:$0xff]  }
  0xa3   :  { %4569 = vmatpush1.bf16.msra.mxu0 %v7517_v29  ;;  %4773 = vmatpush1.bf16.msra.mxu1 %v7520_v30  ;;  %v8739_v29 = vcombine.low %v84_v15, %v84_v15  ;;  %v8741_v30 = vld [vmem:[#allocation2 + $0x10] sm:$0xff]  ;;  %v7663_v15 = vld [vmem:[#allocation5 + $0xf78] ss:$44 sps:$4 sm:$0xff]  }
  0xa4   :  { %4570 = vmatprep.subr.bf16.mxu0 %v7525_v31  ;;  %4774 = vmatprep.subr.bf16.mxu1 %v7528_v32  ;;  %v8743_v31 = vld [vmem:[#allocation2 + $0x30] sm:$0xff]  ;;  %v7605_v32 = vld [vmem:[#allocation5 + $0xc0c] ss:$44 sps:$4 sm:$0xff]  }
  0xa5   :  { %v8747_v34 = vcombine.high %v8741_v30, %v8743_v31 }
  0xa7   :  { %4571 = vmatpush1.bf16.msra.mxu0 %v7523_v35  ;;  %4775 = vmatpush1.bf16.msra.mxu1 %v7526_v37  ;;  %v7603_v35 = vld [vmem:[#allocation5 + $0xc08] ss:$44 sps:$4 sm:$0xff]   ;;  %v7606_v37 = vld [vmem:[#allocation5 + $0xc10] ss:$44 sps:$4 sm:$0xff]  }
  0xa8   :  { %4572 = vmatprep.subr.bf16.mxu0 %v7531_v38  ;;  %4776 = vmatprep.subr.bf16.mxu1 %v7534_v39  ;;  %v7611_v38 = vld [vmem:[#allocation5 + $0xc64] ss:$44 sps:$4 sm:$0xff]   ;;  %v7614_v39 = vld [vmem:[#allocation5 + $0xc6c] ss:$44 sps:$4 sm:$0xff]  }
  0xab   :  { %4573 = vmatpush1.bf16.msra.mxu0 %v7529_v40  ;;  %4777 = vmatpush1.bf16.msra.mxu1 %v7532_v41  ;;  %v7609_v40 = vld [vmem:[#allocation5 + $0xc60] ss:$44 sps:$4 sm:$0xff]   ;;  %v7612_v41 = vld [vmem:[#allocation5 + $0xc68] ss:$44 sps:$4 sm:$0xff]  }
  0xac   :  { %4574 = vmatprep.subr.bf16.mxu0 %v7537_v42  ;;  %4778 = vmatprep.subr.bf16.mxu1 %v7540_v43  ;;  %v7617_v42 = vld [vmem:[#allocation5 + $0xcbc] ss:$44 sps:$4 sm:$0xff]   ;;  %v7620_v43 = vld [vmem:[#allocation5 + $0xcc4] ss:$44 sps:$4 sm:$0xff]  }
  0xaf   :  { %4575 = vmatpush1.bf16.msra.mxu0 %v7535_v44  ;;  %4779 = vmatpush1.bf16.msra.mxu1 %v7538_v45  ;;  %v7615_v44 = vld [vmem:[#allocation5 + $0xcb8] ss:$44 sps:$4 sm:$0xff]   ;;  %v7618_v45 = vld [vmem:[#allocation5 + $0xcc0] ss:$44 sps:$4 sm:$0xff]  }
  0xb0   :  { %4576 = vmatprep.subr.bf16.mxu0 %v7543_v46  ;;  %4780 = vmatprep.subr.bf16.mxu1 %v7546_v47  ;;  %v7623_v46 = vld [vmem:[#allocation5 + $0xd14] ss:$44 sps:$4 sm:$0xff]   ;;  %v7626_v47 = vld [vmem:[#allocation5 + $0xd1c] ss:$44 sps:$4 sm:$0xff]  }
  0xb3   :  { %4577 = vmatpush1.bf16.msra.mxu0 %v7541_v48  ;;  %4781 = vmatpush1.bf16.msra.mxu1 %v7544_v49  ;;  %v7621_v48 = vld [vmem:[#allocation5 + $0xd10] ss:$44 sps:$4 sm:$0xff]   ;;  %v7624_v49 = vld [vmem:[#allocation5 + $0xd18] ss:$44 sps:$4 sm:$0xff]  }
  0xb4   :  { %4578 = vmatprep.subr.bf16.mxu0 %v7549_v51  ;;  %4782 = vmatprep.subr.bf16.mxu1 %v7552_v52  ;;  %v7629_v51 = vld [vmem:[#allocation5 + $0xd6c] ss:$44 sps:$4 sm:$0xff]   ;;  %v7632_v52 = vld [vmem:[#allocation5 + $0xd74] ss:$44 sps:$4 sm:$0xff]  }
  0xb7   :  { %4579 = vmatpush1.bf16.msra.mxu0 %v7547_v53  ;;  %4783 = vmatpush1.bf16.msra.mxu1 %v7550_v54  ;;  %v7627_v53 = vld [vmem:[#allocation5 + $0xd68] ss:$44 sps:$4 sm:$0xff]   ;;  %v7630_v54 = vld [vmem:[#allocation5 + $0xd70] ss:$44 sps:$4 sm:$0xff]  }
  0xb8   :  { %4580 = vmatprep.subr.bf16.mxu0 %v7555_v55  ;;  %4784 = vmatprep.subr.bf16.mxu1 %v7558_v56  ;;  %v7635_v55 = vld [vmem:[#allocation5 + $0xdc4] ss:$44 sps:$4 sm:$0xff]   ;;  %v7638_v56 = vld [vmem:[#allocation5 + $0xdcc] ss:$44 sps:$4 sm:$0xff]  }
  0xbb   :  { %4581 = vmatpush1.bf16.msra.mxu0 %v7553_v57  ;;  %4785 = vmatpush1.bf16.msra.mxu1 %v7556_v58  ;;  %v7633_v57 = vld [vmem:[#allocation5 + $0xdc0] ss:$44 sps:$4 sm:$0xff]   ;;  %v7636_v58 = vld [vmem:[#allocation5 + $0xdc8] ss:$44 sps:$4 sm:$0xff]  }
  0xbc   :  { %4582 = vmatprep.subr.bf16.mxu0 %v7561_v59  ;;  %4786 = vmatprep.subr.bf16.mxu1 %v7564_v60  ;;  %v7641_v59 = vld [vmem:[#allocation5 + $0xe1c] ss:$44 sps:$4 sm:$0xff]   ;;  %v7644_v60 = vld [vmem:[#allocation5 + $0xe24] ss:$44 sps:$4 sm:$0xff]  }
  0xbf   :  { %4583 = vmatpush1.bf16.msra.mxu0 %v7559_v61  ;;  %4787 = vmatpush1.bf16.msra.mxu1 %v7562_v62  ;;  %v7639_v61 = vld [vmem:[#allocation5 + $0xe18] ss:$44 sps:$4 sm:$0xff]   ;;  %v7642_v62 = vld [vmem:[#allocation5 + $0xe20] ss:$44 sps:$4 sm:$0xff]  }
  0xc0   :  { %4584 = vmatprep.subr.bf16.mxu0 %v7567_v63  ;;  %4788 = vmatprep.subr.bf16.mxu1 %v7570_v0  ;;  %v7647_v63 = vld [vmem:[#allocation5 + $0xe74] ss:$44 sps:$4 sm:$0xff]   ;;  %v7650_v0 = vld [vmem:[#allocation5 + $0xe7c] ss:$44 sps:$4 sm:$0xff]  }
  0xc3   :  { %4585 = vmatpush1.bf16.msra.mxu0 %v7565_v1  ;;  %4789 = vmatpush1.bf16.msra.mxu1 %v7568_v2  ;;  %v7645_v1 = vld [vmem:[#allocation5 + $0xe70] ss:$44 sps:$4 sm:$0xff]   ;;  %v7648_v2 = vld [vmem:[#allocation5 + $0xe78] ss:$44 sps:$4 sm:$0xff]  }
  0xc4   :  { %4586 = vmatprep.subr.bf16.mxu0 %v7574_v3  ;;  %4790 = vmatprep.subr.bf16.mxu1 %v7577_v4  ;;  %v7653_v3 = vld [vmem:[#allocation5 + $0xecc] ss:$44 sps:$4 sm:$0xff]   ;;  %v7656_v4 = vld [vmem:[#allocation5 + $0xed4] ss:$44 sps:$4 sm:$0xff]  }
  0xc7   :  { %4587 = vmatpush1.bf16.msra.mxu0 %v7572_v6  ;;  %4791 = vmatpush1.bf16.msra.mxu1 %v7575_v7  ;;  %v7651_v6 = vld [vmem:[#allocation5 + $0xec8] ss:$44 sps:$4 sm:$0xff]   ;;  %v7654_v7 = vld [vmem:[#allocation5 + $0xed0] ss:$44 sps:$4 sm:$0xff]  }
  0xc8   :  { %4588 = vmatprep.subr.bf16.mxu0 %v7581_v8  ;;  %4792 = vmatprep.subr.bf16.mxu1 %v7584_v9  ;;  %v7659_v8 = vld [vmem:[#allocation5 + $0xf24] ss:$44 sps:$4 sm:$0xff]   ;;  %v7662_v9 = vld [vmem:[#allocation5 + $0xf2c] ss:$44 sps:$4 sm:$0xff]  }
  0xcb   :  { %4589 = vmatpush1.bf16.msra.mxu0 %v7579_v10  ;;  %4793 = vmatpush1.bf16.msra.mxu1 %v7582_v11  ;;  %v7657_v10 = vld [vmem:[#allocation5 + $0xf20] ss:$44 sps:$4 sm:$0xff]   ;;  %v7660_v11 = vld [vmem:[#allocation5 + $0xf28] ss:$44 sps:$4 sm:$0xff]  }
  0xcc   :  { %4609 = vmatprep.subr.bf16.mxu0 %v7587_v12  ;;  %4813 = vmatprep.subr.bf16.mxu1 %v7590_v13  ;;  %v7665_v12 = vld [vmem:[#allocation5 + $0xf7c] ss:$44 sps:$4 sm:$0xff]   ;;  %v7668_v13 = vld [vmem:[#allocation5 + $0xf84] ss:$44 sps:$4 sm:$0xff]  }
  0xce   :  { %4591 = vmatmul.mubr.bf16.vlgmr.msra.gmra.mrb[0].mxu0 %v8731_v14  ;;  %4795 = vmatmul.mubr.bf16.vlgmr.msra.gmra.mrb[0].mxu1 %v8731_v14 }
  0xcf   :  { %4610 = vmatpush1.bf16.msra.mxu0 %v7585_v16  ;;  %4814 = vmatpush1.bf16.msra.mxu1 %v7588_v17  ;;  %v7666_v16 = vld [vmem:[#allocation5 + $0xf80] ss:$44 sps:$4 sm:$0xff]  }
  0xd0   :  { %4611 = vmatprep.subr.bf16.mxu0 %v7593_v18  ;;  %4815 = vmatprep.subr.bf16.mxu1 %v7596_v19  ;;  %v7672_v17 = vld [vmem:[#allocation5 + $0xfd4] ss:$44 sps:$4 sm:$0xff]   ;;  %v7675_v18 = vld [vmem:[#allocation5 + $0xfdc] ss:$44 sps:$4 sm:$0xff]  }
  0xd1   :  { %4600 = vmatprep.mubr.bf16.mxu0 %v8733_v20  ;;  %4804 = vmatprep.mubr.bf16.mxu1 %v8733_v20  ;;  %v7670_v19 = vld [vmem:[#allocation5 + $0xfd0] ss:$44 sps:$4 sm:$0xff]  }
  0xd3   :  { %4612 = vmatpush1.bf16.msra.mxu0 %v7591_v21  ;;  %4816 = vmatpush1.bf16.msra.mxu1 %v7594_v22  ;;  %v7673_v21 = vld [vmem:[#allocation5 + $0xfd8] ss:$44 sps:$4 sm:$0xff]  }
  0xd4   :  { %4613 = vmatprep.subr.bf16.mxu0 %v7599_v23  ;;  %4817 = vmatprep.subr.bf16.mxu1 %v7602_v24  ;;  %v7679_v22 = vld [vmem:[#allocation5 + $0x102c] ss:$44 sps:$4 sm:$0xff]   ;;  %v7682_v23 = vld [vmem:[#allocation5 + $0x1034] ss:$44 sps:$4 sm:$0xff]  }
  0xd5   :  { %v7677_v24 = vld [vmem:[#allocation5 + $0x1028] ss:$44 sps:$4 sm:$0xff]  }
  0xd6   :  { %4601 = vmatmul.mubr.bf16.gmra.mrb[4].mxu0 %v8739_v29  ;;  %4805 = vmatmul.mubr.bf16.gmra.mrb[4].mxu1 %v8739_v29 }
  0xd7   :  { %4614 = vmatpush1.bf16.msra.mxu0 %v7597_v25  ;;  %4818 = vmatpush1.bf16.msra.mxu1 %v7600_v26  ;;  %v7680_v25 = vld [vmem:[#allocation5 + $0x1030] ss:$44 sps:$4 sm:$0xff]  }
  0xd8   :  { %4615 = vmatprep.subr.bf16.mxu0 %v7605_v32  ;;  %4819 = vmatprep.subr.bf16.mxu1 %v7608_v33  ;;  %v7685_v26 = vld [vmem:[#allocation5 + $0x1084] ss:$44 sps:$4 sm:$0xff]   ;;  %v7688_v32 = vld [vmem:[#allocation5 + $0x108c] ss:$44 sps:$4 sm:$0xff]  }
  0xd9   :  { %4641 = vmatprep.mubr.bf16.mxu0 %v8747_v34  ;;  %4845 = vmatprep.mubr.bf16.mxu1 %v8747_v34  ;;  %v7683_v33 = vld [vmem:[#allocation5 + $0x1080] ss:$44 sps:$4 sm:$0xff]  }
  0xdb   :  { %4616 = vmatpush1.bf16.msra.mxu0 %v7603_v35  ;;  %4820 = vmatpush1.bf16.msra.mxu1 %v7606_v37  ;;  %v7686_v35 = vld [vmem:[#allocation5 + $0x1088] ss:$44 sps:$4 sm:$0xff]   ;;  %v8755_v37 = vcombine.low %v8741_v30, %v8743_v31  ;;  %v7695_v31 = vld [vmem:[#allocation5 + $0x1130] ss:$44 sps:$4 sm:$0xff]  }
  0xdc   :  { %4617 = vmatprep.subr.bf16.mxu0 %v7611_v38  ;;  %4821 = vmatprep.subr.bf16.mxu1 %v7614_v39  ;;  %v85_v38 = vld [vmem:[#allocation2 + $0x50] sm:$0xff]  ;;  %v7691_v39 = vld [vmem:[#allocation5 + $0x10dc] ss:$44 sps:$4 sm:$0xff]  }
  0xdd   :  { %v7700_v30 = vld [vmem:[#allocation5 + $0x113c] ss:$44 sps:$4 sm:$0xff]  }
  0xdf   :  { %4618 = vmatpush1.bf16.msra.mxu0 %v7609_v40  ;;  %4822 = vmatpush1.bf16.msra.mxu1 %v7612_v41  ;;  %v7694_v40 = vld [vmem:[#allocation5 + $0x10e4] ss:$44 sps:$4 sm:$0xff]   ;;  %v8757_v41 = vcombine.high %v85_v38, %v85_v38 }
  0xe0   :  { %4619 = vmatprep.subr.bf16.mxu0 %v7617_v42  ;;  %4823 = vmatprep.subr.bf16.mxu1 %v7620_v43  ;;  %v7689_v42 = vld [vmem:[#allocation5 + $0x10d8] ss:$44 sps:$4 sm:$0xff]   ;;  %v7692_v43 = vld [vmem:[#allocation5 + $0x10e0] ss:$44 sps:$4 sm:$0xff]  }
  0xe3   :  { %4620 = vmatpush1.bf16.msra.mxu0 %v7615_v44  ;;  %4824 = vmatpush1.bf16.msra.mxu1 %v7618_v45  ;;  %v7697_v44 = vld [vmem:[#allocation5 + $0x1134] ss:$44 sps:$4 sm:$0xff]   ;;  %v7698_v45 = vld [vmem:[#allocation5 + $0x1138] ss:$44 sps:$4 sm:$0xff]  }
  0xe4   :  { %4621 = vmatprep.subr.bf16.mxu0 %v7623_v46  ;;  %4825 = vmatprep.subr.bf16.mxu1 %v7626_v47  ;;  %v8763_v46 = vcombine.low %v85_v38, %v85_v38  ;;  %v8765_v47 = vld [vmem:[#allocation2 + $0x18] sm:$0xff] }
  0xe5   :  { %v7763_v38 = vld [vmem:[#allocation5 + $0x14fc] ss:$44 sps:$4 sm:$0xff]  }
  0xe7   :  { %4622 = vmatpush1.bf16.msra.mxu0 %v7621_v48  ;;  %4826 = vmatpush1.bf16.msra.mxu1 %v7624_v49  ;;  %v8767_v48 = vld [vmem:[#allocation2 + $0x38] sm:$0xff] }
  0xe8   :  { %4623 = vmatprep.subr.bf16.mxu0 %v7629_v51  ;;  %4827 = vmatprep.subr.bf16.mxu1 %v7632_v52  ;;  %v7703_v49 = vld [vmem:[#allocation5 + $0x118c] ss:$44 sps:$4 sm:$0xff]   ;;  %v7706_v51 = vld [vmem:[#allocation5 + $0x1194] ss:$44 sps:$4 sm:$0xff]   ;;  %v8771_v52 = vcombine.high %v8765_v47, %v8767_v48 }
  0xeb   :  { %4624 = vmatpush1.bf16.msra.mxu0 %v7627_v53  ;;  %4828 = vmatpush1.bf16.msra.mxu1 %v7630_v54  ;;  %v7701_v53 = vld [vmem:[#allocation5 + $0x1188] ss:$44 sps:$4 sm:$0xff]   ;;  %v7704_v54 = vld [vmem:[#allocation5 + $0x1190] ss:$44 sps:$4 sm:$0xff]  }
  0xec   :  { %4625 = vmatprep.subr.bf16.mxu0 %v7635_v55  ;;  %4829 = vmatprep.subr.bf16.mxu1 %v7638_v56  ;;  %v7709_v55 = vld [vmem:[#allocation5 + $0x11e4] ss:$44 sps:$4 sm:$0xff]   ;;  %v7712_v56 = vld [vmem:[#allocation5 + $0x11ec] ss:$44 sps:$4 sm:$0xff]  }
  0xef   :  { %4626 = vmatpush1.bf16.msra.mxu0 %v7633_v57  ;;  %4830 = vmatpush1.bf16.msra.mxu1 %v7636_v58  ;;  %v7707_v57 = vld [vmem:[#allocation5 + $0x11e0] ss:$44 sps:$4 sm:$0xff]   ;;  %v7710_v58 = vld [vmem:[#allocation5 + $0x11e8] ss:$44 sps:$4 sm:$0xff]  }
  0xf0   :  { %4627 = vmatprep.subr.bf16.mxu0 %v7641_v59  ;;  %4831 = vmatprep.subr.bf16.mxu1 %v7644_v60  ;;  %v7715_v59 = vld [vmem:[#allocation5 + $0x123c] ss:$44 sps:$4 sm:$0xff]   ;;  %v7718_v60 = vld [vmem:[#allocation5 + $0x1244] ss:$44 sps:$4 sm:$0xff]  }
  0xf3   :  { %4628 = vmatpush1.bf16.msra.mxu0 %v7639_v61  ;;  %4832 = vmatpush1.bf16.msra.mxu1 %v7642_v62  ;;  %v7713_v61 = vld [vmem:[#allocation5 + $0x1238] ss:$44 sps:$4 sm:$0xff]   ;;  %v7716_v62 = vld [vmem:[#allocation5 + $0x1240] ss:$44 sps:$4 sm:$0xff]  }
  0xf4   :  { %4629 = vmatprep.subr.bf16.mxu0 %v7647_v63  ;;  %4833 = vmatprep.subr.bf16.mxu1 %v7650_v0  ;;  %v7721_v63 = vld [vmem:[#allocation5 + $0x1294] ss:$44 sps:$4 sm:$0xff]   ;;  %v7724_v0 = vld [vmem:[#allocation5 + $0x129c] ss:$44 sps:$4 sm:$0xff]  }
  0xf7   :  { %4630 = vmatpush1.bf16.msra.mxu0 %v7645_v1  ;;  %4834 = vmatpush1.bf16.msra.mxu1 %v7648_v2  ;;  %v7719_v1 = vld [vmem:[#allocation5 + $0x1290] ss:$44 sps:$4 sm:$0xff]   ;;  %v7722_v2 = vld [vmem:[#allocation5 + $0x1298] ss:$44 sps:$4 sm:$0xff]  }
  0xf8   :  { %4631 = vmatprep.subr.bf16.mxu0 %v7653_v3  ;;  %4835 = vmatprep.subr.bf16.mxu1 %v7656_v4  ;;  %v7727_v3 = vld [vmem:[#allocation5 + $0x12ec] ss:$44 sps:$4 sm:$0xff]   ;;  %v7730_v4 = vld [vmem:[#allocation5 + $0x12f4] ss:$44 sps:$4 sm:$0xff]  }
  0xfb   :  { %4632 = vmatpush1.bf16.msra.mxu0 %v7651_v6  ;;  %4836 = vmatpush1.bf16.msra.mxu1 %v7654_v7  ;;  %v7725_v6 = vld [vmem:[#allocation5 + $0x12e8] ss:$44 sps:$4 sm:$0xff]   ;;  %v7728_v7 = vld [vmem:[#allocation5 + $0x12f0] ss:$44 sps:$4 sm:$0xff]  }
  0xfc   :  { %4633 = vmatprep.subr.bf16.mxu0 %v7659_v8  ;;  %4837 = vmatprep.subr.bf16.mxu1 %v7662_v9  ;;  %v7733_v8 = vld [vmem:[#allocation5 + $0x1344] ss:$44 sps:$4 sm:$0xff]   ;;  %v7736_v9 = vld [vmem:[#allocation5 + $0x134c] ss:$44 sps:$4 sm:$0xff]  }
  0xff   :  { %4634 = vmatpush1.bf16.msra.mxu0 %v7657_v10  ;;  %4838 = vmatpush1.bf16.msra.mxu1 %v7660_v11  ;;  %v7731_v10 = vld [vmem:[#allocation5 + $0x1340] ss:$44 sps:$4 sm:$0xff]   ;;  %v7734_v11 = vld [vmem:[#allocation5 + $0x1348] ss:$44 sps:$4 sm:$0xff]  }
 0x100   :  { %4635 = vmatprep.subr.bf16.mxu0 %v7665_v12  ;;  %4839 = vmatprep.subr.bf16.mxu1 %v7668_v13  ;;  %v7739_v12 = vld [vmem:[#allocation5 + $0x139c] ss:$44 sps:$4 sm:$0xff]   ;;  %v7742_v13 = vld [vmem:[#allocation5 + $0x13a4] ss:$44 sps:$4 sm:$0xff]  }
 0x103   :  { %4636 = vmatpush1.bf16.msra.mxu0 %v7663_v15  ;;  %4840 = vmatpush1.bf16.msra.mxu1 %v7666_v16  ;;  %v7737_v15 = vld [vmem:[#allocation5 + $0x1398] ss:$44 sps:$4 sm:$0xff]   ;;  %v7740_v16 = vld [vmem:[#allocation5 + $0x13a0] ss:$44 sps:$4 sm:$0xff]  }
 0x104   :  { %4637 = vmatprep.subr.bf16.mxu0 %v7672_v17  ;;  %4841 = vmatprep.subr.bf16.mxu1 %v7675_v18  ;;  %v7745_v17 = vld [vmem:[#allocation5 + $0x13f4] ss:$44 sps:$4 sm:$0xff]   ;;  %v7748_v18 = vld [vmem:[#allocation5 + $0x13fc] ss:$44 sps:$4 sm:$0xff]  }
 0x107   :  { %4638 = vmatpush1.bf16.msra.mxu0 %v7670_v19  ;;  %4842 = vmatpush1.bf16.msra.mxu1 %v7673_v21  ;;  %v7743_v19 = vld [vmem:[#allocation5 + $0x13f0] ss:$44 sps:$4 sm:$0xff]   ;;  %v7746_v21 = vld [vmem:[#allocation5 + $0x13f8] ss:$44 sps:$4 sm:$0xff]  }
 0x108   :  { %4639 = vmatprep.subr.bf16.mxu0 %v7679_v22  ;;  %4843 = vmatprep.subr.bf16.mxu1 %v7682_v23  ;;  %v7751_v22 = vld [vmem:[#allocation5 + $0x144c] ss:$44 sps:$4 sm:$0xff]   ;;  %v7754_v23 = vld [vmem:[#allocation5 + $0x1454] ss:$44 sps:$4 sm:$0xff]  }
 0x10b   :  { %4640 = vmatpush1.bf16.msra.mxu0 %v7677_v24  ;;  %4844 = vmatpush1.bf16.msra.mxu1 %v7680_v25  ;;  %v7749_v24 = vld [vmem:[#allocation5 + $0x1448] ss:$44 sps:$4 sm:$0xff]   ;;  %v7752_v25 = vld [vmem:[#allocation5 + $0x1450] ss:$44 sps:$4 sm:$0xff]  }
 0x10c   :  { %4660 = vmatprep.subr.bf16.mxu0 %v7685_v26  ;;  %4864 = vmatprep.subr.bf16.mxu1 %v7688_v32  ;;  %v7757_v26 = vld [vmem:[#allocation5 + $0x14a4] ss:$44 sps:$4 sm:$0xff]   ;;  %v7760_v32 = vld [vmem:[#allocation5 + $0x14ac] ss:$44 sps:$4 sm:$0xff]  }
 0x10e   :  { %4642 = vmatmul.mubr.bf16.vlgmr.msra.gmra.mrb[0].mxu0 %v8755_v37  ;;  %4846 = vmatmul.mubr.bf16.vlgmr.msra.gmra.mrb[0].mxu1 %v8755_v37 }
 0x10f   :  { %4661 = vmatpush1.bf16.msra.mxu0 %v7683_v33  ;;  %4865 = vmatpush1.bf16.msra.mxu1 %v7686_v35  ;;  %v7755_v33 = vld [vmem:[#allocation5 + $0x14a0] ss:$44 sps:$4 sm:$0xff]   ;;  %v7758_v35 = vld [vmem:[#allocation5 + $0x14a8] ss:$44 sps:$4 sm:$0xff]  }
 0x110   :  { %4662 = vmatprep.subr.bf16.mxu0 %v7691_v39  ;;  %4866 = vmatprep.subr.bf16.mxu1 %v7694_v40  ;;  %v7766_v39 = vld [vmem:[#allocation5 + $0x1504] ss:$44 sps:$4 sm:$0xff]  }
 0x111   :  { %4651 = vmatprep.mubr.bf16.mxu0 %v8757_v41  ;;  %4855 = vmatprep.mubr.bf16.mxu1 %v8757_v41  ;;  %v7761_v40 = vld [vmem:[#allocation5 + $0x14f8] ss:$44 sps:$4 sm:$0xff]  }
 0x113   :  { %4663 = vmatpush1.bf16.msra.mxu0 %v7689_v42  ;;  %4867 = vmatpush1.bf16.msra.mxu1 %v7692_v43  ;;  %v7764_v42 = vld [vmem:[#allocation5 + $0x1500] ss:$44 sps:$4 sm:$0xff]  }
 0x114   :  { %4664 = vmatprep.subr.bf16.mxu0 %v7697_v44  ;;  %4868 = vmatprep.subr.bf16.mxu1 %v7700_v30  ;;  %v7771_v43 = vld [vmem:[#allocation5 + $0x1554] ss:$44 sps:$4 sm:$0xff]   ;;  %v7774_v44 = vld [vmem:[#allocation5 + $0x155c] ss:$44 sps:$4 sm:$0xff]  }
 0x115   :  { %v7769_v30 = vld [vmem:[#allocation5 + $0x1550] ss:$44 sps:$4 sm:$0xff]  }
 0x116   :  { %4652 = vmatmul.mubr.bf16.gmra.mrb[4].mxu0 %v8763_v46  ;;  %4856 = vmatmul.mubr.bf16.gmra.mrb[4].mxu1 %v8763_v46 }
 0x117   :  { %4665 = vmatpush1.bf16.msra.mxu0 %v7695_v31  ;;  %4869 = vmatpush1.bf16.msra.mxu1 %v7698_v45  ;;  %v7772_v31 = vld [vmem:[#allocation5 + $0x1558] ss:$44 sps:$4 sm:$0xff]  }
 0x118   :  { %4666 = vmatprep.subr.bf16.mxu0 %v7703_v49  ;;  %4870 = vmatprep.subr.bf16.mxu1 %v7706_v51  ;;  %v7777_v45 = vld [vmem:[#allocation5 + $0x15ac] ss:$44 sps:$4 sm:$0xff]   ;;  %v7780_v49 = vld [vmem:[#allocation5 + $0x15b4] ss:$44 sps:$4 sm:$0xff]  }
 0x119   :  { %4692 = vmatprep.mubr.bf16.mxu0 %v8771_v52  ;;  %4896 = vmatprep.mubr.bf16.mxu1 %v8771_v52  ;;  %v7775_v51 = vld [vmem:[#allocation5 + $0x15a8] ss:$44 sps:$4 sm:$0xff]  }
 0x11b   :  { %4667 = vmatpush1.bf16.msra.mxu0 %v7701_v53  ;;  %4871 = vmatpush1.bf16.msra.mxu1 %v7704_v54  ;;  %v7778_v53 = vld [vmem:[#allocation5 + $0x15b0] ss:$44 sps:$4 sm:$0xff]   ;;  %v7783_v54 = vld [vmem:[#allocation5 + $0x14] ss:$44 sps:$4 sm:$0xff]  }
 0x11c   :  { %4668 = vmatprep.subr.bf16.mxu0 %v7709_v55  ;;  %4872 = vmatprep.subr.bf16.mxu1 %v7712_v56  ;;  %v7786_v55 = vld [vmem:[#allocation5 + $0x1c] ss:$44 sps:$4 sm:$0xff]  }
 0x11d   :  { %v7781_v56 = vld [vmem:[#allocation5 + $0x10] ss:$44 sps:$4 sm:$0xff]  }
 0x11f   :  { %4669 = vmatpush1.bf16.msra.mxu0 %v7707_v57  ;;  %4873 = vmatpush1.bf16.msra.mxu1 %v7710_v58  ;;  %v8779_v57 = vcombine.low %v8765_v47, %v8767_v48  ;;  %v7784_v58 = vld [vmem:[#allocation5 + $0x18] ss:$44 sps:$4 sm:$0xff]  }
 0x120   :  { %4670 = vmatprep.subr.bf16.mxu0 %v7715_v59  ;;  %4874 = vmatprep.subr.bf16.mxu1 %v7718_v60  ;;  %v86_v59 = vld [vmem:[#allocation2 + $0x58] sm:$0xff]  ;;  %v7797_v47 = vld [vmem:[#allocation5 + $0xc4] ss:$44 sps:$4 sm:$0xff]  }
 0x121   :  { %v7789_v60 = vld [vmem:[#allocation5 + $0x6c] ss:$44 sps:$4 sm:$0xff]  }
 0x122   :  { %v7800_v48 = vld [vmem:[#allocation5 + $0xcc] ss:$44 sps:$4 sm:$0xff]  }
 0x123   :  { %4671 = vmatpush1.bf16.msra.mxu0 %v7713_v61  ;;  %4875 = vmatpush1.bf16.msra.mxu1 %v7716_v62  ;;  %v7792_v61 = vld [vmem:[#allocation5 + $0x74] ss:$44 sps:$4 sm:$0xff]   ;;  %v8781_v62 = vcombine.high %v86_v59, %v86_v59 }
 0x124   :  { %4672 = vmatprep.subr.bf16.mxu0 %v7721_v63  ;;  %4876 = vmatprep.subr.bf16.mxu1 %v7724_v0  ;;  %v7787_v63 = vld [vmem:[#allocation5 + $0x68] ss:$44 sps:$4 sm:$0xff]   ;;  %v7790_v0 = vld [vmem:[#allocation5 + $0x70] ss:$44 sps:$4 sm:$0xff]  }
 0x127   :  { %4673 = vmatpush1.bf16.msra.mxu0 %v7719_v1  ;;  %4877 = vmatpush1.bf16.msra.mxu1 %v7722_v2  ;;  %v8787_v1 = vcombine.low %v86_v59, %v86_v59  ;;  %v7795_v2 = vld [vmem:[#allocation5 + $0xc0] ss:$44 sps:$4 sm:$0xff]   ;;  %v7858_v59 = vld [vmem:[#allocation5 + $0x438] ss:$44 sps:$4 sm:$0xff]  }
 0x128   :  { %4674 = vmatprep.subr.bf16.mxu0 %v7727_v3  ;;  %4878 = vmatprep.subr.bf16.mxu1 %v7730_v4  ;;  %v7798_v3 = vld [vmem:[#allocation5 + $0xc8] ss:$44 sps:$4 sm:$0xff]  }
 0x129   :  { %v7803_v4 = vld [vmem:[#allocation5 + $0x11c] ss:$44 sps:$4 sm:$0xff]  }
 0x12b   :  { %4675 = vmatpush1.bf16.msra.mxu0 %v7725_v6  ;;  %4879 = vmatpush1.bf16.msra.mxu1 %v7728_v7  ;;  %v7806_v6 = vld [vmem:[#allocation5 + $0x124] ss:$44 sps:$4 sm:$0xff]  }
 0x12c   :  { %4676 = vmatprep.subr.bf16.mxu0 %v7733_v8  ;;  %4880 = vmatprep.subr.bf16.mxu1 %v7736_v9  ;;  %v7801_v7 = vld [vmem:[#allocation5 + $0x118] ss:$44 sps:$4 sm:$0xff]   ;;  %v7804_v8 = vld [vmem:[#allocation5 + $0x120] ss:$44 sps:$4 sm:$0xff]  }
 0x12d   :  { %v7809_v9 = vld [vmem:[#allocation5 + $0x174] ss:$44 sps:$4 sm:$0xff]  }
 0x12f   :  { %4677 = vmatpush1.bf16.msra.mxu0 %v7731_v10  ;;  %4881 = vmatpush1.bf16.msra.mxu1 %v7734_v11  ;;  %v7812_v10 = vld [vmem:[#allocation5 + $0x17c] ss:$44 sps:$4 sm:$0xff]  }
 0x130   :  { %4678 = vmatprep.subr.bf16.mxu0 %v7739_v12  ;;  %4882 = vmatprep.subr.bf16.mxu1 %v7742_v13  ;;  %v7807_v11 = vld [vmem:[#allocation5 + $0x170] ss:$44 sps:$4 sm:$0xff]   ;;  %v7810_v12 = vld [vmem:[#allocation5 + $0x178] ss:$44 sps:$4 sm:$0xff]  }
 0x131   :  { %v7815_v13 = vld [vmem:[#allocation5 + $0x1cc] ss:$44 sps:$4 sm:$0xff]  }
 0x133   :  { %4679 = vmatpush1.bf16.msra.mxu0 %v7737_v15  ;;  %4883 = vmatpush1.bf16.msra.mxu1 %v7740_v16  ;;  %v7818_v15 = vld [vmem:[#allocation5 + $0x1d4] ss:$44 sps:$4 sm:$0xff]  }
 0x134   :  { %4680 = vmatprep.subr.bf16.mxu0 %v7745_v17  ;;  %4884 = vmatprep.subr.bf16.mxu1 %v7748_v18  ;;  %v7813_v16 = vld [vmem:[#allocation5 + $0x1c8] ss:$44 sps:$4 sm:$0xff]   ;;  %v7816_v17 = vld [vmem:[#allocation5 + $0x1d0] ss:$44 sps:$4 sm:$0xff]  }
 0x135   :  { %v7821_v18 = vld [vmem:[#allocation5 + $0x224] ss:$44 sps:$4 sm:$0xff]  }
 0x137   :  { %4681 = vmatpush1.bf16.msra.mxu0 %v7743_v19  ;;  %4885 = vmatpush1.bf16.msra.mxu1 %v7746_v21  ;;  %v7824_v19 = vld [vmem:[#allocation5 + $0x22c] ss:$44 sps:$4 sm:$0xff]  }
 0x138   :  { %4682 = vmatprep.subr.bf16.mxu0 %v7751_v22  ;;  %4886 = vmatprep.subr.bf16.mxu1 %v7754_v23  ;;  %v7819_v21 = vld [vmem:[#allocation5 + $0x220] ss:$44 sps:$4 sm:$0xff]   ;;  %v7822_v22 = vld [vmem:[#allocation5 + $0x228] ss:$44 sps:$4 sm:$0xff]  }
 0x139   :  { %v7827_v23 = vld [vmem:[#allocation5 + $0x27c] ss:$44 sps:$4 sm:$0xff]  }
 0x13b   :  { %4683 = vmatpush1.bf16.msra.mxu0 %v7749_v24  ;;  %4887 = vmatpush1.bf16.msra.mxu1 %v7752_v25  ;;  %v7830_v24 = vld [vmem:[#allocation5 + $0x284] ss:$44 sps:$4 sm:$0xff]  }
 0x13c   :  { %4684 = vmatprep.subr.bf16.mxu0 %v7757_v26  ;;  %4888 = vmatprep.subr.bf16.mxu1 %v7760_v32  ;;  %v7825_v25 = vld [vmem:[#allocation5 + $0x278] ss:$44 sps:$4 sm:$0xff]   ;;  %v7828_v26 = vld [vmem:[#allocation5 + $0x280] ss:$44 sps:$4 sm:$0xff]  }
 0x13d   :  { %v7833_v32 = vld [vmem:[#allocation5 + $0x2d4] ss:$44 sps:$4 sm:$0xff]  }
 0x13f   :  { %4685 = vmatpush1.bf16.msra.mxu0 %v7755_v33  ;;  %4889 = vmatpush1.bf16.msra.mxu1 %v7758_v35  ;;  %v7836_v33 = vld [vmem:[#allocation5 + $0x2dc] ss:$44 sps:$4 sm:$0xff]  }
 0x140   :  { %4686 = vmatprep.subr.bf16.mxu0 %v7763_v38  ;;  %4890 = vmatprep.subr.bf16.mxu1 %v7766_v39  ;;  %v7831_v35 = vld [vmem:[#allocation5 + $0x2d0] ss:$44 sps:$4 sm:$0xff]   ;;  %v7834_v38 = vld [vmem:[#allocation5 + $0x2d8] ss:$44 sps:$4 sm:$0xff]  }
 0x141   :  { %v7839_v39 = vld [vmem:[#allocation5 + $0x32c] ss:$44 sps:$4 sm:$0xff]  }
 0x143   :  { %4687 = vmatpush1.bf16.msra.mxu0 %v7761_v40  ;;  %4891 = vmatpush1.bf16.msra.mxu1 %v7764_v42  ;;  %v7842_v40 = vld [vmem:[#allocation5 + $0x334] ss:$44 sps:$4 sm:$0xff]  }
 0x144   :  { %4688 = vmatprep.subr.bf16.mxu0 %v7771_v43  ;;  %4892 = vmatprep.subr.bf16.mxu1 %v7774_v44  ;;  %v7837_v42 = vld [vmem:[#allocation5 + $0x328] ss:$44 sps:$4 sm:$0xff]   ;;  %v7840_v43 = vld [vmem:[#allocation5 + $0x330] ss:$44 sps:$4 sm:$0xff]  }
 0x145   :  { %v7845_v44 = vld [vmem:[#allocation5 + $0x384] ss:$44 sps:$4 sm:$0xff]  }
 0x147   :  { %4689 = vmatpush1.bf16.msra.mxu0 %v7769_v30  ;;  %4893 = vmatpush1.bf16.msra.mxu1 %v7772_v31  ;;  %v7848_v30 = vld [vmem:[#allocation5 + $0x38c] ss:$44 sps:$4 sm:$0xff]  }
 0x148   :  { %4690 = vmatprep.subr.bf16.mxu0 %v7777_v45  ;;  %4894 = vmatprep.subr.bf16.mxu1 %v7780_v49  ;;  %v7843_v31 = vld [vmem:[#allocation5 + $0x380] ss:$44 sps:$4 sm:$0xff]   ;;  %v7846_v45 = vld [vmem:[#allocation5 + $0x388] ss:$44 sps:$4 sm:$0xff]  }
 0x149   :  { %v7851_v49 = vld [vmem:[#allocation5 + $0x3dc] ss:$44 sps:$4 sm:$0xff]  }
 0x14b   :  { %4691 = vmatpush1.bf16.msra.mxu0 %v7775_v51  ;;  %4895 = vmatpush1.bf16.msra.mxu1 %v7778_v53  ;;  %v7854_v51 = vld [vmem:[#allocation5 + $0x3e4] ss:$44 sps:$4 sm:$0xff]  }
 0x14c   :  { %4915 = vmatprep.subr.bf16.mxu0 %v7783_v54  ;;  %5119 = vmatprep.subr.bf16.mxu1 %v7786_v55  ;;  %v7849_v53 = vld [vmem:[#allocation5 + $0x3d8] ss:$44 sps:$4 sm:$0xff]   ;;  %v7852_v54 = vld [vmem:[#allocation5 + $0x3e0] ss:$44 sps:$4 sm:$0xff]  }
 0x14d   :  { %v7857_v55 = vld [vmem:[#allocation5 + $0x434] ss:$44 sps:$4 sm:$0xff]  }
 0x14e   :  { %4693 = vmatmul.mubr.bf16.vlgmr.msra.gmra.mrb[0].mxu0 %v8779_v57  ;;  %4897 = vmatmul.mubr.bf16.vlgmr.msra.gmra.mrb[0].mxu1 %v8779_v57 }
 0x14f   :  { %4916 = vmatpush1.bf16.msra.mxu0 %v7781_v56  ;;  %5120 = vmatpush1.bf16.msra.mxu1 %v7784_v58  ;;  %v7860_v56 = vld [vmem:[#allocation5 + $0x43c] ss:$44 sps:$4 sm:$0xff]  }
 0x150   :  { %4917 = vmatprep.subr.bf16.mxu0 %v7789_v60  ;;  %5121 = vmatprep.subr.bf16.mxu1 %v7792_v61  ;;  %v7855_v58 = vld [vmem:[#allocation5 + $0x430] ss:$44 sps:$4 sm:$0xff]   ;;  %v7863_v60 = vld [vmem:[#allocation5 + $0x48c] ss:$44 sps:$4 sm:$0xff]   ;;  %v7866_v61 = vld [vmem:[#allocation5 + $0x494] ss:$44 sps:$4 sm:$0xff]  }
 0x151   :  { %4702 = vmatprep.mubr.bf16.mxu0 %v8781_v62  ;;  %4906 = vmatprep.mubr.bf16.mxu1 %v8781_v62 }
 0x153   :  { %4918 = vmatpush1.bf16.msra.mxu0 %v7787_v63  ;;  %5122 = vmatpush1.bf16.msra.mxu1 %v7790_v0  ;;  %v7861_v63 = vld [vmem:[#allocation5 + $0x488] ss:$44 sps:$4 sm:$0xff]   ;;  %v7864_v0 = vld [vmem:[#allocation5 + $0x490] ss:$44 sps:$4 sm:$0xff]  }
 0x154   :  { %4919 = vmatprep.subr.bf16.mxu0 %v7797_v47  ;;  %5123 = vmatprep.subr.bf16.mxu1 %v7800_v48  ;;  %v7869_v47 = vld [vmem:[#allocation5 + $0x4e4] ss:$44 sps:$4 sm:$0xff]   ;;  %v7872_v48 = vld [vmem:[#allocation5 + $0x4ec] ss:$44 sps:$4 sm:$0xff]  }
 0x156   :  { %4703 = vmatmul.mubr.bf16.gmra.mrb[4].mxu0 %v8787_v1  ;;  %4907 = vmatmul.mubr.bf16.gmra.mrb[4].mxu1 %v8787_v1 }
 0x157   :  { %4920 = vmatpush1.bf16.msra.mxu0 %v7795_v2  ;;  %5124 = vmatpush1.bf16.msra.mxu1 %v7798_v3  ;;  %v7867_v2 = vld [vmem:[#allocation5 + $0x4e0] ss:$44 sps:$4 sm:$0xff]   ;;  %v7870_v3 = vld [vmem:[#allocation5 + $0x4e8] ss:$44 sps:$4 sm:$0xff]  }
 0x158   :  { %4921 = vmatprep.subr.bf16.mxu0 %v7803_v4  ;;  %5125 = vmatprep.subr.bf16.mxu1 %v7806_v6  ;;  %v7875_v4 = vld [vmem:[#allocation5 + $0x53c] ss:$44 sps:$4 sm:$0xff]   ;;  %v7878_v6 = vld [vmem:[#allocation5 + $0x544] ss:$44 sps:$4 sm:$0xff]  }
 0x159   :  { %4947 = vmatprep.mubr.bf16.mxu0 %v8703_v50  ;;  %5151 = vmatprep.mubr.bf16.mxu1 %v8703_v50 }
 0x15b   :  { %4922 = vmatpush1.bf16.msra.mxu0 %v7801_v7  ;;  %5126 = vmatpush1.bf16.msra.mxu1 %v7804_v8  ;;  %v7873_v7 = vld [vmem:[#allocation5 + $0x538] ss:$44 sps:$4 sm:$0xff]   ;;  %v7876_v8 = vld [vmem:[#allocation5 + $0x540] ss:$44 sps:$4 sm:$0xff]  }
 0x15c   :  { %4923 = vmatprep.subr.bf16.mxu0 %v7809_v9  ;;  %5127 = vmatprep.subr.bf16.mxu1 %v7812_v10  ;;  %v7881_v9 = vld [vmem:[#allocation5 + $0x594] ss:$44 sps:$4 sm:$0xff]   ;;  %v7884_v10 = vld [vmem:[#allocation5 + $0x59c] ss:$44 sps:$4 sm:$0xff]  }
 0x15f   :  { %4924 = vmatpush1.bf16.msra.mxu0 %v7807_v11  ;;  %5128 = vmatpush1.bf16.msra.mxu1 %v7810_v12  ;;  %v7879_v11 = vld [vmem:[#allocation5 + $0x590] ss:$44 sps:$4 sm:$0xff]   ;;  %v7882_v12 = vld [vmem:[#allocation5 + $0x598] ss:$44 sps:$4 sm:$0xff]  }
 0x160   :  { %4925 = vmatprep.subr.bf16.mxu0 %v7815_v13  ;;  %5129 = vmatprep.subr.bf16.mxu1 %v7818_v15  ;;  %v7887_v13 = vld [vmem:[#allocation5 + $0x5ec] ss:$44 sps:$4 sm:$0xff]   ;;  %v7890_v15 = vld [vmem:[#allocation5 + $0x5f4] ss:$44 sps:$4 sm:$0xff]  }
 0x163   :  { %4926 = vmatpush1.bf16.msra.mxu0 %v7813_v16  ;;  %5130 = vmatpush1.bf16.msra.mxu1 %v7816_v17  ;;  %v7885_v16 = vld [vmem:[#allocation5 + $0x5e8] ss:$44 sps:$4 sm:$0xff]   ;;  %v7888_v17 = vld [vmem:[#allocation5 + $0x5f0] ss:$44 sps:$4 sm:$0xff]  }
 0x164   :  { %4927 = vmatprep.subr.bf16.mxu0 %v7821_v18  ;;  %5131 = vmatprep.subr.bf16.mxu1 %v7824_v19  ;;  %v7893_v18 = vld [vmem:[#allocation5 + $0x644] ss:$44 sps:$4 sm:$0xff]   ;;  %v7896_v19 = vld [vmem:[#allocation5 + $0x64c] ss:$44 sps:$4 sm:$0xff]  }
 0x167   :  { %4928 = vmatpush1.bf16.msra.mxu0 %v7819_v21  ;;  %5132 = vmatpush1.bf16.msra.mxu1 %v7822_v22  ;;  %v7891_v21 = vld [vmem:[#allocation5 + $0x640] ss:$44 sps:$4 sm:$0xff]   ;;  %v7894_v22 = vld [vmem:[#allocation5 + $0x648] ss:$44 sps:$4 sm:$0xff]  }
 0x168   :  { %4929 = vmatprep.subr.bf16.mxu0 %v7827_v23  ;;  %5133 = vmatprep.subr.bf16.mxu1 %v7830_v24  ;;  %v7899_v23 = vld [vmem:[#allocation5 + $0x69c] ss:$44 sps:$4 sm:$0xff]   ;;  %v7902_v24 = vld [vmem:[#allocation5 + $0x6a4] ss:$44 sps:$4 sm:$0xff]  }
 0x16b   :  { %4930 = vmatpush1.bf16.msra.mxu0 %v7825_v25  ;;  %5134 = vmatpush1.bf16.msra.mxu1 %v7828_v26  ;;  %v7897_v25 = vld [vmem:[#allocation5 + $0x698] ss:$44 sps:$4 sm:$0xff]   ;;  %v7900_v26 = vld [vmem:[#allocation5 + $0x6a0] ss:$44 sps:$4 sm:$0xff]  }
 0x16c   :  { %4931 = vmatprep.subr.bf16.mxu0 %v7833_v32  ;;  %5135 = vmatprep.subr.bf16.mxu1 %v7836_v33  ;;  %v7905_v32 = vld [vmem:[#allocation5 + $0x6f4] ss:$44 sps:$4 sm:$0xff]   ;;  %v7908_v33 = vld [vmem:[#allocation5 + $0x6fc] ss:$44 sps:$4 sm:$0xff]  }
 0x16f   :  { %4932 = vmatpush1.bf16.msra.mxu0 %v7831_v35  ;;  %5136 = vmatpush1.bf16.msra.mxu1 %v7834_v38  ;;  %v7903_v35 = vld [vmem:[#allocation5 + $0x6f0] ss:$44 sps:$4 sm:$0xff]   ;;  %v7906_v38 = vld [vmem:[#allocation5 + $0x6f8] ss:$44 sps:$4 sm:$0xff]  }
 0x170   :  { %4933 = vmatprep.subr.bf16.mxu0 %v7839_v39  ;;  %5137 = vmatprep.subr.bf16.mxu1 %v7842_v40  ;;  %v7911_v39 = vld [vmem:[#allocation5 + $0x74c] ss:$44 sps:$4 sm:$0xff]   ;;  %v7914_v40 = vld [vmem:[#allocation5 + $0x754] ss:$44 sps:$4 sm:$0xff]  }
 0x173   :  { %4934 = vmatpush1.bf16.msra.mxu0 %v7837_v42  ;;  %5138 = vmatpush1.bf16.msra.mxu1 %v7840_v43  ;;  %v7909_v42 = vld [vmem:[#allocation5 + $0x748] ss:$44 sps:$4 sm:$0xff]   ;;  %v7912_v43 = vld [vmem:[#allocation5 + $0x750] ss:$44 sps:$4 sm:$0xff]  }
 0x174   :  { %4935 = vmatprep.subr.bf16.mxu0 %v7845_v44  ;;  %5139 = vmatprep.subr.bf16.mxu1 %v7848_v30  ;;  %v7917_v44 = vld [vmem:[#allocation5 + $0x7a4] ss:$44 sps:$4 sm:$0xff]   ;;  %v7920_v30 = vld [vmem:[#allocation5 + $0x7ac] ss:$44 sps:$4 sm:$0xff]  }
 0x177   :  { %4936 = vmatpush1.bf16.msra.mxu0 %v7843_v31  ;;  %5140 = vmatpush1.bf16.msra.mxu1 %v7846_v45  ;;  %v7915_v31 = vld [vmem:[#allocation5 + $0x7a0] ss:$44 sps:$4 sm:$0xff]   ;;  %v7918_v45 = vld [vmem:[#allocation5 + $0x7a8] ss:$44 sps:$4 sm:$0xff]  }
 0x178   :  { %4937 = vmatprep.subr.bf16.mxu0 %v7851_v49  ;;  %5141 = vmatprep.subr.bf16.mxu1 %v7854_v51  ;;  %v7923_v49 = vld [vmem:[#allocation5 + $0x7fc] ss:$44 sps:$4 sm:$0xff]   ;;  %v7926_v51 = vld [vmem:[#allocation5 + $0x804] ss:$44 sps:$4 sm:$0xff]  }
 0x17b   :  { %4938 = vmatpush1.bf16.msra.mxu0 %v7849_v53  ;;  %5142 = vmatpush1.bf16.msra.mxu1 %v7852_v54  ;;  %v7921_v53 = vld [vmem:[#allocation5 + $0x7f8] ss:$44 sps:$4 sm:$0xff]   ;;  %v7924_v54 = vld [vmem:[#allocation5 + $0x800] ss:$44 sps:$4 sm:$0xff]  }
 0x17c   :  { %4939 = vmatprep.subr.bf16.mxu0 %v7857_v55  ;;  %5143 = vmatprep.subr.bf16.mxu1 %v7860_v56  ;;  %v7929_v55 = vld [vmem:[#allocation5 + $0x854] ss:$44 sps:$4 sm:$0xff]   ;;  %v7932_v56 = vld [vmem:[#allocation5 + $0x85c] ss:$44 sps:$4 sm:$0xff]  }
 0x17f   :  { %4940 = vmatpush1.bf16.msra.mxu0 %v7855_v58  ;;  %5144 = vmatpush1.bf16.msra.mxu1 %v7858_v59  ;;  %v7927_v58 = vld [vmem:[#allocation5 + $0x850] ss:$44 sps:$4 sm:$0xff]   ;;  %v7930_v59 = vld [vmem:[#allocation5 + $0x858] ss:$44 sps:$4 sm:$0xff]  }
 0x180   :  { %4941 = vmatprep.subr.bf16.mxu0 %v7863_v60  ;;  %5145 = vmatprep.subr.bf16.mxu1 %v7866_v61  ;;  %v7935_v60 = vld [vmem:[#allocation5 + $0x8ac] ss:$44 sps:$4 sm:$0xff]   ;;  %v7938_v61 = vld [vmem:[#allocation5 + $0x8b4] ss:$44 sps:$4 sm:$0xff]  }
 0x183   :  { %4942 = vmatpush1.bf16.msra.mxu0 %v7861_v63  ;;  %5146 = vmatpush1.bf16.msra.mxu1 %v7864_v0  ;;  %v7933_v63 = vld [vmem:[#allocation5 + $0x8a8] ss:$44 sps:$4 sm:$0xff]   ;;  %v7936_v0 = vld [vmem:[#allocation5 + $0x8b0] ss:$44 sps:$4 sm:$0xff]  }
 0x184   :  { %4943 = vmatprep.subr.bf16.mxu0 %v7869_v47  ;;  %5147 = vmatprep.subr.bf16.mxu1 %v7872_v48  ;;  %v7941_v47 = vld [vmem:[#allocation5 + $0x904] ss:$44 sps:$4 sm:$0xff]   ;;  %v7944_v48 = vld [vmem:[#allocation5 + $0x90c] ss:$44 sps:$4 sm:$0xff]  }
 0x187   :  { %4944 = vmatpush1.bf16.msra.mxu0 %v7867_v2  ;;  %5148 = vmatpush1.bf16.msra.mxu1 %v7870_v3  ;;  %v7939_v2 = vld [vmem:[#allocation5 + $0x900] ss:$44 sps:$4 sm:$0xff]   ;;  %v7942_v3 = vld [vmem:[#allocation5 + $0x908] ss:$44 sps:$4 sm:$0xff]  }
 0x188   :  { %4945 = vmatprep.subr.bf16.mxu0 %v7875_v4  ;;  %5149 = vmatprep.subr.bf16.mxu1 %v7878_v6  ;;  %v7947_v4 = vld [vmem:[#allocation5 + $0x95c] ss:$44 sps:$4 sm:$0xff]   ;;  %v7950_v6 = vld [vmem:[#allocation5 + $0x964] ss:$44 sps:$4 sm:$0xff]  }
 0x18b   :  { %4946 = vmatpush1.bf16.msra.mxu0 %v7873_v7  ;;  %5150 = vmatpush1.bf16.msra.mxu1 %v7876_v8  ;;  %v7945_v7 = vld [vmem:[#allocation5 + $0x958] ss:$44 sps:$4 sm:$0xff]   ;;  %v7948_v8 = vld [vmem:[#allocation5 + $0x960] ss:$44 sps:$4 sm:$0xff]  }
 0x18c   :  { %4966 = vmatprep.subr.bf16.mxu0 %v7881_v9  ;;  %5170 = vmatprep.subr.bf16.mxu1 %v7884_v10  ;;  %v7953_v9 = vld [vmem:[#allocation5 + $0x9b4] ss:$44 sps:$4 sm:$0xff]   ;;  %v7956_v10 = vld [vmem:[#allocation5 + $0x9bc] ss:$44 sps:$4 sm:$0xff]  }
 0x18e   :  { %4948 = vmatmul.mubr.bf16.vlgmr.msra.gmra.mrb[8].mxu0 %v8707_v5  ;;  %5152 = vmatmul.mubr.bf16.vlgmr.msra.gmra.mrb[8].mxu1 %v8707_v5 }
 0x18f   :  { %4967 = vmatpush1.bf16.msra.mxu0 %v7879_v11  ;;  %5171 = vmatpush1.bf16.msra.mxu1 %v7882_v12  ;;  %v7951_v11 = vld [vmem:[#allocation5 + $0x9b0] ss:$44 sps:$4 sm:$0xff]   ;;  %v7954_v12 = vld [vmem:[#allocation5 + $0x9b8] ss:$44 sps:$4 sm:$0xff]  }
 0x190   :  { %4968 = vmatprep.subr.bf16.mxu0 %v7887_v13  ;;  %5172 = vmatprep.subr.bf16.mxu1 %v7890_v15  ;;  %v7959_v13 = vld [vmem:[#allocation5 + $0xa0c] ss:$44 sps:$4 sm:$0xff]   ;;  %v7962_v15 = vld [vmem:[#allocation5 + $0xa14] ss:$44 sps:$4 sm:$0xff]  }
 0x191   :  { %4957 = vmatprep.mubr.bf16.mxu0 %v8711_v27  ;;  %5161 = vmatprep.mubr.bf16.mxu1 %v8711_v27 }
 0x193   :  { %4969 = vmatpush1.bf16.msra.mxu0 %v7885_v16  ;;  %5173 = vmatpush1.bf16.msra.mxu1 %v7888_v17  ;;  %v7957_v16 = vld [vmem:[#allocation5 + $0xa08] ss:$44 sps:$4 sm:$0xff]   ;;  %v7960_v17 = vld [vmem:[#allocation5 + $0xa10] ss:$44 sps:$4 sm:$0xff]  }
 0x194   :  { %4970 = vmatprep.subr.bf16.mxu0 %v7893_v18  ;;  %5174 = vmatprep.subr.bf16.mxu1 %v7896_v19  ;;  %v7965_v18 = vld [vmem:[#allocation5 + $0xa64] ss:$44 sps:$4 sm:$0xff]   ;;  %v7968_v19 = vld [vmem:[#allocation5 + $0xa6c] ss:$44 sps:$4 sm:$0xff]  }
 0x196   :  { %4958 = vmatmul.mubr.bf16.gmra.mrb[12].mxu0 %v8713_v28  ;;  %5162 = vmatmul.mubr.bf16.gmra.mrb[12].mxu1 %v8713_v28 }
 0x197   :  { %4971 = vmatpush1.bf16.msra.mxu0 %v7891_v21  ;;  %5175 = vmatpush1.bf16.msra.mxu1 %v7894_v22  ;;  %v7963_v21 = vld [vmem:[#allocation5 + $0xa60] ss:$44 sps:$4 sm:$0xff]   ;;  %v7966_v22 = vld [vmem:[#allocation5 + $0xa68] ss:$44 sps:$4 sm:$0xff]  }
 0x198   :  { %4972 = vmatprep.subr.bf16.mxu0 %v7899_v23  ;;  %5176 = vmatprep.subr.bf16.mxu1 %v7902_v24  ;;  %v7971_v23 = vld [vmem:[#allocation5 + $0xabc] ss:$44 sps:$4 sm:$0xff]   ;;  %v7974_v24 = vld [vmem:[#allocation5 + $0xac4] ss:$44 sps:$4 sm:$0xff]  }
 0x199   :  { %4998 = vmatprep.mubr.bf16.mxu0 %v8725_v36  ;;  %5202 = vmatprep.mubr.bf16.mxu1 %v8725_v36 }
 0x19b   :  { %4973 = vmatpush1.bf16.msra.mxu0 %v7897_v25  ;;  %5177 = vmatpush1.bf16.msra.mxu1 %v7900_v26  ;;  %v7969_v25 = vld [vmem:[#allocation5 + $0xab8] ss:$44 sps:$4 sm:$0xff]   ;;  %v7972_v26 = vld [vmem:[#allocation5 + $0xac0] ss:$44 sps:$4 sm:$0xff]  }
 0x19c   :  { %4974 = vmatprep.subr.bf16.mxu0 %v7905_v32  ;;  %5178 = vmatprep.subr.bf16.mxu1 %v7908_v33  ;;  %v7977_v32 = vld [vmem:[#allocation5 + $0xb14] ss:$44 sps:$4 sm:$0xff]   ;;  %v7980_v33 = vld [vmem:[#allocation5 + $0xb1c] ss:$44 sps:$4 sm:$0xff]  }
 0x19f   :  { %4975 = vmatpush1.bf16.msra.mxu0 %v7903_v35  ;;  %5179 = vmatpush1.bf16.msra.mxu1 %v7906_v38  ;;  %v7975_v35 = vld [vmem:[#allocation5 + $0xb10] ss:$44 sps:$4 sm:$0xff]   ;;  %v7978_v38 = vld [vmem:[#allocation5 + $0xb18] ss:$44 sps:$4 sm:$0xff]  }
 0x1a0   :  { %4976 = vmatprep.subr.bf16.mxu0 %v7911_v39  ;;  %5180 = vmatprep.subr.bf16.mxu1 %v7914_v40  ;;  %v7983_v39 = vld [vmem:[#allocation5 + $0xb6c] ss:$44 sps:$4 sm:$0xff]   ;;  %v7986_v40 = vld [vmem:[#allocation5 + $0xb74] ss:$44 sps:$4 sm:$0xff]  }
 0x1a3   :  { %4977 = vmatpush1.bf16.msra.mxu0 %v7909_v42  ;;  %5181 = vmatpush1.bf16.msra.mxu1 %v7912_v43  ;;  %v7981_v42 = vld [vmem:[#allocation5 + $0xb68] ss:$44 sps:$4 sm:$0xff]   ;;  %v7984_v43 = vld [vmem:[#allocation5 + $0xb70] ss:$44 sps:$4 sm:$0xff]  }
 0x1a4   :  { %4978 = vmatprep.subr.bf16.mxu0 %v7917_v44  ;;  %5182 = vmatprep.subr.bf16.mxu1 %v7920_v30  ;;  %v7989_v44 = vld [vmem:[#allocation5 + $0xbc4] ss:$44 sps:$4 sm:$0xff]   ;;  %v7992_v30 = vld [vmem:[#allocation5 + $0xbcc] ss:$44 sps:$4 sm:$0xff]  }
 0x1a7   :  { %4979 = vmatpush1.bf16.msra.mxu0 %v7915_v31  ;;  %5183 = vmatpush1.bf16.msra.mxu1 %v7918_v45  ;;  %v7987_v31 = vld [vmem:[#allocation5 + $0xbc0] ss:$44 sps:$4 sm:$0xff]   ;;  %v7990_v45 = vld [vmem:[#allocation5 + $0xbc8] ss:$44 sps:$4 sm:$0xff]  }
 0x1a8   :  { %4980 = vmatprep.subr.bf16.mxu0 %v7923_v49  ;;  %5184 = vmatprep.subr.bf16.mxu1 %v7926_v51  ;;  %v7995_v49 = vld [vmem:[#allocation5 + $0xc1c] ss:$44 sps:$4 sm:$0xff]   ;;  %v7998_v51 = vld [vmem:[#allocation5 + $0xc24] ss:$44 sps:$4 sm:$0xff]  }
 0x1ab   :  { %4981 = vmatpush1.bf16.msra.mxu0 %v7921_v53  ;;  %5185 = vmatpush1.bf16.msra.mxu1 %v7924_v54  ;;  %v7993_v53 = vld [vmem:[#allocation5 + $0xc18] ss:$44 sps:$4 sm:$0xff]   ;;  %v7996_v54 = vld [vmem:[#allocation5 + $0xc20] ss:$44 sps:$4 sm:$0xff]  }
 0x1ac   :  { %4982 = vmatprep.subr.bf16.mxu0 %v7929_v55  ;;  %5186 = vmatprep.subr.bf16.mxu1 %v7932_v56  ;;  %v8001_v55 = vld [vmem:[#allocation5 + $0xc74] ss:$44 sps:$4 sm:$0xff]   ;;  %v8004_v56 = vld [vmem:[#allocation5 + $0xc7c] ss:$44 sps:$4 sm:$0xff]  }
 0x1af   :  { %4983 = vmatpush1.bf16.msra.mxu0 %v7927_v58  ;;  %5187 = vmatpush1.bf16.msra.mxu1 %v7930_v59  ;;  %v7999_v58 = vld [vmem:[#allocation5 + $0xc70] ss:$44 sps:$4 sm:$0xff]   ;;  %v8002_v59 = vld [vmem:[#allocation5 + $0xc78] ss:$44 sps:$4 sm:$0xff]  }
 0x1b0   :  { %4984 = vmatprep.subr.bf16.mxu0 %v7935_v60  ;;  %5188 = vmatprep.subr.bf16.mxu1 %v7938_v61  ;;  %v8007_v60 = vld [vmem:[#allocation5 + $0xccc] ss:$44 sps:$4 sm:$0xff]   ;;  %v8010_v61 = vld [vmem:[#allocation5 + $0xcd4] ss:$44 sps:$4 sm:$0xff]  }
 0x1b3   :  { %4985 = vmatpush1.bf16.msra.mxu0 %v7933_v63  ;;  %5189 = vmatpush1.bf16.msra.mxu1 %v7936_v0  ;;  %v8005_v63 = vld [vmem:[#allocation5 + $0xcc8] ss:$44 sps:$4 sm:$0xff]   ;;  %v8008_v0 = vld [vmem:[#allocation5 + $0xcd0] ss:$44 sps:$4 sm:$0xff]  }
 0x1b4   :  { %4986 = vmatprep.subr.bf16.mxu0 %v7941_v47  ;;  %5190 = vmatprep.subr.bf16.mxu1 %v7944_v48  ;;  %v8013_v47 = vld [vmem:[#allocation5 + $0xd24] ss:$44 sps:$4 sm:$0xff]   ;;  %v8016_v48 = vld [vmem:[#allocation5 + $0xd2c] ss:$44 sps:$4 sm:$0xff]  }
 0x1b7   :  { %4987 = vmatpush1.bf16.msra.mxu0 %v7939_v2  ;;  %5191 = vmatpush1.bf16.msra.mxu1 %v7942_v3  ;;  %v8011_v2 = vld [vmem:[#allocation5 + $0xd20] ss:$44 sps:$4 sm:$0xff]   ;;  %v8014_v3 = vld [vmem:[#allocation5 + $0xd28] ss:$44 sps:$4 sm:$0xff]  }
 0x1b8   :  { %4988 = vmatprep.subr.bf16.mxu0 %v7947_v4  ;;  %5192 = vmatprep.subr.bf16.mxu1 %v7950_v6  ;;  %v8019_v4 = vld [vmem:[#allocation5 + $0xd7c] ss:$44 sps:$4 sm:$0xff]   ;;  %v8022_v6 = vld [vmem:[#allocation5 + $0xd84] ss:$44 sps:$4 sm:$0xff]  }
 0x1bb   :  { %4989 = vmatpush1.bf16.msra.mxu0 %v7945_v7  ;;  %5193 = vmatpush1.bf16.msra.mxu1 %v7948_v8  ;;  %v8017_v7 = vld [vmem:[#allocation5 + $0xd78] ss:$44 sps:$4 sm:$0xff]   ;;  %v8020_v8 = vld [vmem:[#allocation5 + $0xd80] ss:$44 sps:$4 sm:$0xff]  }
 0x1bc   :  { %4990 = vmatprep.subr.bf16.mxu0 %v7953_v9  ;;  %5194 = vmatprep.subr.bf16.mxu1 %v7956_v10  ;;  %v8025_v9 = vld [vmem:[#allocation5 + $0xdd4] ss:$44 sps:$4 sm:$0xff]   ;;  %v8028_v10 = vld [vmem:[#allocation5 + $0xddc] ss:$44 sps:$4 sm:$0xff]  }
 0x1bf   :  { %4991 = vmatpush1.bf16.msra.mxu0 %v7951_v11  ;;  %5195 = vmatpush1.bf16.msra.mxu1 %v7954_v12  ;;  %v8023_v11 = vld [vmem:[#allocation5 + $0xdd0] ss:$44 sps:$4 sm:$0xff]   ;;  %v8026_v12 = vld [vmem:[#allocation5 + $0xdd8] ss:$44 sps:$4 sm:$0xff]  }
 0x1c0   :  { %4992 = vmatprep.subr.bf16.mxu0 %v7959_v13  ;;  %5196 = vmatprep.subr.bf16.mxu1 %v7962_v15  ;;  %v8031_v13 = vld [vmem:[#allocation5 + $0xe2c] ss:$44 sps:$4 sm:$0xff]   ;;  %v8034_v15 = vld [vmem:[#allocation5 + $0xe34] ss:$44 sps:$4 sm:$0xff]  }
 0x1c3   :  { %4993 = vmatpush1.bf16.msra.mxu0 %v7957_v16  ;;  %5197 = vmatpush1.bf16.msra.mxu1 %v7960_v17  ;;  %v8029_v16 = vld [vmem:[#allocation5 + $0xe28] ss:$44 sps:$4 sm:$0xff]   ;;  %v8032_v17 = vld [vmem:[#allocation5 + $0xe30] ss:$44 sps:$4 sm:$0xff]  }
 0x1c4   :  { %4994 = vmatprep.subr.bf16.mxu0 %v7965_v18  ;;  %5198 = vmatprep.subr.bf16.mxu1 %v7968_v19  ;;  %v8037_v18 = vld [vmem:[#allocation5 + $0xe84] ss:$44 sps:$4 sm:$0xff]   ;;  %v8040_v19 = vld [vmem:[#allocation5 + $0xe8c] ss:$44 sps:$4 sm:$0xff]  }
 0x1c7   :  { %4995 = vmatpush1.bf16.msra.mxu0 %v7963_v21  ;;  %5199 = vmatpush1.bf16.msra.mxu1 %v7966_v22  ;;  %v8035_v21 = vld [vmem:[#allocation5 + $0xe80] ss:$44 sps:$4 sm:$0xff]   ;;  %v8038_v22 = vld [vmem:[#allocation5 + $0xe88] ss:$44 sps:$4 sm:$0xff]  }
 0x1c8   :  { %4996 = vmatprep.subr.bf16.mxu0 %v7971_v23  ;;  %5200 = vmatprep.subr.bf16.mxu1 %v7974_v24  ;;  %v8043_v23 = vld [vmem:[#allocation5 + $0xedc] ss:$44 sps:$4 sm:$0xff]   ;;  %v8046_v24 = vld [vmem:[#allocation5 + $0xee4] ss:$44 sps:$4 sm:$0xff]  }
 0x1cb   :  { %4997 = vmatpush1.bf16.msra.mxu0 %v7969_v25  ;;  %5201 = vmatpush1.bf16.msra.mxu1 %v7972_v26  ;;  %v8041_v25 = vld [vmem:[#allocation5 + $0xed8] ss:$44 sps:$4 sm:$0xff]   ;;  %v8044_v26 = vld [vmem:[#allocation5 + $0xee0] ss:$44 sps:$4 sm:$0xff]  }
 0x1cc   :  { %5017 = vmatprep.subr.bf16.mxu0 %v7977_v32  ;;  %5221 = vmatprep.subr.bf16.mxu1 %v7980_v33  ;;  %v8049_v32 = vld [vmem:[#allocation5 + $0xf34] ss:$44 sps:$4 sm:$0xff]   ;;  %v8052_v33 = vld [vmem:[#allocation5 + $0xf3c] ss:$44 sps:$4 sm:$0xff]  }
 0x1ce   :  { %4999 = vmatmul.mubr.bf16.vlgmr.msra.gmra.mrb[8].mxu0 %v8731_v14  ;;  %5203 = vmatmul.mubr.bf16.vlgmr.msra.gmra.mrb[8].mxu1 %v8731_v14 }
 0x1cf   :  { %5018 = vmatpush1.bf16.msra.mxu0 %v7975_v35  ;;  %5222 = vmatpush1.bf16.msra.mxu1 %v7978_v38  ;;  %v8047_v35 = vld [vmem:[#allocation5 + $0xf30] ss:$44 sps:$4 sm:$0xff]   ;;  %v8050_v38 = vld [vmem:[#allocation5 + $0xf38] ss:$44 sps:$4 sm:$0xff]  }
 0x1d0   :  { %5019 = vmatprep.subr.bf16.mxu0 %v7983_v39  ;;  %5223 = vmatprep.subr.bf16.mxu1 %v7986_v40  ;;  %v8055_v39 = vld [vmem:[#allocation5 + $0xf8c] ss:$44 sps:$4 sm:$0xff]   ;;  %v8058_v40 = vld [vmem:[#allocation5 + $0xf94] ss:$44 sps:$4 sm:$0xff]  }
 0x1d1   :  { %5008 = vmatprep.mubr.bf16.mxu0 %v8733_v20  ;;  %5212 = vmatprep.mubr.bf16.mxu1 %v8733_v20 }
 0x1d3   :  { %5020 = vmatpush1.bf16.msra.mxu0 %v7981_v42  ;;  %5224 = vmatpush1.bf16.msra.mxu1 %v7984_v43  ;;  %v8053_v42 = vld [vmem:[#allocation5 + $0xf88] ss:$44 sps:$4 sm:$0xff]   ;;  %v8056_v43 = vld [vmem:[#allocation5 + $0xf90] ss:$44 sps:$4 sm:$0xff]  }
 0x1d4   :  { %5021 = vmatprep.subr.bf16.mxu0 %v7989_v44  ;;  %5225 = vmatprep.subr.bf16.mxu1 %v7992_v30  ;;  %v8061_v44 = vld [vmem:[#allocation5 + $0xfe4] ss:$44 sps:$4 sm:$0xff]   ;;  %v8064_v30 = vld [vmem:[#allocation5 + $0xfec] ss:$44 sps:$4 sm:$0xff]  }
 0x1d6   :  { %5009 = vmatmul.mubr.bf16.gmra.mrb[12].mxu0 %v8739_v29  ;;  %5213 = vmatmul.mubr.bf16.gmra.mrb[12].mxu1 %v8739_v29 }
 0x1d7   :  { %5022 = vmatpush1.bf16.msra.mxu0 %v7987_v31  ;;  %5226 = vmatpush1.bf16.msra.mxu1 %v7990_v45  ;;  %v8059_v31 = vld [vmem:[#allocation5 + $0xfe0] ss:$44 sps:$4 sm:$0xff]   ;;  %v8062_v45 = vld [vmem:[#allocation5 + $0xfe8] ss:$44 sps:$4 sm:$0xff]  }
 0x1d8   :  { %5023 = vmatprep.subr.bf16.mxu0 %v7995_v49  ;;  %5227 = vmatprep.subr.bf16.mxu1 %v7998_v51  ;;  %v8067_v49 = vld [vmem:[#allocation5 + $0x103c] ss:$44 sps:$4 sm:$0xff]   ;;  %v8070_v51 = vld [vmem:[#allocation5 + $0x1044] ss:$44 sps:$4 sm:$0xff]  }
 0x1d9   :  { %5049 = vmatprep.mubr.bf16.mxu0 %v8747_v34  ;;  %5253 = vmatprep.mubr.bf16.mxu1 %v8747_v34 }
 0x1db   :  { %5024 = vmatpush1.bf16.msra.mxu0 %v7993_v53  ;;  %5228 = vmatpush1.bf16.msra.mxu1 %v7996_v54  ;;  %v8065_v53 = vld [vmem:[#allocation5 + $0x1038] ss:$44 sps:$4 sm:$0xff]   ;;  %v8068_v54 = vld [vmem:[#allocation5 + $0x1040] ss:$44 sps:$4 sm:$0xff]  }
 0x1dc   :  { %5025 = vmatprep.subr.bf16.mxu0 %v8001_v55  ;;  %5229 = vmatprep.subr.bf16.mxu1 %v8004_v56  ;;  %v8073_v55 = vld [vmem:[#allocation5 + $0x1094] ss:$44 sps:$4 sm:$0xff]   ;;  %v8076_v56 = vld [vmem:[#allocation5 + $0x109c] ss:$44 sps:$4 sm:$0xff]  }
 0x1df   :  { %5026 = vmatpush1.bf16.msra.mxu0 %v7999_v58  ;;  %5230 = vmatpush1.bf16.msra.mxu1 %v8002_v59  ;;  %v8071_v58 = vld [vmem:[#allocation5 + $0x1090] ss:$44 sps:$4 sm:$0xff]   ;;  %v8074_v59 = vld [vmem:[#allocation5 + $0x1098] ss:$44 sps:$4 sm:$0xff]  }
 0x1e0   :  { %5027 = vmatprep.subr.bf16.mxu0 %v8007_v60  ;;  %5231 = vmatprep.subr.bf16.mxu1 %v8010_v61  ;;  %v8079_v60 = vld [vmem:[#allocation5 + $0x10ec] ss:$44 sps:$4 sm:$0xff]   ;;  %v8082_v61 = vld [vmem:[#allocation5 + $0x10f4] ss:$44 sps:$4 sm:$0xff]  }
 0x1e3   :  { %5028 = vmatpush1.bf16.msra.mxu0 %v8005_v63  ;;  %5232 = vmatpush1.bf16.msra.mxu1 %v8008_v0  ;;  %v8077_v63 = vld [vmem:[#allocation5 + $0x10e8] ss:$44 sps:$4 sm:$0xff]   ;;  %v8080_v0 = vld [vmem:[#allocation5 + $0x10f0] ss:$44 sps:$4 sm:$0xff]  }
 0x1e4   :  { %5029 = vmatprep.subr.bf16.mxu0 %v8013_v47  ;;  %5233 = vmatprep.subr.bf16.mxu1 %v8016_v48  ;;  %v8085_v47 = vld [vmem:[#allocation5 + $0x1144] ss:$44 sps:$4 sm:$0xff]   ;;  %v8088_v48 = vld [vmem:[#allocation5 + $0x114c] ss:$44 sps:$4 sm:$0xff]  }
 0x1e7   :  { %5030 = vmatpush1.bf16.msra.mxu0 %v8011_v2  ;;  %5234 = vmatpush1.bf16.msra.mxu1 %v8014_v3  ;;  %v8083_v2 = vld [vmem:[#allocation5 + $0x1140] ss:$44 sps:$4 sm:$0xff]   ;;  %v8086_v3 = vld [vmem:[#allocation5 + $0x1148] ss:$44 sps:$4 sm:$0xff]  }
 0x1e8   :  { %5031 = vmatprep.subr.bf16.mxu0 %v8019_v4  ;;  %5235 = vmatprep.subr.bf16.mxu1 %v8022_v6  ;;  %v8091_v4 = vld [vmem:[#allocation5 + $0x119c] ss:$44 sps:$4 sm:$0xff]   ;;  %v8094_v6 = vld [vmem:[#allocation5 + $0x11a4] ss:$44 sps:$4 sm:$0xff]  }
 0x1eb   :  { %5032 = vmatpush1.bf16.msra.mxu0 %v8017_v7  ;;  %5236 = vmatpush1.bf16.msra.mxu1 %v8020_v8  ;;  %v8089_v7 = vld [vmem:[#allocation5 + $0x1198] ss:$44 sps:$4 sm:$0xff]   ;;  %v8092_v8 = vld [vmem:[#allocation5 + $0x11a0] ss:$44 sps:$4 sm:$0xff]  }
 0x1ec   :  { %5033 = vmatprep.subr.bf16.mxu0 %v8025_v9  ;;  %5237 = vmatprep.subr.bf16.mxu1 %v8028_v10  ;;  %v8097_v9 = vld [vmem:[#allocation5 + $0x11f4] ss:$44 sps:$4 sm:$0xff]   ;;  %v8100_v10 = vld [vmem:[#allocation5 + $0x11fc] ss:$44 sps:$4 sm:$0xff]  }
 0x1ef   :  { %5034 = vmatpush1.bf16.msra.mxu0 %v8023_v11  ;;  %5238 = vmatpush1.bf16.msra.mxu1 %v8026_v12  ;;  %v8095_v11 = vld [vmem:[#allocation5 + $0x11f0] ss:$44 sps:$4 sm:$0xff]   ;;  %v8098_v12 = vld [vmem:[#allocation5 + $0x11f8] ss:$44 sps:$4 sm:$0xff]  }
 0x1f0   :  { %5035 = vmatprep.subr.bf16.mxu0 %v8031_v13  ;;  %5239 = vmatprep.subr.bf16.mxu1 %v8034_v15  ;;  %v8103_v13 = vld [vmem:[#allocation5 + $0x124c] ss:$44 sps:$4 sm:$0xff]   ;;  %v8106_v15 = vld [vmem:[#allocation5 + $0x1254] ss:$44 sps:$4 sm:$0xff]  }
 0x1f3   :  { %5036 = vmatpush1.bf16.msra.mxu0 %v8029_v16  ;;  %5240 = vmatpush1.bf16.msra.mxu1 %v8032_v17  ;;  %v8101_v16 = vld [vmem:[#allocation5 + $0x1248] ss:$44 sps:$4 sm:$0xff]   ;;  %v8104_v17 = vld [vmem:[#allocation5 + $0x1250] ss:$44 sps:$4 sm:$0xff]  }
 0x1f4   :  { %5037 = vmatprep.subr.bf16.mxu0 %v8037_v18  ;;  %5241 = vmatprep.subr.bf16.mxu1 %v8040_v19  ;;  %v8109_v18 = vld [vmem:[#allocation5 + $0x12a4] ss:$44 sps:$4 sm:$0xff]   ;;  %v8112_v19 = vld [vmem:[#allocation5 + $0x12ac] ss:$44 sps:$4 sm:$0xff]  }
 0x1f7   :  { %5038 = vmatpush1.bf16.msra.mxu0 %v8035_v21  ;;  %5242 = vmatpush1.bf16.msra.mxu1 %v8038_v22  ;;  %v8107_v22 = vld [vmem:[#allocation5 + $0x12a0] ss:$44 sps:$4 sm:$0xff]  }
 0x1f8   :  { %5039 = vmatprep.subr.bf16.mxu0 %v8043_v23  ;;  %5243 = vmatprep.subr.bf16.mxu1 %v8046_v24 }
 0x1fb   :  { %5040 = vmatpush1.bf16.msra.mxu0 %v8041_v25  ;;  %5244 = vmatpush1.bf16.msra.mxu1 %v8044_v26  ;;  %v8110_v25 = vld [vmem:[#allocation5 + $0x12a8] ss:$44 sps:$4 sm:$0xff]  }
 0x1fc   :  { %5041 = vmatprep.subr.bf16.mxu0 %v8049_v32  ;;  %5245 = vmatprep.subr.bf16.mxu1 %v8052_v33  ;;  %v8115_v33 = vld [vmem:[#allocation5 + $0x12fc] ss:$44 sps:$4 sm:$0xff]  }
 0x1ff   :  { %5042 = vmatpush1.bf16.msra.mxu0 %v8047_v35  ;;  %5246 = vmatpush1.bf16.msra.mxu1 %v8050_v38  ;;  %v8118_v35 = vld [vmem:[#allocation5 + $0x1304] ss:$44 sps:$4 sm:$0xff]  }
 0x200   :  { %5043 = vmatprep.subr.bf16.mxu0 %v8055_v39  ;;  %5247 = vmatprep.subr.bf16.mxu1 %v8058_v40 }
 0x203   :  { %5044 = vmatpush1.bf16.msra.mxu0 %v8053_v42  ;;  %5248 = vmatpush1.bf16.msra.mxu1 %v8056_v43  ;;  %v8113_v42 = vld [vmem:[#allocation5 + $0x12f8] ss:$44 sps:$4 sm:$0xff]   ;;  %v8116_v43 = vld [vmem:[#allocation5 + $0x1300] ss:$44 sps:$4 sm:$0xff]  }
 0x204   :  { %5045 = vmatprep.subr.bf16.mxu0 %v8061_v44  ;;  %5249 = vmatprep.subr.bf16.mxu1 %v8064_v30  ;;  %v8121_v44 = vld [vmem:[#allocation5 + $0x1354] ss:$44 sps:$4 sm:$0xff]   ;;  %v8124_v30 = vld [vmem:[#allocation5 + $0x135c] ss:$44 sps:$4 sm:$0xff]  }
 0x207   :  { %5046 = vmatpush1.bf16.msra.mxu0 %v8059_v31  ;;  %5250 = vmatpush1.bf16.msra.mxu1 %v8062_v45  ;;  %v8119_v45 = vld [vmem:[#allocation5 + $0x1350] ss:$44 sps:$4 sm:$0xff]  }
 0x208   :  { %5047 = vmatprep.subr.bf16.mxu0 %v8067_v49  ;;  %5251 = vmatprep.subr.bf16.mxu1 %v8070_v51 }
 0x20b   :  { %5048 = vmatpush1.bf16.msra.mxu0 %v8065_v53  ;;  %5252 = vmatpush1.bf16.msra.mxu1 %v8068_v54  ;;  %v8122_v53 = vld [vmem:[#allocation5 + $0x1358] ss:$44 sps:$4 sm:$0xff]  }
 0x20c   :  { %5068 = vmatprep.subr.bf16.mxu0 %v8073_v55  ;;  %5272 = vmatprep.subr.bf16.mxu1 %v8076_v56  ;;  %v8127_v56 = vld [vmem:[#allocation5 + $0x13ac] ss:$44 sps:$4 sm:$0xff]  }
 0x20e   :  { %5050 = vmatmul.mubr.bf16.vlgmr.msra.gmra.mrb[8].mxu0 %v8755_v37  ;;  %5254 = vmatmul.mubr.bf16.vlgmr.msra.gmra.mrb[8].mxu1 %v8755_v37 }
 0x20f   :  { %5069 = vmatpush1.bf16.msra.mxu0 %v8071_v58  ;;  %5273 = vmatpush1.bf16.msra.mxu1 %v8074_v59  ;;  %v8130_v58 = vld [vmem:[#allocation5 + $0x13b4] ss:$44 sps:$4 sm:$0xff]  }
 0x210   :  { %5070 = vmatprep.subr.bf16.mxu0 %v8079_v60  ;;  %5274 = vmatprep.subr.bf16.mxu1 %v8082_v61 }
 0x211   :  { %5059 = vmatprep.mubr.bf16.mxu0 %v8757_v41  ;;  %5263 = vmatprep.mubr.bf16.mxu1 %v8757_v41 }
 0x213   :  { %5071 = vmatpush1.bf16.msra.mxu0 %v8077_v63  ;;  %5275 = vmatpush1.bf16.msra.mxu1 %v8080_v0  ;;  %v8125_v63 = vld [vmem:[#allocation5 + $0x13a8] ss:$44 sps:$4 sm:$0xff]   ;;  %v8128_v0 = vld [vmem:[#allocation5 + $0x13b0] ss:$44 sps:$4 sm:$0xff]  }
 0x214   :  { %5072 = vmatprep.subr.bf16.mxu0 %v8085_v47  ;;  %5276 = vmatprep.subr.bf16.mxu1 %v8088_v48  ;;  %v8133_v47 = vld [vmem:[#allocation5 + $0x1404] ss:$44 sps:$4 sm:$0xff]   ;;  %v8136_v48 = vld [vmem:[#allocation5 + $0x140c] ss:$44 sps:$4 sm:$0xff]  }
 0x216   :  { %5060 = vmatmul.mubr.bf16.gmra.mrb[12].mxu0 %v8763_v46  ;;  %5264 = vmatmul.mubr.bf16.gmra.mrb[12].mxu1 %v8763_v46 }
 0x217   :  { %5073 = vmatpush1.bf16.msra.mxu0 %v8083_v2  ;;  %5277 = vmatpush1.bf16.msra.mxu1 %v8086_v3  ;;  %v8131_v2 = vld [vmem:[#allocation5 + $0x1400] ss:$44 sps:$4 sm:$0xff]   ;;  %v8134_v3 = vld [vmem:[#allocation5 + $0x1408] ss:$44 sps:$4 sm:$0xff]  }
 0x218   :  { %5074 = vmatprep.subr.bf16.mxu0 %v8091_v4  ;;  %5278 = vmatprep.subr.bf16.mxu1 %v8094_v6  ;;  %v8139_v4 = vld [vmem:[#allocation5 + $0x145c] ss:$44 sps:$4 sm:$0xff]   ;;  %v8142_v6 = vld [vmem:[#allocation5 + $0x1464] ss:$44 sps:$4 sm:$0xff]  }
 0x219   :  { %5100 = vmatprep.mubr.bf16.mxu0 %v8771_v52  ;;  %5304 = vmatprep.mubr.bf16.mxu1 %v8771_v52 }
 0x21b   :  { %5075 = vmatpush1.bf16.msra.mxu0 %v8089_v7  ;;  %5279 = vmatpush1.bf16.msra.mxu1 %v8092_v8  ;;  %v8137_v7 = vld [vmem:[#allocation5 + $0x1458] ss:$44 sps:$4 sm:$0xff]   ;;  %v8140_v8 = vld [vmem:[#allocation5 + $0x1460] ss:$44 sps:$4 sm:$0xff]  }
 0x21c   :  { %5076 = vmatprep.subr.bf16.mxu0 %v8097_v9  ;;  %5280 = vmatprep.subr.bf16.mxu1 %v8100_v10  ;;  %v8145_v9 = vld [vmem:[#allocation5 + $0x14b4] ss:$44 sps:$4 sm:$0xff]   ;;  %v8148_v10 = vld [vmem:[#allocation5 + $0x14bc] ss:$44 sps:$4 sm:$0xff]  }
 0x21f   :  { %5077 = vmatpush1.bf16.msra.mxu0 %v8095_v11  ;;  %5281 = vmatpush1.bf16.msra.mxu1 %v8098_v12  ;;  %v8143_v11 = vld [vmem:[#allocation5 + $0x14b0] ss:$44 sps:$4 sm:$0xff]   ;;  %v8146_v12 = vld [vmem:[#allocation5 + $0x14b8] ss:$44 sps:$4 sm:$0xff]  }
 0x220   :  { %5078 = vmatprep.subr.bf16.mxu0 %v8103_v13  ;;  %5282 = vmatprep.subr.bf16.mxu1 %v8106_v15  ;;  %v8151_v13 = vld [vmem:[#allocation5 + $0x150c] ss:$44 sps:$4 sm:$0xff]   ;;  %v8154_v15 = vld [vmem:[#allocation5 + $0x1514] ss:$44 sps:$4 sm:$0xff]  }
 0x221   :  { %v8817_v21 = vpop.f32.mrb[0].mxu0  ;;  %v8819_v23 = vpop.f32.mrb[0].mxu1 }
 0x222   :  { %v8821_v24 = vpop.f32.mrb[1].mxu0  ;;  %v8823_v26 = vpop.f32.mrb[1].mxu1 }
 0x223   :  { %v8825_v32 = vpop.f32.mrb[2].mxu0  ;;  %5079 = vmatpush1.bf16.msra.mxu0 %v8101_v16  ;;  %5283 = vmatpush1.bf16.msra.mxu1 %v8104_v17  ;;  %v8827_v38 = vpop.f32.mrb[2].mxu1  ;;  %v8149_v16 = vld [vmem:[#allocation5 + $0x1508] ss:$44 sps:$4 sm:$0xff]   ;;  %v8152_v17 = vld [vmem:[#allocation5 + $0x1510] ss:$44 sps:$4 sm:$0xff]  }
 0x224   :  { %v8829_v39 = vpop.f32.mrb[3].mxu0  ;;  %5080 = vmatprep.subr.bf16.mxu0 %v8109_v18  ;;  %5284 = vmatprep.subr.bf16.mxu1 %v8112_v19  ;;  %v8831_v40 = vpop.f32.mrb[3].mxu1  ;;  %v8157_v18 = vld [vmem:[#allocation5 + $0x1564] ss:$44 sps:$4 sm:$0xff]   ;;  %v8160_v19 = vld [vmem:[#allocation5 + $0x156c] ss:$44 sps:$4 sm:$0xff]  }
 0x227   :  { %5081 = vmatpush1.bf16.msra.mxu0 %v8107_v22  ;;  %5285 = vmatpush1.bf16.msra.mxu1 %v8110_v25  ;;  %v8155_v22 = vld [vmem:[#allocation5 + $0x1560] ss:$44 sps:$4 sm:$0xff]   ;;  %v8158_v25 = vld [vmem:[#allocation5 + $0x1568] ss:$44 sps:$4 sm:$0xff]  }
 0x228   :  { %5082 = vmatprep.subr.bf16.mxu0 %v8115_v33  ;;  %5286 = vmatprep.subr.bf16.mxu1 %v8118_v35  ;;  %v8163_v33 = vld [vmem:[#allocation5 + $0x15bc] ss:$44 sps:$4 sm:$0xff]   ;;  %v8166_v35 = vld [vmem:[#allocation5 + $0x15c4] ss:$44 sps:$4 sm:$0xff]  }
 0x229   :  { %v8833_v31 = vpop.f32.mrb[4].mxu0  ;;  %v8835_v49 = vpop.f32.mrb[4].mxu1 }
 0x22a   :  { %v8837_v51 = vpop.f32.mrb[5].mxu0  ;;  %v8839_v54 = vpop.f32.mrb[5].mxu1 }
 0x22b   :  { %v4708_v55 = vpop.f32.mrb[6].mxu0  ;;  %5083 = vmatpush1.bf16.msra.mxu0 %v8113_v42  ;;  %5287 = vmatpush1.bf16.msra.mxu1 %v8116_v43  ;;  %v4912_v59 = vpop.f32.mrb[6].mxu1  ;;  %v8161_v42 = vld [vmem:[#allocation5 + $0x15b8] ss:$44 sps:$4 sm:$0xff]   ;;  %v8164_v43 = vld [vmem:[#allocation5 + $0x15c0] ss:$44 sps:$4 sm:$0xff]  }
 0x22c   :  { %v4709_v60 = vpop.f32.mrb[7].mxu0  ;;  %5084 = vmatprep.subr.bf16.mxu0 %v8121_v44  ;;  %5288 = vmatprep.subr.bf16.mxu1 %v8124_v30  ;;  %v4913_v61 = vpop.f32.mrb[7].mxu1  ;;  %v8169_v44 = vld [vmem:[#allocation5 + $0x24] ss:$44 sps:$4 sm:$0xff]   ;;  %v8215_v30 = vld [vmem:[#allocation5 + $0x2e8] ss:$44 sps:$4 sm:$0xff]  }
 0x22d   :  { %v8216_v55 = vld [vmem:[#allocation5 + $0x28] ss:$44 sps:$4 sm:$0xff]   ;;  %v8221_v60 = vld [vmem:[#allocation5 + $0x80] ss:$44 sps:$4 sm:$0xff]   ;;  %v8173_v61 = vld [vmem:[#allocation5 + $0xd0] ss:$44 sps:$4 sm:$0xff]  }
 0x22e   :  { %v8175_v59 = vld [vmem:[#allocation5 + $0xd4] ss:$44 sps:$4 sm:$0xff]  }
 0x22f   :  { %5085 = vmatpush1.bf16.msra.mxu0 %v8119_v45  ;;  %5289 = vmatpush1.bf16.msra.mxu1 %v8122_v53  ;;  %v8167_v45 = vld [vmem:[#allocation5 + $0x20] ss:$44 sps:$4 sm:$0xff]   ;;  %v8172_v53 = vld [vmem:[#allocation5 + $0x7c] ss:$44 sps:$4 sm:$0xff]  }
 0x230   :  { %5086 = vmatprep.subr.bf16.mxu0 %v8127_v56  ;;  %5290 = vmatprep.subr.bf16.mxu1 %v8130_v58  ;;  %v8220_v56 = vld [vmem:[#allocation5 + $0x340] ss:$44 sps:$4 sm:$0xff]   ;;  %v8170_v58 = vld [vmem:[#allocation5 + $0x78] ss:$44 sps:$4 sm:$0xff]  }
 0x233   :  { %5087 = vmatpush1.bf16.msra.mxu0 %v8125_v63  ;;  %5291 = vmatpush1.bf16.msra.mxu1 %v8128_v0  ;;  %v8178_v63 = vld [vmem:[#allocation5 + $0x12c] ss:$44 sps:$4 sm:$0xff]  }
 0x234   :  { %5088 = vmatprep.subr.bf16.mxu0 %v8133_v47  ;;  %5292 = vmatprep.subr.bf16.mxu1 %v8136_v48  ;;  %v8225_v0 = vld [vmem:[#allocation5 + $0x398] ss:$44 sps:$4 sm:$0xff]   ;;  %v8230_v48 = vld [vmem:[#allocation5 + $0x3f0] ss:$44 sps:$4 sm:$0xff]  }
 0x235   :  { %v8226_v47 = vld [vmem:[#allocation5 + $0xd8] ss:$44 sps:$4 sm:$0xff]  }
 0x237   :  { %5089 = vmatpush1.bf16.msra.mxu0 %v8131_v2  ;;  %5293 = vmatpush1.bf16.msra.mxu1 %v8134_v3  ;;  %v8176_v2 = vld [vmem:[#allocation5 + $0x128] ss:$44 sps:$4 sm:$0xff]   ;;  %v8181_v3 = vld [vmem:[#allocation5 + $0x184] ss:$44 sps:$4 sm:$0xff]  }
 0x238   :  { %5090 = vmatprep.subr.bf16.mxu0 %v8139_v4  ;;  %5294 = vmatprep.subr.bf16.mxu1 %v8142_v6  ;;  %v8231_v4 = vld [vmem:[#allocation5 + $0x130] ss:$44 sps:$4 sm:$0xff]   ;;  %v8235_v6 = vld [vmem:[#allocation5 + $0x448] ss:$44 sps:$4 sm:$0xff]  }
 0x23b   :  { %5091 = vmatpush1.bf16.msra.mxu0 %v8137_v7  ;;  %5295 = vmatpush1.bf16.msra.mxu1 %v8140_v8  ;;  %v8179_v7 = vld [vmem:[#allocation5 + $0x180] ss:$44 sps:$4 sm:$0xff]   ;;  %v8184_v8 = vld [vmem:[#allocation5 + $0x1dc] ss:$44 sps:$4 sm:$0xff]  }
 0x23c   :  { %5092 = vmatprep.subr.bf16.mxu0 %v8145_v9  ;;  %5296 = vmatprep.subr.bf16.mxu1 %v8148_v10  ;;  %v8236_v9 = vld [vmem:[#allocation5 + $0x188] ss:$44 sps:$4 sm:$0xff]   ;;  %v8240_v10 = vld [vmem:[#allocation5 + $0x4a0] ss:$44 sps:$4 sm:$0xff]  }
 0x23f   :  { %5093 = vmatpush1.bf16.msra.mxu0 %v8143_v11  ;;  %5297 = vmatpush1.bf16.msra.mxu1 %v8146_v12  ;;  %v8182_v11 = vld [vmem:[#allocation5 + $0x1d8] ss:$44 sps:$4 sm:$0xff]   ;;  %v8187_v12 = vld [vmem:[#allocation5 + $0x234] ss:$44 sps:$4 sm:$0xff]  }
 0x240   :  { %5094 = vmatprep.subr.bf16.mxu0 %v8151_v13  ;;  %5298 = vmatprep.subr.bf16.mxu1 %v8154_v15  ;;  %v8241_v13 = vld [vmem:[#allocation5 + $0x1e0] ss:$44 sps:$4 sm:$0xff]   ;;  %v8245_v15 = vld [vmem:[#allocation5 + $0x4f8] ss:$44 sps:$4 sm:$0xff]  }
 0x243   :  { %5095 = vmatpush1.bf16.msra.mxu0 %v8149_v16  ;;  %5299 = vmatpush1.bf16.msra.mxu1 %v8152_v17  ;;  %v8190_v16 = vld [vmem:[#allocation5 + $0x28c] ss:$44 sps:$4 sm:$0xff]  }
 0x244   :  { %5096 = vmatprep.subr.bf16.mxu0 %v8157_v18  ;;  %5300 = vmatprep.subr.bf16.mxu1 %v8160_v19  ;;  %v8246_v17 = vld [vmem:[#allocation5 + $0x238] ss:$44 sps:$4 sm:$0xff]   ;;  %v8250_v18 = vld [vmem:[#allocation5 + $0x550] ss:$44 sps:$4 sm:$0xff]   ;;  %v8188_v19 = vld [vmem:[#allocation5 + $0x288] ss:$44 sps:$4 sm:$0xff]  }
 0x247   :  { %5097 = vmatpush1.bf16.msra.mxu0 %v8155_v22  ;;  %5301 = vmatpush1.bf16.msra.mxu1 %v8158_v25  ;;  %v8193_v22 = vld [vmem:[#allocation5 + $0x2e4] ss:$44 sps:$4 sm:$0xff]  }
 0x248   :  { %5098 = vmatprep.subr.bf16.mxu0 %v8163_v33  ;;  %5302 = vmatprep.subr.bf16.mxu1 %v8166_v35  ;;  %v8251_v25 = vld [vmem:[#allocation5 + $0x290] ss:$44 sps:$4 sm:$0xff]   ;;  %v8255_v33 = vld [vmem:[#allocation5 + $0x868] ss:$44 sps:$4 sm:$0xff]   ;;  %v8191_v35 = vld [vmem:[#allocation5 + $0x2e0] ss:$44 sps:$4 sm:$0xff]  }
 0x24b   :  { %5099 = vmatpush1.bf16.msra.mxu0 %v8161_v42  ;;  %5303 = vmatpush1.bf16.msra.mxu1 %v8164_v43  ;;  %v8196_v42 = vld [vmem:[#allocation5 + $0x33c] ss:$44 sps:$4 sm:$0xff]  }
 0x24c   :  { %5323 = vmatprep.subr.bf16.mxu0 %v8169_v44  ;;  %7059 = vmatprep.subr.bf16.mxu1 %v8215_v30  ;;  %v8256_v43 = vld [vmem:[#allocation5 + $0x5a8] ss:$44 sps:$4 sm:$0xff]   ;;  %v8260_v44 = vld [vmem:[#allocation5 + $0x8c0] ss:$44 sps:$4 sm:$0xff]   ;;  %v8194_v30 = vld [vmem:[#allocation5 + $0x338] ss:$44 sps:$4 sm:$0xff]  }
 0x24e   :  { %5101 = vmatmul.mubr.bf16.vlgmr.msra.gmra.mrb[8].mxu0 %v8779_v57  ;;  %5305 = vmatmul.mubr.bf16.vlgmr.msra.gmra.mrb[8].mxu1 %v8779_v57 }
 0x24f   :  { %5324 = vmatpush1.bf16.msra.mxu0 %v8167_v45  ;;  %5110 = vmatprep.mubr.bf16.mxu0 %v8781_v62  ;;  %v8199_v45 = vld [vmem:[#allocation5 + $0x394] ss:$44 sps:$4 sm:$0xff]  }
 0x250   :  { %5325 = vmatprep.subr.bf16.mxu0 %v8172_v53  ;;  %5314 = vmatprep.mubr.bf16.mxu1 %v8781_v62  ;;  %v8261_v53 = vld [vmem:[#allocation5 + $0x600] ss:$44 sps:$4 sm:$0xff]  }
 0x251   :  { %7060 = vmatpush3.bf16.msra.mxu1 %v8216_v55  ;;  %v8265_v55 = vld [vmem:[#allocation5 + $0x918] ss:$44 sps:$4 sm:$0xff]  }
 0x252   :  { %7061 = vmatprep.subr.bf16.mxu1 %v8220_v56  ;;  %v8197_v56 = vld [vmem:[#allocation5 + $0x390] ss:$44 sps:$4 sm:$0xff]  }
 0x253   :  { %5326 = vmatpush1.bf16.msra.mxu0 %v8170_v58  ;;  %v8202_v58 = vld [vmem:[#allocation5 + $0x3ec] ss:$44 sps:$4 sm:$0xff]  }
 0x254   :  { %5327 = vmatprep.subr.bf16.mxu0 %v8175_v59  ;;  %v8266_v59 = vld [vmem:[#allocation5 + $0x658] ss:$44 sps:$4 sm:$0xff]  }
 0x255   :  { %7062 = vmatpush3.bf16.msra.mxu1 %v8221_v60  ;;  %v8270_v60 = vld [vmem:[#allocation5 + $0x970] ss:$44 sps:$4 sm:$0xff]  }
 0x256   :  { %5111 = vmatmul.mubr.bf16.gmra.mrb[12].mxu0 %v8787_v1  ;;  %5315 = vmatmul.mubr.bf16.gmra.mrb[12].mxu1 %v8787_v1 }
 0x257   :  { %5328 = vmatpush1.bf16.msra.mxu0 %v8173_v61  ;;  %5355 = vmatprep.mubr.bf16.mxu0 %v8703_v50  ;;  %v8200_v61 = vld [vmem:[#allocation5 + $0x3e8] ss:$44 sps:$4 sm:$0xff]  }
 0x258   :  { %5329 = vmatprep.subr.bf16.mxu0 %v8178_v63  ;;  %7063 = vmatprep.subr.bf16.mxu1 %v8225_v0  ;;  %v8205_v63 = vld [vmem:[#allocation5 + $0x444] ss:$44 sps:$4 sm:$0xff]  }
 0x259   :  { %7064 = vmatpush3.bf16.msra.mxu1 %v8226_v47  ;;  %5559 = vmatprep.mubr.bf16.mxu1 %v8703_v50  ;;  %v8185_v50 = vld [vmem:[#allocation5 + $0x230] ss:$44 sps:$4 sm:$0xff]   ;;  %v8275_v47 = vld [vmem:[#allocation5 + $0x9c8] ss:$44 sps:$4 sm:$0xff]  }
 0x25a   :  { %7065 = vmatprep.subr.bf16.mxu1 %v8230_v48  ;;  %v8271_v0 = vld [vmem:[#allocation5 + $0x6b0] ss:$44 sps:$4 sm:$0xff]   ;;  %v8203_v48 = vld [vmem:[#allocation5 + $0x440] ss:$44 sps:$4 sm:$0xff]  }
 0x25b   :  { %5330 = vmatpush1.bf16.msra.mxu0 %v8176_v2  ;;  %v8208_v2 = vld [vmem:[#allocation5 + $0x49c] ss:$44 sps:$4 sm:$0xff]  }
 0x25c   :  { %5331 = vmatprep.subr.bf16.mxu0 %v8181_v3  ;;  %v8276_v3 = vld [vmem:[#allocation5 + $0x708] ss:$44 sps:$4 sm:$0xff]  }
 0x25d   :  { %7066 = vmatpush3.bf16.msra.mxu1 %v8231_v4  ;;  %v8280_v4 = vld [vmem:[#allocation5 + $0xa20] ss:$44 sps:$4 sm:$0xff]  }
 0x25e   :  { %7067 = vmatprep.subr.bf16.mxu1 %v8235_v6  ;;  %v8206_v6 = vld [vmem:[#allocation5 + $0x498] ss:$44 sps:$4 sm:$0xff]  }
 0x25f   :  { %5332 = vmatpush1.bf16.msra.mxu0 %v8179_v7  ;;  %v8211_v7 = vld [vmem:[#allocation5 + $0x4f4] ss:$44 sps:$4 sm:$0xff]  }
 0x260   :  { %5333 = vmatprep.subr.bf16.mxu0 %v8184_v8  ;;  %v8281_v8 = vld [vmem:[#allocation5 + $0x760] ss:$44 sps:$4 sm:$0xff]  }
 0x261   :  { %7068 = vmatpush3.bf16.msra.mxu1 %v8236_v9  ;;  %v8285_v9 = vld [vmem:[#allocation5 + $0xa78] ss:$44 sps:$4 sm:$0xff]  }
 0x262   :  { %7069 = vmatprep.subr.bf16.mxu1 %v8240_v10  ;;  %v8209_v10 = vld [vmem:[#allocation5 + $0x4f0] ss:$44 sps:$4 sm:$0xff]  }
 0x263   :  { %5334 = vmatpush1.bf16.msra.mxu0 %v8182_v11  ;;  %v8214_v11 = vld [vmem:[#allocation5 + $0x54c] ss:$44 sps:$4 sm:$0xff]  }
 0x264   :  { %5335 = vmatprep.subr.bf16.mxu0 %v8187_v12  ;;  %v8286_v12 = vld [vmem:[#allocation5 + $0x7b8] ss:$44 sps:$4 sm:$0xff]  }
 0x265   :  { %7070 = vmatpush3.bf16.msra.mxu1 %v8241_v13  ;;  %v8290_v13 = vld [vmem:[#allocation5 + $0xad0] ss:$44 sps:$4 sm:$0xff]  }
 0x266   :  { %7071 = vmatprep.subr.bf16.mxu1 %v8245_v15  ;;  %v8212_v15 = vld [vmem:[#allocation5 + $0x548] ss:$44 sps:$4 sm:$0xff]  }
 0x267   :  { %5336 = vmatpush1.bf16.msra.mxu0 %v8185_v50  ;;  %v8219_v50 = vld [vmem:[#allocation5 + $0x5a4] ss:$44 sps:$4 sm:$0xff]  }
 0x268   :  { %5337 = vmatprep.subr.bf16.mxu0 %v8190_v16  ;;  %v8291_v16 = vld [vmem:[#allocation5 + $0x810] ss:$44 sps:$4 sm:$0xff]  }
 0x269   :  { %7072 = vmatpush3.bf16.msra.mxu1 %v8246_v17  ;;  %v8295_v17 = vld [vmem:[#allocation5 + $0xde8] ss:$44 sps:$4 sm:$0xff]  }
 0x26a   :  { %7073 = vmatprep.subr.bf16.mxu1 %v8250_v18  ;;  %v8217_v18 = vld [vmem:[#allocation5 + $0x5a0] ss:$44 sps:$4 sm:$0xff]  }
 0x26b   :  { %5338 = vmatpush1.bf16.msra.mxu0 %v8188_v19  ;;  %v8224_v19 = vld [vmem:[#allocation5 + $0x5fc] ss:$44 sps:$4 sm:$0xff]  }
 0x26c   :  { %5339 = vmatprep.subr.bf16.mxu0 %v8193_v22  ;;  %v8296_v22 = vld [vmem:[#allocation5 + $0xb28] ss:$44 sps:$4 sm:$0xff]  }
 0x26d   :  { %7074 = vmatpush3.bf16.msra.mxu1 %v8251_v25  ;;  %v8300_v25 = vld [vmem:[#allocation5 + $0xe40] ss:$44 sps:$4 sm:$0xff]  }
 0x26e   :  { %7087 = vmatprep.subr.bf16.mxu1 %v8255_v33  ;;  %v8222_v33 = vld [vmem:[#allocation5 + $0x5f8] ss:$44 sps:$4 sm:$0xff]  }
 0x26f   :  { %5340 = vmatpush1.bf16.msra.mxu0 %v8191_v35  ;;  %v8229_v35 = vld [vmem:[#allocation5 + $0x654] ss:$44 sps:$4 sm:$0xff]  }
 0x270   :  { %5341 = vmatprep.subr.bf16.mxu0 %v8196_v42  ;;  %5560 = vmatmul.mubr.bf16.vlgmr.msra.gmra.mrb[16].mxu1 %v8707_v5  ;;  %v8301_v42 = vld [vmem:[#allocation5 + $0xb80] ss:$44 sps:$4 sm:$0xff]  }
 0x271   :  { %7088 = vmatpush3.bf16.msra.mxu1 %v8256_v43  ;;  %5567 = vmatprep.mubr.bf16.mxu1 %v8711_v27  ;;  %v8305_v43 = vld [vmem:[#allocation5 + $0xe98] ss:$44 sps:$4 sm:$0xff]  }
 0x272   :  { %7089 = vmatprep.subr.bf16.mxu1 %v8260_v44  ;;  %v8227_v44 = vld [vmem:[#allocation5 + $0x650] ss:$44 sps:$4 sm:$0xff]  }
 0x273   :  { %5342 = vmatpush1.bf16.msra.mxu0 %v8194_v30  ;;  %v8306_v30 = vld [vmem:[#allocation5 + $0xbd8] ss:$44 sps:$4 sm:$0xff]  }
 0x274   :  { %5343 = vmatprep.subr.bf16.mxu0 %v8199_v45  ;;  %v8232_v45 = vld [vmem:[#allocation5 + $0x6a8] ss:$44 sps:$4 sm:$0xff]  }
 0x275   :  { %7090 = vmatpush3.bf16.msra.mxu1 %v8261_v53  ;;  %v8239_v53 = vld [vmem:[#allocation5 + $0x704] ss:$44 sps:$4 sm:$0xff]  }
 0x276   :  { %7091 = vmatprep.subr.bf16.mxu1 %v8265_v55  ;;  %v8311_v55 = vld [vmem:[#allocation5 + $0xc30] ss:$44 sps:$4 sm:$0xff]  }
 0x277   :  { %5344 = vmatpush1.bf16.msra.mxu0 %v8197_v56  ;;  %v8315_v56 = vld [vmem:[#allocation5 + $0xf48] ss:$44 sps:$4 sm:$0xff]  }
 0x278   :  { %5345 = vmatprep.subr.bf16.mxu0 %v8202_v58  ;;  %5568 = vmatmul.mubr.bf16.gmra.mrb[20].mxu1 %v8713_v28  ;;  %v8237_v58 = vld [vmem:[#allocation5 + $0x700] ss:$44 sps:$4 sm:$0xff]  }
 0x279   :  { %7092 = vmatpush3.bf16.msra.mxu1 %v8266_v59  ;;  %5607 = vmatprep.mubr.bf16.mxu1 %v8725_v36  ;;  %v8316_v59 = vld [vmem:[#allocation5 + $0xc88] ss:$44 sps:$4 sm:$0xff]  }
 0x27a   :  { %7093 = vmatprep.subr.bf16.mxu1 %v8270_v60  ;;  %v8320_v60 = vld [vmem:[#allocation5 + $0xfa0] ss:$44 sps:$4 sm:$0xff]  }
 0x27b   :  { %5346 = vmatpush1.bf16.msra.mxu0 %v8200_v61  ;;  %v8249_v61 = vld [vmem:[#allocation5 + $0x7b4] ss:$44 sps:$4 sm:$0xff]  }
 0x27c   :  { %5347 = vmatprep.subr.bf16.mxu0 %v8205_v63  ;;  %v8321_v63 = vld [vmem:[#allocation5 + $0xce0] ss:$44 sps:$4 sm:$0xff]  }
 0x27d   :  { %7094 = vmatpush3.bf16.msra.mxu1 %v8271_v0  ;;  %v8325_v0 = vld [vmem:[#allocation5 + $0xff8] ss:$44 sps:$4 sm:$0xff]  }
 0x27e   :  { %7095 = vmatprep.subr.bf16.mxu1 %v8275_v47  ;;  %v8247_v47 = vld [vmem:[#allocation5 + $0x7b0] ss:$44 sps:$4 sm:$0xff]  }
 0x27f   :  { %5348 = vmatpush1.bf16.msra.mxu0 %v8203_v48  ;;  %v8254_v48 = vld [vmem:[#allocation5 + $0x80c] ss:$44 sps:$4 sm:$0xff]  }
 0x280   :  { %5349 = vmatprep.subr.bf16.mxu0 %v8208_v2  ;;  %v8326_v2 = vld [vmem:[#allocation5 + $0xd38] ss:$44 sps:$4 sm:$0xff]  }
 0x281   :  { %7096 = vmatpush3.bf16.msra.mxu1 %v8276_v3  ;;  %v8330_v3 = vld [vmem:[#allocation5 + $0x1050] ss:$44 sps:$4 sm:$0xff]  }
 0x282   :  { %7097 = vmatprep.subr.bf16.mxu1 %v8280_v4  ;;  %v8252_v4 = vld [vmem:[#allocation5 + $0x808] ss:$44 sps:$4 sm:$0xff]  }
 0x283   :  { %5350 = vmatpush1.bf16.msra.mxu0 %v8206_v6  ;;  %v8259_v6 = vld [vmem:[#allocation5 + $0x864] ss:$44 sps:$4 sm:$0xff]  }
 0x284   :  { %5351 = vmatprep.subr.bf16.mxu0 %v8211_v7  ;;  %v8331_v7 = vld [vmem:[#allocation5 + $0xd90] ss:$44 sps:$4 sm:$0xff]  }
 0x285   :  { %7098 = vmatpush3.bf16.msra.mxu1 %v8281_v8  ;;  %v8335_v8 = vld [vmem:[#allocation5 + $0x1368] ss:$44 sps:$4 sm:$0xff]  }
 0x286   :  { %7099 = vmatprep.subr.bf16.mxu1 %v8285_v9  ;;  %v8257_v9 = vld [vmem:[#allocation5 + $0x860] ss:$44 sps:$4 sm:$0xff]  }
 0x287   :  { %5352 = vmatpush1.bf16.msra.mxu0 %v8209_v10  ;;  %v8264_v10 = vld [vmem:[#allocation5 + $0x8bc] ss:$44 sps:$4 sm:$0xff]  }
 0x288   :  { %5353 = vmatprep.subr.bf16.mxu0 %v8214_v11  ;;  %v8336_v11 = vld [vmem:[#allocation5 + $0x10a8] ss:$44 sps:$4 sm:$0xff]  }
 0x289   :  { %7100 = vmatpush3.bf16.msra.mxu1 %v8286_v12  ;;  %v8340_v12 = vld [vmem:[#allocation5 + $0x13c0] ss:$44 sps:$4 sm:$0xff]  }
 0x28a   :  { %7101 = vmatprep.subr.bf16.mxu1 %v8290_v13  ;;  %v8262_v13 = vld [vmem:[#allocation5 + $0x8b8] ss:$44 sps:$4 sm:$0xff]  }
 0x28b   :  { %5354 = vmatpush1.bf16.msra.mxu0 %v8212_v15  ;;  %v8269_v15 = vld [vmem:[#allocation5 + $0x914] ss:$44 sps:$4 sm:$0xff]  }
 0x28c   :  { %5374 = vmatprep.subr.bf16.mxu0 %v8219_v50  ;;  %v8341_v50 = vld [vmem:[#allocation5 + $0x1100] ss:$44 sps:$4 sm:$0xff]  }
 0x28d   :  { %7102 = vmatpush3.bf16.msra.mxu1 %v8291_v16  ;;  %v8345_v16 = vld [vmem:[#allocation5 + $0x1418] ss:$44 sps:$4 sm:$0xff]  }
 0x28e   :  { %5356 = vmatmul.mubr.bf16.vlgmr.msra.gmra.mrb[16].mxu0 %v8707_v5  ;;  %7115 = vmatprep.subr.bf16.mxu1 %v8295_v17  ;;  %v8234_v5 = vld [vmem:[#allocation5 + $0x6ac] ss:$44 sps:$4 sm:$0xff]   ;;  %v8267_v17 = vld [vmem:[#allocation5 + $0x910] ss:$44 sps:$4 sm:$0xff]  }
 0x28f   :  { %5375 = vmatpush1.bf16.msra.mxu0 %v8217_v18  ;;  %5365 = vmatprep.mubr.bf16.mxu0 %v8711_v27  ;;  %v8310_v27 = vld [vmem:[#allocation5 + $0xef0] ss:$44 sps:$4 sm:$0xff]   ;;  %v8274_v18 = vld [vmem:[#allocation5 + $0x96c] ss:$44 sps:$4 sm:$0xff]  }
 0x290   :  { %5376 = vmatprep.subr.bf16.mxu0 %v8224_v19  ;;  %5608 = vmatmul.mubr.bf16.vlgmr.msra.gmra.mrb[24].mxu1 %v8731_v14  ;;  %v8346_v19 = vld [vmem:[#allocation5 + $0x1158] ss:$44 sps:$4 sm:$0xff]  }
 0x291   :  { %7116 = vmatpush3.bf16.msra.mxu1 %v8296_v22  ;;  %5615 = vmatprep.mubr.bf16.mxu1 %v8733_v20  ;;  %v8350_v22 = vld [vmem:[#allocation5 + $0x1470] ss:$44 sps:$4 sm:$0xff]  }
 0x292   :  { %7117 = vmatprep.subr.bf16.mxu1 %v8300_v25  ;;  %v8272_v25 = vld [vmem:[#allocation5 + $0x968] ss:$44 sps:$4 sm:$0xff]  }
 0x293   :  { %5377 = vmatpush1.bf16.msra.mxu0 %v8222_v33  ;;  %v8279_v33 = vld [vmem:[#allocation5 + $0x9c4] ss:$44 sps:$4 sm:$0xff]  }
 0x294   :  { %5378 = vmatprep.subr.bf16.mxu0 %v8229_v35  ;;  %v8351_v35 = vld [vmem:[#allocation5 + $0x11b0] ss:$44 sps:$4 sm:$0xff]  }
 0x295   :  { %7118 = vmatpush3.bf16.msra.mxu1 %v8301_v42  ;;  %v8355_v42 = vld [vmem:[#allocation5 + $0x14c8] ss:$44 sps:$4 sm:$0xff]  }
 0x296   :  { %5366 = vmatmul.mubr.bf16.gmra.mrb[20].mxu0 %v8713_v28  ;;  %7119 = vmatprep.subr.bf16.mxu1 %v8305_v43  ;;  %v8244_v28 = vld [vmem:[#allocation5 + $0x75c] ss:$44 sps:$4 sm:$0xff]   ;;  %v8277_v43 = vld [vmem:[#allocation5 + $0x9c0] ss:$44 sps:$4 sm:$0xff]  }
 0x297   :  { %5379 = vmatpush1.bf16.msra.mxu0 %v8227_v44  ;;  %5406 = vmatprep.mubr.bf16.mxu0 %v8725_v36  ;;  %v8242_v36 = vld [vmem:[#allocation5 + $0x758] ss:$44 sps:$4 sm:$0xff]   ;;  %v8284_v44 = vld [vmem:[#allocation5 + $0xa1c] ss:$44 sps:$4 sm:$0xff]  }
 0x298   :  { %5380 = vmatprep.subr.bf16.mxu0 %v8234_v5  ;;  %5616 = vmatmul.mubr.bf16.gmra.mrb[28].mxu1 %v8739_v29  ;;  %v8356_v5 = vld [vmem:[#allocation5 + $0x1208] ss:$44 sps:$4 sm:$0xff]  }
 0x299   :  { %7120 = vmatpush3.bf16.msra.mxu1 %v8306_v30  ;;  %5655 = vmatprep.mubr.bf16.mxu1 %v8747_v34  ;;  %v8360_v30 = vld [vmem:[#allocation5 + $0x1520] ss:$44 sps:$4 sm:$0xff]  }
 0x29a   :  { %7121 = vmatprep.subr.bf16.mxu1 %v8310_v27  ;;  %v8282_v27 = vld [vmem:[#allocation5 + $0xa18] ss:$44 sps:$4 sm:$0xff]  }
 0x29b   :  { %5381 = vmatpush1.bf16.msra.mxu0 %v8232_v45  ;;  %v8289_v45 = vld [vmem:[#allocation5 + $0xa74] ss:$44 sps:$4 sm:$0xff]  }
 0x29c   :  { %5382 = vmatprep.subr.bf16.mxu0 %v8239_v53  ;;  %v8361_v53 = vld [vmem:[#allocation5 + $0x1260] ss:$44 sps:$4 sm:$0xff]  }
 0x29d   :  { %7122 = vmatpush3.bf16.msra.mxu1 %v8311_v55  ;;  %v8365_v55 = vld [vmem:[#allocation5 + $0x1578] ss:$44 sps:$4 sm:$0xff]  }
 0x29e   :  { %7123 = vmatprep.subr.bf16.mxu1 %v8315_v56  ;;  %v8287_v56 = vld [vmem:[#allocation5 + $0xa70] ss:$44 sps:$4 sm:$0xff]  }
 0x29f   :  { %5383 = vmatpush1.bf16.msra.mxu0 %v8237_v58  ;;  %v8294_v58 = vld [vmem:[#allocation5 + $0xacc] ss:$44 sps:$4 sm:$0xff]  }
 0x2a0   :  { %5384 = vmatprep.subr.bf16.mxu0 %v8244_v28  ;;  %v8366_v28 = vld [vmem:[#allocation5 + $0x12b8] ss:$44 sps:$4 sm:$0xff]  }
 0x2a1   :  { %7124 = vmatpush3.bf16.msra.mxu1 %v8316_v59  ;;  %v8370_v59 = vld [vmem:[#allocation5 + $0x15d0] ss:$44 sps:$4 sm:$0xff]  }
 0x2a2   :  { %7125 = vmatprep.subr.bf16.mxu1 %v8320_v60  ;;  %v8292_v60 = vld [vmem:[#allocation5 + $0xac8] ss:$44 sps:$4 sm:$0xff]  }
 0x2a3   :  { %5385 = vmatpush1.bf16.msra.mxu0 %v8242_v36  ;;  %v8299_v36 = vld [vmem:[#allocation5 + $0xb24] ss:$44 sps:$4 sm:$0xff]  }
 0x2a4   :  { %5386 = vmatprep.subr.bf16.mxu0 %v8249_v61  ;;  %v8371_v61 = vld [vmem:[#allocation5 + $0x1310] ss:$44 sps:$4 sm:$0xff]  }
 0x2a5   :  { %7126 = vmatpush3.bf16.msra.mxu1 %v8321_v63  ;;  %v8375_v63 = vld [vmem:[#allocation7 + $0x40] sm:$0xff]  }
 0x2a6   :  { %7127 = vmatprep.subr.bf16.mxu1 %v8325_v0  ;;  %v8297_v0 = vld [vmem:[#allocation5 + $0xb20] ss:$44 sps:$4 sm:$0xff]  }
 0x2a7   :  { %5387 = vmatpush1.bf16.msra.mxu0 %v8247_v47  ;;  %v8304_v47 = vld [vmem:[#allocation5 + $0xb7c] ss:$44 sps:$4 sm:$0xff]  }
 0x2a8   :  { %5388 = vmatprep.subr.bf16.mxu0 %v8254_v48  ;;  %v8376_v48 = vld [vmem:[#allocation7] sm:$0xff]  }
 0x2a9   :  { %7128 = vmatpush3.bf16.msra.mxu1 %v8326_v2  ;;  %v8380_v2 = vld [vmem:[#allocation7 + $0x48] sm:$0xff]  }
 0x2aa   :  { %7129 = vmatprep.subr.bf16.mxu1 %v8330_v3  ;;  %v8302_v3 = vld [vmem:[#allocation5 + $0xb78] ss:$44 sps:$4 sm:$0xff]  }
 0x2ab   :  { %5389 = vmatpush1.bf16.msra.mxu0 %v8252_v4  ;;  %v8309_v4 = vld [vmem:[#allocation5 + $0xbd4] ss:$44 sps:$4 sm:$0xff]  }
 0x2ac   :  { %5390 = vmatprep.subr.bf16.mxu0 %v8259_v6  ;;  %v8381_v6 = vld [vmem:[#allocation7 + $0x8] sm:$0xff]  }
 0x2ad   :  { %7130 = vmatpush3.bf16.msra.mxu1 %v8331_v7  ;;  %v8385_v7 = vld [vmem:[#allocation7 + $0x50] sm:$0xff]  }
 0x2ae   :  { %7143 = vmatprep.subr.bf16.mxu1 %v8335_v8  ;;  %v8307_v8 = vld [vmem:[#allocation5 + $0xbd0] ss:$44 sps:$4 sm:$0xff]  }
 0x2af   :  { %5391 = vmatpush1.bf16.msra.mxu0 %v8257_v9  ;;  %v8386_v9 = vld [vmem:[#allocation7 + $0x10] sm:$0xff]  }
 0x2b0   :  { %5392 = vmatprep.subr.bf16.mxu0 %v8264_v10  ;;  %5656 = vmatmul.mubr.bf16.vlgmr.msra.gmra.mrb[32].mxu1 %v8755_v37  ;;  %v8312_v10 = vld [vmem:[#allocation5 + $0xc28] ss:$44 sps:$4 sm:$0xff]  }
 0x2b1   :  { %7144 = vmatpush3.bf16.msra.mxu1 %v8336_v11  ;;  %5663 = vmatprep.mubr.bf16.mxu1 %v8757_v41  ;;  %v8319_v11 = vld [vmem:[#allocation5 + $0xc84] ss:$44 sps:$4 sm:$0xff]  }
 0x2b2   :  { %7145 = vmatprep.subr.bf16.mxu1 %v8340_v12  ;;  %v8391_v12 = vld [vmem:[#allocation7 + $0x18] sm:$0xff]  }
 0x2b3   :  { %5393 = vmatpush1.bf16.msra.mxu0 %v8262_v13  ;;  %v8395_v13 = vld [vmem:[#allocation7 + $0x60] sm:$0xff]  }
 0x2b4   :  { %5394 = vmatprep.subr.bf16.mxu0 %v8269_v15  ;;  %v8317_v15 = vld [vmem:[#allocation5 + $0xc80] ss:$44 sps:$4 sm:$0xff]  }
 0x2b5   :  { %7146 = vmatpush3.bf16.msra.mxu1 %v8341_v50  ;;  %v8324_v50 = vld [vmem:[#allocation5 + $0xcdc] ss:$44 sps:$4 sm:$0xff]  }
 0x2b6   :  { %7147 = vmatprep.subr.bf16.mxu1 %v8345_v16  ;;  %v8400_v16 = vld [vmem:[#allocation7 + $0x68] sm:$0xff]  }
 0x2b7   :  { %5395 = vmatpush1.bf16.msra.mxu0 %v8267_v17  ;;  %v8322_v17 = vld [vmem:[#allocation5 + $0xcd8] ss:$44 sps:$4 sm:$0xff]  }
 0x2b8   :  { %5396 = vmatprep.subr.bf16.mxu0 %v8274_v18  ;;  %5664 = vmatmul.mubr.bf16.gmra.mrb[36].mxu1 %v8763_v46  ;;  %v8401_v18 = vld [vmem:[#allocation7 + $0x28] sm:$0xff]  }
 0x2b9   :  { %7148 = vmatpush3.bf16.msra.mxu1 %v8346_v19  ;;  %5703 = vmatprep.mubr.bf16.mxu1 %v8771_v52  ;;  %v8405_v19 = vld [vmem:[#allocation7 + $0x70] sm:$0xff]  }
 0x2ba   :  { %7149 = vmatprep.subr.bf16.mxu1 %v8350_v22  ;;  %v8327_v22 = vld [vmem:[#allocation5 + $0xd30] ss:$44 sps:$4 sm:$0xff]  }
 0x2bb   :  { %5397 = vmatpush1.bf16.msra.mxu0 %v8272_v25  ;;  %v8334_v25 = vld [vmem:[#allocation5 + $0xd8c] ss:$44 sps:$4 sm:$0xff]  }
 0x2bc   :  { %5398 = vmatprep.subr.bf16.mxu0 %v8279_v33  ;;  %v8406_v33 = vld [vmem:[#allocation7 + $0x30] sm:$0xff]  }
 0x2bd   :  { %7150 = vmatpush3.bf16.msra.mxu1 %v8351_v35  ;;  %v8410_v35 = vld [vmem:[#allocation7 + $0x78] sm:$0xff]  }
 0x2be   :  { %7151 = vmatprep.subr.bf16.mxu1 %v8355_v42  ;;  %v8332_v42 = vld [vmem:[#allocation5 + $0xd88] ss:$44 sps:$4 sm:$0xff]  }
 0x2bf   :  { %5399 = vmatpush1.bf16.msra.mxu0 %v8277_v43  ;;  %v8339_v43 = vld [vmem:[#allocation5 + $0xde4] ss:$44 sps:$4 sm:$0xff]  }
 0x2c0   :  { %5400 = vmatprep.subr.bf16.mxu0 %v8284_v44  ;;  %v8411_v44 = vld [vmem:[#allocation7 + $0x38] sm:$0xff]  }
 0x2c1   :  { %7152 = vmatpush3.bf16.msra.mxu1 %v8356_v5  ;;  %v8337_v5 = vld [vmem:[#allocation5 + $0xde0] ss:$44 sps:$4 sm:$0xff]  }
 0x2c2   :  { %7153 = vmatprep.subr.bf16.mxu1 %v8360_v30  ;;  %v8344_v30 = vld [vmem:[#allocation5 + $0xe3c] ss:$44 sps:$4 sm:$0xff]  }
 0x2c3   :  { %5401 = vmatpush1.bf16.msra.mxu0 %v8282_v27  ;;  %v8342_v27 = vld [vmem:[#allocation5 + $0xe38] ss:$44 sps:$4 sm:$0xff]  }
 0x2c4   :  { %5402 = vmatprep.subr.bf16.mxu0 %v8289_v45  ;;  %v8349_v45 = vld [vmem:[#allocation5 + $0xe94] ss:$44 sps:$4 sm:$0xff]  }
 0x2c5   :  { %7154 = vmatpush3.bf16.msra.mxu1 %v8361_v53  ;;  %v8347_v53 = vld [vmem:[#allocation5 + $0xe90] ss:$44 sps:$4 sm:$0xff]  }
 0x2c6   :  { %7155 = vmatprep.subr.bf16.mxu1 %v8365_v55  ;;  %v8354_v55 = vld [vmem:[#allocation5 + $0xeec] ss:$44 sps:$4 sm:$0xff]  }
 0x2c7   :  { %5403 = vmatpush1.bf16.msra.mxu0 %v8287_v56  ;;  %v8352_v56 = vld [vmem:[#allocation5 + $0xee8] ss:$44 sps:$4 sm:$0xff]  }
 0x2c8   :  { %5404 = vmatprep.subr.bf16.mxu0 %v8294_v58  ;;  %v8359_v58 = vld [vmem:[#allocation5 + $0xf44] ss:$44 sps:$4 sm:$0xff]  }
 0x2c9   :  { %7156 = vmatpush3.bf16.msra.mxu1 %v8366_v28  ;;  %v8357_v28 = vld [vmem:[#allocation5 + $0xf40] ss:$44 sps:$4 sm:$0xff]  }
 0x2ca   :  { %7157 = vmatprep.subr.bf16.mxu1 %v8370_v59  ;;  %v8364_v59 = vld [vmem:[#allocation5 + $0xf9c] ss:$44 sps:$4 sm:$0xff]  }
 0x2cb   :  { %5405 = vmatpush1.bf16.msra.mxu0 %v8292_v60  ;;  %v8362_v60 = vld [vmem:[#allocation5 + $0xf98] ss:$44 sps:$4 sm:$0xff]  }
 0x2cc   :  { %5425 = vmatprep.subr.bf16.mxu0 %v8299_v36  ;;  %v8369_v36 = vld [vmem:[#allocation5 + $0xff4] ss:$44 sps:$4 sm:$0xff]  }
 0x2cd   :  { %7158 = vmatpush3.bf16.msra.mxu1 %v8371_v61  ;;  %v8367_v61 = vld [vmem:[#allocation5 + $0xff0] ss:$44 sps:$4 sm:$0xff]  }
 0x2ce   :  { %5407 = vmatmul.mubr.bf16.vlgmr.msra.gmra.mrb[16].mxu0 %v8731_v14  ;;  %7171 = vmatprep.subr.bf16.mxu1 %v8375_v63  ;;  %v8314_v14 = vld [vmem:[#allocation5 + $0xc2c] ss:$44 sps:$4 sm:$0xff]  }
 0x2cf   :  { %5426 = vmatpush1.bf16.msra.mxu0 %v8297_v0  ;;  %5416 = vmatprep.mubr.bf16.mxu0 %v8733_v20  ;;  %v8390_v20 = vld [vmem:[#allocation7 + $0x58] sm:$0xff]   ;;  %v8372_v0 = vld [vmem:[#allocation5 + $0x1048] ss:$44 sps:$4 sm:$0xff]  }
 0x2d0   :  { %5427 = vmatprep.subr.bf16.mxu0 %v8304_v47  ;;  %5704 = vmatmul.mubr.bf16.vlgmr.msra.gmra.mrb[40].mxu1 %v8779_v57  ;;  %v8374_v63 = vld [vmem:[#allocation5 + $0x104c] ss:$44 sps:$4 sm:$0xff]   ;;  %v8379_v47 = vld [vmem:[#allocation5 + $0x10a4] ss:$44 sps:$4 sm:$0xff]  }
 0x2d1   :  { %7172 = vmatpush3.bf16.msra.mxu1 %v8376_v48  ;;  %5711 = vmatprep.mubr.bf16.mxu1 %v8781_v62  ;;  %v8377_v48 = vld [vmem:[#allocation5 + $0x10a0] ss:$44 sps:$4 sm:$0xff]  }
 0x2d2   :  { %7173 = vmatprep.subr.bf16.mxu1 %v8380_v2  ;;  %v8384_v2 = vld [vmem:[#allocation5 + $0x10fc] ss:$44 sps:$4 sm:$0xff]  }
 0x2d3   :  { %5428 = vmatpush1.bf16.msra.mxu0 %v8302_v3  ;;  %v8382_v3 = vld [vmem:[#allocation5 + $0x10f8] ss:$44 sps:$4 sm:$0xff]  }
 0x2d4   :  { %5429 = vmatprep.subr.bf16.mxu0 %v8309_v4  ;;  %v8389_v4 = vld [vmem:[#allocation5 + $0x1154] ss:$44 sps:$4 sm:$0xff]  }
 0x2d5   :  { %7174 = vmatpush3.bf16.msra.mxu1 %v8381_v6  ;;  %v8387_v6 = vld [vmem:[#allocation5 + $0x1150] ss:$44 sps:$4 sm:$0xff]  }
 0x2d6   :  { %5417 = vmatmul.mubr.bf16.gmra.mrb[20].mxu0 %v8739_v29  ;;  %7175 = vmatprep.subr.bf16.mxu1 %v8385_v7  ;;  %v8396_v29 = vld [vmem:[#allocation7 + $0x20] sm:$0xff]   ;;  %v8394_v7 = vld [vmem:[#allocation5 + $0x11ac] ss:$44 sps:$4 sm:$0xff]  }
 0x2d7   :  { %5430 = vmatpush1.bf16.msra.mxu0 %v8307_v8  ;;  %5457 = vmatprep.mubr.bf16.mxu0 %v8747_v34  ;;  %v8329_v34 = vld [vmem:[#allocation5 + $0xd34] ss:$44 sps:$4 sm:$0xff]  }
 0x2d8   :  { %5431 = vmatprep.subr.bf16.mxu0 %v8314_v14  ;;  %5712 = vmatmul.mubr.bf16.gmra.mrb[44].mxu1 %v8787_v1  ;;  %v8392_v8 = vld [vmem:[#allocation5 + $0x11a8] ss:$44 sps:$4 sm:$0xff]   ;;  %v8399_v14 = vld [vmem:[#allocation5 + $0x1204] ss:$44 sps:$4 sm:$0xff]  }
 0x2d9   :  { %7176 = vmatpush3.bf16.msra.mxu1 %v8386_v9  ;;  %v8404_v9 = vld [vmem:[#allocation5 + $0x125c] ss:$44 sps:$4 sm:$0xff]  }
 0x2da   :  { %7177 = vmatprep.subr.bf16.mxu1 %v8390_v20  ;;  %v8409_v20 = vld [vmem:[#allocation5 + $0x12b4] ss:$44 sps:$4 sm:$0xff]  }
 0x2db   :  { %5432 = vmatpush1.bf16.msra.mxu0 %v8312_v10 }
 0x2dc   :  { %5433 = vmatprep.subr.bf16.mxu0 %v8319_v11 }
 0x2dd   :  { %7178 = vmatpush3.bf16.msra.mxu1 %v8391_v12  ;;  %v5720_v12 = vmul.f32 %v8821_v24, %v8821_v24  ;;  %v5726_v24 = vmul.f32 %v8827_v38, %v8827_v38  ;;  %v8417_v38 = vld [vmem:[#allocation5 + $0x1364] ss:$44 sps:$4 sm:$0xff]  }
 0x2de   :  { %7179 = vmatprep.subr.bf16.mxu1 %v8395_v13 }
 0x2df   :  { %5434 = vmatpush1.bf16.msra.mxu0 %v8317_v15 }
 0x2e0   :  { %5435 = vmatprep.subr.bf16.mxu0 %v8324_v50  ;;  %v5724_v50 = vmul.f32 %v8825_v32, %v8825_v32 }
 0x2e1   :  { %7180 = vmatpush3.bf16.msra.mxu1 %v8396_v29  ;;  %v5721_v29 = vmul.f32 %v8819_v23, %v8819_v23 }
 0x2e2   :  { %7181 = vmatprep.subr.bf16.mxu1 %v8400_v16 }
 0x2e3   :  { %5436 = vmatpush1.bf16.msra.mxu0 %v8322_v17 }
 0x2e4   :  { %5437 = vmatprep.subr.bf16.mxu0 %v8329_v34 }
 0x2e5   :  { %7182 = vmatpush3.bf16.msra.mxu1 %v8401_v18 }
 0x2e6   :  { %7183 = vmatprep.subr.bf16.mxu1 %v8405_v19  ;;  %v8407_v19 = vld [vmem:[#allocation5 + $0x12b0] ss:$44 sps:$4 sm:$0xff]  }
 0x2e7   :  { %5438 = vmatpush1.bf16.msra.mxu0 %v8327_v22 }
 0x2e8   :  { %5439 = vmatprep.subr.bf16.mxu0 %v8334_v25 }
 0x2e9   :  { %7184 = vmatpush3.bf16.msra.mxu1 %v8406_v33 }
 0x2ea   :  { %7185 = vmatprep.subr.bf16.mxu1 %v8410_v35  ;;  %v8414_v35 = vld [vmem:[#allocation5 + $0x130c] ss:$44 sps:$4 sm:$0xff]  }
 0x2eb   :  { %5440 = vmatpush1.bf16.msra.mxu0 %v8332_v42 }
 0x2ec   :  { %5441 = vmatprep.subr.bf16.mxu0 %v8339_v43 }
 0x2ed   :  { %7186 = vmatpush3.bf16.msra.mxu1 %v8411_v44 }
 0x2ef   :  { %5442 = vmatpush1.bf16.msra.mxu0 %v8337_v5 }
 0x2f0   :  { %5443 = vmatprep.subr.bf16.mxu0 %v8344_v30 }
 0x2f3   :  { %5444 = vmatpush1.bf16.msra.mxu0 %v8342_v27 }
 0x2f4   :  { %5445 = vmatprep.subr.bf16.mxu0 %v8349_v45 }
 0x2f7   :  { %5446 = vmatpush1.bf16.msra.mxu0 %v8347_v53 }
 0x2f8   :  { %5447 = vmatprep.subr.bf16.mxu0 %v8354_v55 }
 0x2fb   :  { %5448 = vmatpush1.bf16.msra.mxu0 %v8352_v56 }
 0x2fc   :  { %5449 = vmatprep.subr.bf16.mxu0 %v8359_v58 }
 0x2ff   :  { %5450 = vmatpush1.bf16.msra.mxu0 %v8357_v28  ;;  %v5729_v28 = vmul.f32 %v8833_v31, %v8833_v31  ;;  %v8420_v31 = vld [vmem:[#allocation5 + $0x13bc] ss:$44 sps:$4 sm:$0xff]  }
 0x300   :  { %5451 = vmatprep.subr.bf16.mxu0 %v8364_v59  ;;  %v5730_v59 = vmul.f32 %v8837_v51, %v8837_v51 }
 0x303   :  { %5452 = vmatpush1.bf16.msra.mxu0 %v8362_v60 }
 0x304   :  { %5453 = vmatprep.subr.bf16.mxu0 %v8369_v36 }
 0x307   :  { %5454 = vmatpush1.bf16.msra.mxu0 %v8367_v61 }
 0x308   :  { %5455 = vmatprep.subr.bf16.mxu0 %v8374_v63  ;;  %v5731_v63 = vmul.f32 %v8835_v49, %v8835_v49  ;;  %v8423_v49 = vld [vmem:[#allocation5 + $0x1414] ss:$44 sps:$4 sm:$0xff]  }
 0x30b   :  { %5456 = vmatpush1.bf16.msra.mxu0 %v8372_v0 }
 0x30c   :  { %5476 = vmatprep.subr.bf16.mxu0 %v8379_v47 }
 0x30e   :  { %5458 = vmatmul.mubr.bf16.vlgmr.msra.gmra.mrb[16].mxu0 %v8755_v37  ;;  %v8397_v37 = vld [vmem:[#allocation5 + $0x1200] ss:$44 sps:$4 sm:$0xff]  }
 0x30f   :  { %5477 = vmatpush1.bf16.msra.mxu0 %v8377_v48  ;;  %5467 = vmatprep.mubr.bf16.mxu0 %v8757_v41  ;;  %v8402_v41 = vld [vmem:[#allocation5 + $0x1258] ss:$44 sps:$4 sm:$0xff]  }
 0x310   :  { %5478 = vmatprep.subr.bf16.mxu0 %v8384_v2  ;;  %v8415_v2 = vld [vmem:[#allocation5 + $0x1360] ss:$44 sps:$4 sm:$0xff]  }
 0x313   :  { %5479 = vmatpush1.bf16.msra.mxu0 %v8382_v3 }
 0x314   :  { %5480 = vmatprep.subr.bf16.mxu0 %v8389_v4 }
 0x316   :  { %5468 = vmatmul.mubr.bf16.gmra.mrb[20].mxu0 %v8763_v46  ;;  %v5719_v46 = vmul.f32 %v8817_v21, %v8817_v21  ;;  %v5725_v21 = vmul.f32 %v8829_v39, %v8829_v39  ;;  %v8412_v39 = vld [vmem:[#allocation5 + $0x1308] ss:$44 sps:$4 sm:$0xff]  }
 0x317   :  { %5481 = vmatpush1.bf16.msra.mxu0 %v8387_v6  ;;  %5508 = vmatprep.mubr.bf16.mxu0 %v8771_v52 }
 0x318   :  { %5482 = vmatprep.subr.bf16.mxu0 %v8394_v7 }
 0x31b   :  { %5483 = vmatpush1.bf16.msra.mxu0 %v8392_v8 }
 0x31c   :  { %5484 = vmatprep.subr.bf16.mxu0 %v8399_v14 }
 0x31f   :  { %5485 = vmatpush1.bf16.msra.mxu0 %v8397_v37  ;;  %v8418_v37 = vld [vmem:[#allocation5 + $0x13b8] ss:$44 sps:$4 sm:$0xff]  }
 0x320   :  { %5486 = vmatprep.subr.bf16.mxu0 %v8404_v9 }
 0x321   :  { %v8876_v10 = vpop.f32.mrb[8].mxu0  ;;  %v5306_v11 = vpop.f32.mrb[8].mxu1 }
 0x322   :  { %v5735_v52 = vmul.f32 %v5306_v11, %v5306_v11  ;;  %v5104_v13 = vpop.f32.mrb[9].mxu0  ;;  %v5308_v15 = vpop.f32.mrb[9].mxu1  ;;  %v8424_v11 = vld [vmem:[#allocation5 + $0x1468] ss:$44 sps:$4 sm:$0xff]  }
 0x323   :  { %v5734_v16 = vmul.f32 %v5104_v13, %v5104_v13  ;;  %v5736_v17 = vmul.f32 %v5308_v15, %v5308_v15  ;;  %v8886_v34 = vpop.f32.mrb[10].mxu0  ;;  %v5310_v18 = vpop.f32.mrb[10].mxu1  ;;  %5487 = vmatpush1.bf16.msra.mxu0 %v8402_v41  ;;  %v8421_v41 = vld [vmem:[#allocation5 + $0x1410] ss:$44 sps:$4 sm:$0xff]   ;;  %v8430_v13 = vld [vmem:[#allocation5 + $0x1518] ss:$44 sps:$4 sm:$0xff]  }
 0x324   :  { %v5750_v22 = vadd.f32 %v5735_v52, %v5720_v12  ;;  %v5740_v25 = vmul.f32 %v5310_v18, %v5310_v18  ;;  %v5108_v33 = vpop.f32.mrb[11].mxu0  ;;  %v5312_v32 = vpop.f32.mrb[11].mxu1  ;;  %5488 = vmatprep.subr.bf16.mxu0 %v8409_v20  ;;  %v8426_v20 = vld [vmem:[#allocation5 + $0x146c] ss:$44 sps:$4 sm:$0xff]   ;;  %v8432_v52 = vld [vmem:[#allocation5 + $0x151c] ss:$44 sps:$4 sm:$0xff]  }
 0x325   :  { %v5749_v23 = vadd.f32 %v5734_v16, %v5719_v46  ;;  %v8892_v42 = vadd.f32 %v5736_v17, %v5721_v29  ;;  %v5739_v43 = vmul.f32 %v5108_v33, %v5108_v33  ;;  %v5741_v44 = vmul.f32 %v5312_v32, %v5312_v32  ;;  %v8429_v46 = vld [vmem:[#allocation5 + $0x14c4] ss:$44 sps:$4 sm:$0xff]   ;;  %v8427_v12 = vld [vmem:[#allocation5 + $0x14c0] ss:$44 sps:$4 sm:$0xff]  }
 0x326   :  { %v5755_v5 = vadd.f32 %v5740_v25, %v5725_v21  ;;  %v8435_v15 = vld [vmem:[#allocation5 + $0x1574] ss:$44 sps:$4 sm:$0xff]   ;;  %v8438_v16 = vld [vmem:[#allocation5 + $0x15cc] ss:$44 sps:$4 sm:$0xff]  }
 0x327   :  { %v5754_v30 = vadd.f32 %v5739_v43, %v5724_v50  ;;  %v8894_v27 = vadd.f32 %v5741_v44, %v5726_v24  ;;  %5489 = vmatpush1.bf16.msra.mxu0 %v8407_v19  ;;  %v8433_v50 = vld [vmem:[#allocation5 + $0x1570] ss:$44 sps:$4 sm:$0xff]   ;;  %v8436_v24 = vld [vmem:[#allocation5 + $0x15c8] ss:$44 sps:$4 sm:$0xff]  }
 0x328   :  { %5490 = vmatprep.subr.bf16.mxu0 %v8414_v35  ;;  %v5765_v45 = vpack.c.bf16 %v5755_v5, %v5750_v22 }
 0x329   :  { %v5764_v53 = vpack.c.bf16 %v5754_v30, %v5749_v23  ;;  %v5766_v55 = vpack.c.bf16 %v8894_v27, %v8892_v42  ;;  %v8898_v56 = vpop.f32.mrb[12].mxu0  ;;  %v5316_v58 = vpop.f32.mrb[12].mxu1  ;;  %v8459_v42 = vld [vmem:[#allocation7 + $0x120] sm:$0xff]   ;;  %v8460_v27 = vld [vmem:[#allocation7 + $0x128] sm:$0xff]  }
 0x32a   :  { %v5745_v60 = vmul.f32 %v5316_v58, %v5316_v58  ;;  %v5114_v36 = vpop.f32.mrb[13].mxu0  ;;  %v5318_v61 = vpop.f32.mrb[13].mxu1  ;;  %6126 = vmatprep.mubr.bf16.mxu1 %v5765_v45 }
 0x32b   :  { %v5744_v0 = vmul.f32 %v5114_v36, %v5114_v36  ;;  %v5746_v47 = vmul.f32 %v5318_v61, %v5318_v61  ;;  %v5116_v48 = vpop.f32.mrb[14].mxu0  ;;  %5491 = vmatpush1.bf16.msra.mxu0 %v8412_v39  ;;  %6127 = vmatmul.mubr.bf16.vlgmr.msra.gmra.mrb[48].mxu1 %v5764_v53  ;;  %v5320_v3 = vpop.f32.mrb[14].mxu1 }
 0x32c   :  { %v5760_v4 = vadd.f32 %v5745_v60, %v5730_v59  ;;  %v5117_v6 = vpop.f32.mrb[15].mxu0  ;;  %5492 = vmatprep.subr.bf16.mxu0 %v8417_v38  ;;  %v5321_v7 = vpop.f32.mrb[15].mxu1 }
 0x32d   :  { %v5759_v51 = vadd.f32 %v5744_v0, %v5729_v28  ;;  %v8906_v8 = vadd.f32 %v5746_v47, %v5731_v63  ;;  %v8441_v6 = vld [vmem:[#allocation7 + $0xc8] sm:$0xff]  }
 0x32e   :  { %v5770_v14 = vpack.c.bf16 %v5760_v4, %v5760_v4  ;;  %v8440_v4 = vld [vmem:[#allocation7 + $0x80] sm:$0xff]   ;;  %v8442_v7 = vld [vmem:[#allocation7 + $0x88] sm:$0xff]  }
 0x32f   :  { %5493 = vmatpush1.bf16.msra.mxu0 %v8415_v2  ;;  %v5769_v9 = vpack.c.bf16 %v5759_v51, %v5759_v51  ;;  %v8439_v2 = vld [vmem:[#allocation7 + $0xc0] sm:$0xff]  }
 0x330   :  { %6134 = vmatprep.mubr.bf16.mxu1 %v5770_v14  ;;  %5494 = vmatprep.subr.bf16.mxu0 %v8420_v31  ;;  %v8443_v14 = vld [vmem:[#allocation7 + $0xd0] sm:$0xff]  }
 0x331   :  { %7199 = vmatprep.subr.bf16.mxu1 %v8439_v2  ;;  %v5722_v2 = vmul.f32 %v8823_v26, %v8823_v26 }
 0x332   :  { %7200 = vmatpush3.bf16.msra.mxu1 %v8440_v4 }
 0x333   :  { %5495 = vmatpush1.bf16.msra.mxu0 %v8418_v37  ;;  %6135 = vmatmul.mubr.bf16.gmra.mrb[52].mxu1 %v5769_v9 }
 0x334   :  { %5496 = vmatprep.subr.bf16.mxu0 %v8423_v49  ;;  %7201 = vmatprep.subr.bf16.mxu1 %v8441_v6  ;;  %v5723_v6 = vmul.f32 %v8876_v10, %v8876_v10  ;;  %v5732_v10 = vmul.f32 %v8839_v54, %v8839_v54  ;;  %v5771_v54 = vpack.c.bf16 %v8906_v8, %v8906_v8 }
 0x336   :  { %7202 = vmatpush3.bf16.msra.mxu1 %v8442_v7 }
 0x337   :  { %5497 = vmatpush1.bf16.msra.mxu0 %v8421_v41  ;;  %7203 = vmatprep.subr.bf16.mxu1 %v8443_v14 }
 0x338   :  { %5498 = vmatprep.subr.bf16.mxu0 %v8426_v20  ;;  %v8444_v20 = vld [vmem:[#allocation7 + $0x90] sm:$0xff]  }
 0x33a   :  { %7204 = vmatpush3.bf16.msra.mxu1 %v8444_v20 }
 0x33b   :  { %5499 = vmatpush1.bf16.msra.mxu0 %v8424_v11  ;;  %v8445_v11 = vld [vmem:[#allocation7 + $0xd8] sm:$0xff]  }
 0x33c   :  { %5500 = vmatprep.subr.bf16.mxu0 %v8429_v46  ;;  %v8446_v46 = vld [vmem:[#allocation7 + $0x98] sm:$0xff]   ;;  %7205 = vmatprep.subr.bf16.mxu1 %v8445_v11 }
 0x33e   :  { %7206 = vmatpush3.bf16.msra.mxu1 %v8446_v46 }
 0x33f   :  { %5501 = vmatpush1.bf16.msra.mxu0 %v8427_v12  ;;  %v8447_v12 = vld [vmem:[#allocation7 + $0xe0] sm:$0xff]  }
 0x340   :  { %5502 = vmatprep.subr.bf16.mxu0 %v8432_v52  ;;  %v8448_v52 = vld [vmem:[#allocation7 + $0xa0] sm:$0xff]   ;;  %7207 = vmatprep.subr.bf16.mxu1 %v8447_v12 }
 0x342   :  { %7208 = vmatpush3.bf16.msra.mxu1 %v8448_v52  ;;  %v8456_v52 = vld [vmem:[#allocation7 + $0x108] sm:$0xff]  }
 0x343   :  { %5503 = vmatpush1.bf16.msra.mxu0 %v8430_v13  ;;  %v7075_v29 = vpop.f32.mrb[16].mxu1  ;;  %v8449_v13 = vld [vmem:[#allocation7 + $0xe8] sm:$0xff]  }
 0x344   :  { %5504 = vmatprep.subr.bf16.mxu0 %v8435_v15  ;;  %v7076_v17 = vpop.f32.mrb[17].mxu1  ;;  %v8450_v15 = vld [vmem:[#allocation7 + $0xa8] sm:$0xff]   ;;  %7209 = vmatprep.subr.bf16.mxu1 %v8449_v13 }
 0x345   :  { %v7077_v18 = vadd.f32 %v7076_v17, %v7075_v29  ;;  %v7078_v19 = vpop.f32.mrb[18].mxu1  ;;  %v8452_v29 = vld [vmem:[#allocation7 + $0xb0] sm:$0xff]  }
 0x346   :  { %v7079_v21 = vpop.f32.mrb[19].mxu1  ;;  %7210 = vmatpush3.bf16.msra.mxu1 %v8450_v15 }
 0x347   :  { %5505 = vmatpush1.bf16.msra.mxu0 %v8433_v50  ;;  %v7080_v22 = vadd.f32 %v7079_v21, %v7078_v19  ;;  %v8451_v50 = vld [vmem:[#allocation7 + $0xf0] sm:$0xff]  }
 0x348   :  { %5506 = vmatprep.subr.bf16.mxu0 %v8438_v16  ;;  %7211 = vmatprep.subr.bf16.mxu1 %v8451_v50 }
 0x34a   :  { %7212 = vmatpush3.bf16.msra.mxu1 %v8452_v29 }
 0x34b   :  { %5507 = vmatpush1.bf16.msra.mxu0 %v8436_v24  ;;  %v7081_v25 = vpop.f32.mrb[20].mxu1  ;;  %v8454_v24 = vld [vmem:[#allocation7 + $0xb8] sm:$0xff]  }
 0x34c   :  { %v7082_v33 = vpop.f32.mrb[21].mxu1 }
 0x34d   :  { %v7083_v32 = vadd.f32 %v7082_v33, %v7081_v25  ;;  %v7084_v35 = vpop.f32.mrb[22].mxu1 }
 0x34e   :  { %5509 = vmatmul.mubr.bf16.vlgmr.msra.gmra.mrb[16].mxu0 %v8779_v57  ;;  %v7085_v23 = vpop.f32.mrb[23].mxu1  ;;  %v8455_v35 = vld [vmem:[#allocation7 + $0x100] sm:$0xff]  }
 0x34f   :  { %5518 = vmatprep.mubr.bf16.mxu0 %v8781_v62 }
 0x356   :  { %5519 = vmatmul.mubr.bf16.gmra.mrb[20].mxu0 %v8787_v1 }
 0x363   :  { %v7103_v43 = vpop.f32.mrb[24].mxu1 }
 0x364   :  { %v7104_v44 = vpop.f32.mrb[25].mxu1 }
 0x365   :  { %v7105_v5 = vadd.f32 %v7104_v44, %v7103_v43  ;;  %v7106_v30 = vpop.f32.mrb[26].mxu1 }
 0x366   :  { %v7107_v39 = vpop.f32.mrb[27].mxu1 }
 0x367   :  { %v5610_v45 = vadd.f32 %v7105_v5, %v7077_v18  ;;  %v7108_v38 = vadd.f32 %v7107_v39, %v7106_v30  ;;  %v8453_v18 = vld [vmem:[#allocation7 + $0xf8] sm:$0xff]  }
 0x368   :  { %7213 = vmatprep.subr.bf16.mxu1 %v8453_v18 }
 0x369   :  { %v5613_v53 = vadd.f32 %v7108_v38, %v7080_v22  ;;  %v7058_v22 = vld [vmem:[#allocation8] ss:$0 sm:$0xff]  ;;  %7214 = vmatpush3.bf16.msra.mxu1 %v8454_v24  ;;  %v8462_v24 = vld [vmem:[#allocation7 + $0x138] sm:$0xff]  }
 0x36a   :  { %7237 = vmatprep.subr.bf16.mxu1 %v8455_v35 }
 0x36b   :  { %v7109_v58 = vpop.f32.mrb[28].mxu1 }
 0x36c   :  { %v7110_v28 = vpop.f32.mrb[29].mxu1 }
 0x36d   :  { %v7111_v59 = vadd.f32 %v7110_v28, %v7109_v58  ;;  %v7112_v60 = vpop.f32.mrb[30].mxu1 }
 0x36e   :  { %v7113_v36 = vpop.f32.mrb[31].mxu1 }
 0x36f   :  { %v5618_v61 = vadd.f32 %v7111_v59, %v7083_v32 }
 0x383   :  { %v7131_v57 = vpop.f32.mrb[32].mxu1 }
 0x384   :  { %v7132_v63 = vpop.f32.mrb[33].mxu1 }
 0x385   :  { %v7133_v0 = vadd.f32 %v7132_v63, %v7131_v57  ;;  %v7134_v62 = vpop.f32.mrb[34].mxu1 }
 0x386   :  { %v7135_v47 = vpop.f32.mrb[35].mxu1 }
 0x387   :  { %v5658_v1 = vadd.f32 %v7133_v0, %v5610_v45  ;;  %v7136_v48 = vadd.f32 %v7135_v47, %v7134_v62 }
 0x389   :  { %v5661_v3 = vadd.f32 %v7136_v48, %v5613_v53 }
 0x38b   :  { %v7137_v31 = vpop.f32.mrb[36].mxu1 }
 0x38c   :  { %v7138_v51 = vpop.f32.mrb[37].mxu1 }
 0x38d   :  { %v7139_v37 = vadd.f32 %v7138_v51, %v7137_v31  ;;  %v7140_v49 = vpop.f32.mrb[38].mxu1  ;;  %v5727_v51 = vmul.f32 %v8831_v40, %v8831_v40  ;;  %v5733_v40 = vmul.f32 %v8898_v56, %v8898_v56  ;;  %v8458_v56 = vld [vmem:[#allocation7 + $0x118] sm:$0xff]  }
 0x38e   :  { %v7141_v9 = vpop.f32.mrb[39].mxu1 }
 0x38f   :  { %v5666_v41 = vadd.f32 %v7139_v37, %v5618_v61  ;;  %v5728_v9 = vmul.f32 %v8886_v34, %v8886_v34 }
 0x3a3   :  { %v7159_v16 = vpop.f32.mrb[40].mxu1 }
 0x3a4   :  { %v7160_v17 = vpop.f32.mrb[41].mxu1 }
 0x3a5   :  { %v7161_v19 = vadd.f32 %v7160_v17, %v7159_v16  ;;  %v7162_v21 = vpop.f32.mrb[42].mxu1 }
 0x3a6   :  { %v7163_v25 = vpop.f32.mrb[43].mxu1 }
 0x3a7   :  { %v5706_v33 = vadd.f32 %v7161_v19, %v5658_v1  ;;  %v7164_v32 = vadd.f32 %v7163_v25, %v7162_v21  ;;  %v8457_v19 = vld [vmem:[#allocation7 + $0x110] sm:$0xff]  }
 0x3a9   :  { %v6257_v23 = vadd.f32 %v7058_v22, %v5706_v33  ;;  %v5709_v43 = vadd.f32 %v7164_v32, %v5661_v3 }
 0x3ab   :  { %6260 = vst [vmem:[#allocation11] sm:$0xff] %v6257_v23  ;;  %v6258_v44 = vadd.f32 %v7058_v22, %v5709_v43  ;;  %v7165_v5 = vpop.f32.mrb[44].mxu1 }
 0x3ac   :  { %v7166_v30 = vpop.f32.mrb[45].mxu1 }
 0x3ad   :  { %6261 = vst [vmem:[#allocation11 + $0x8] sm:$0xff] %v6258_v44  ;;  %v7167_v39 = vadd.f32 %v7166_v30, %v7165_v5  ;;  %v7168_v45 = vpop.f32.mrb[46].mxu1 }
 0x3ae   :  { %v7169_v38 = vpop.f32.mrb[47].mxu1 }
 0x3af   :  { %v5714_v53 = vadd.f32 %v7167_v39, %v5666_v41 }
 0x3b1   :  { %v6259_v58 = vadd.f32 %v7058_v22, %v5714_v53 }
 0x3b3   :  { %6262 = vst [vmem:[#allocation11 + $0x10] sm:$0xff] %v6259_v58 }
 0x3fe   :  { %v7187_v28 = vpop.f32.mrb[48].mxu1 }
 0x3ff   :  { %v7188_v59 = vpop.f32.mrb[49].mxu1 }
 0x400   :  { %v8911_v60 = vadd.f32 %v7188_v59, %v7187_v28  ;;  %v7190_v36 = vpop.f32.mrb[50].mxu1 }
 0x401   :  { %v7191_v61 = vpop.f32.mrb[51].mxu1 }
 0x402   :  { %v8913_v57 = vadd.f32 %v7191_v61, %v7190_v36 }
 0x406   :  { %v7193_v63 = vpop.f32.mrb[52].mxu1 }
 0x407   :  { %v7194_v0 = vpop.f32.mrb[53].mxu1 }
 0x408   :  { %v8915_v62 = vadd.f32 %v7194_v0, %v7193_v63  ;;  %v7196_v47 = vpop.f32.mrb[54].mxu1 }
 0x409   :  { %v7197_v1 = vpop.f32.mrb[55].mxu1 }
 0x421   :  { %v5510_v48 = vpop.f32.mrb[16].mxu0 }
 0x422   :  { %v5737_v3 = vmul.f32 %v5510_v48, %v5510_v48  ;;  %v5512_v4 = vpop.f32.mrb[17].mxu0 }
 0x423   :  { %v5738_v31 = vmul.f32 %v5512_v4, %v5512_v4  ;;  %v5514_v7 = vpop.f32.mrb[18].mxu0 }
 0x424   :  { %v5752_v14 = vadd.f32 %v5737_v3, %v5722_v2  ;;  %v5742_v37 = vmul.f32 %v5514_v7, %v5514_v7  ;;  %v5516_v49 = vpop.f32.mrb[19].mxu0 }
 0x425   :  { %v5753_v41 = vadd.f32 %v5738_v31, %v5723_v6  ;;  %v5743_v20 = vmul.f32 %v5516_v49, %v5516_v49 }
 0x426   :  { %v5757_v11 = vadd.f32 %v5742_v37, %v5727_v51 }
 0x427   :  { %v5758_v26 = vadd.f32 %v5743_v20, %v5728_v9 }
 0x428   :  { %v5767_v46 = vpack.c.bf16 %v5757_v11, %v5752_v14 }
 0x429   :  { %v5520_v12 = vpop.f32.mrb[20].mxu0  ;;  %v5768_v13 = vpack.c.bf16 %v5758_v26, %v5753_v41 }
 0x42a   :  { %v5747_v15 = vmul.f32 %v5520_v12, %v5520_v12  ;;  %v5522_v50 = vpop.f32.mrb[21].mxu0  ;;  %6174 = vmatprep.mubr.bf16.mxu1 %v5767_v46 }
 0x42b   :  { %v5748_v29 = vmul.f32 %v5522_v50, %v5522_v50  ;;  %v5524_v16 = vpop.f32.mrb[22].mxu0  ;;  %6175 = vmatmul.mubr.bf16.vlgmr.msra.gmra.mrb[56].mxu1 %v5766_v55  ;;  %v8461_v55 = vld [vmem:[#allocation7 + $0x130] sm:$0xff]  }
 0x42c   :  { %v5762_v34 = vadd.f32 %v5747_v15, %v5732_v10  ;;  %7238 = vmatpush3.bf16.msra.mxu1 %v8455_v35  ;;  %v5525_v17 = vpop.f32.mrb[23].mxu0 }
 0x42d   :  { %v5763_v18 = vadd.f32 %v5748_v29, %v5733_v40  ;;  %7239 = vmatprep.subr.bf16.mxu1 %v8456_v52 }
 0x42e   :  { %v5772_v21 = vpack.c.bf16 %v5762_v34, %v5762_v34 }
 0x42f   :  { %v5773_v8 = vpack.c.bf16 %v5763_v18, %v5763_v18 }
 0x430   :  { %7240 = vmatpush3.bf16.msra.mxu1 %v8456_v52  ;;  %6182 = vmatprep.mubr.bf16.mxu1 %v5772_v21 }
 0x431   :  { %7241 = vmatprep.subr.bf16.mxu1 %v8457_v19 }
 0x433   :  { %6183 = vmatmul.mubr.bf16.gmra.mrb[60].mxu1 %v5771_v54 }
 0x434   :  { %7242 = vmatpush3.bf16.msra.mxu1 %v8457_v19  ;;  %7253 = vmatprep.mubr.bf16.mxu1 %v5768_v13 }
 0x435   :  { %7243 = vmatprep.subr.bf16.mxu1 %v8458_v56 }
 0x438   :  { %7244 = vmatpush3.bf16.msra.mxu1 %v8458_v56 }
 0x439   :  { %7245 = vmatprep.subr.bf16.mxu1 %v8459_v42 }
 0x43c   :  { %7246 = vmatpush3.bf16.msra.mxu1 %v8459_v42 }
 0x43d   :  { %7247 = vmatprep.subr.bf16.mxu1 %v8460_v27 }
 0x440   :  { %7248 = vmatpush3.bf16.msra.mxu1 %v8460_v27 }
 0x441   :  { %7249 = vmatprep.subr.bf16.mxu1 %v8461_v55 }
 0x444   :  { %7250 = vmatpush3.bf16.msra.mxu1 %v8461_v55 }
 0x445   :  { %7251 = vmatprep.subr.bf16.mxu1 %v8462_v24 }
 0x448   :  { %7252 = vmatpush3.bf16.msra.mxu1 %v8462_v24 }
 0x44b   :  { %7254 = vmatmul.mubr.bf16.vlgmr.msra.gmra.mrb[64].mxu1 %v5773_v8 }
 0x44c   :  { %8568 = shalt.err (!%p8565_p8)
}
 0x44d   :  { %s8569_s23 = scalar_lea.hbm %s8972_s5, 384 }
 0x44e   :  { %p8570_p9 = scmp.ne.s32.totalorder %s8972_s5, %s8569_s23  ;;  %p8573_p10 = scmp.lt.u32.totalorder %s8569_s23, %s8972_s5 }
 0x450   :  { %p8575_p11 = pnand %p8573_p10, %p8570_p9 }
 0x452   :  { %8578 = shalt.err (!%p8575_p11)
}
 0x453   :  { %s8622_s28 = smov 128   ;;  %s8623_s29 = smov 8   ;;  %v6129_v33 = vadd.f32 1e-08, %v8911_v60  ;;  %v6132_v43 = vadd.f32 1e-08, %v8913_v57 }
 0x454   :  { %6286 = dma.vmem_to_hbm [thread:$0]  %s6281_s19, 384, %s8972_s5, [#allocation12], %s8622_s28, %s8622_s28, %s8623_s29   ;;  %v6137_v38 = vadd.f32 1e-08, %v8915_v62 }
 0x455   :  { %s8624_s5 = smov [#allocation10]  }
 0x456   :  { %s6268_s6 = sshll.u32 %s8624_s5, 4  ;;  %s6269_s6 = int_to_ptr.vmem [resolvable:$true] %s6268_s6 }
 0x457   :  { %s8579_s7 = scalar_lea.vmem %s6269_s6, 384  ;;  %p8584_p13 = scmp.lt.s32.totalorder %s6269_s6, %s6269_s6 }
 0x458   :  { %p8580_p12 = scmp.ne.s32.totalorder %s6269_s6, %s8579_s7  ;;  %p8585_p0 = scmp.lt.s32.totalorder %s8579_s7, %s8579_s7 }
 0x45a   :  { %p8586_p1 = por %p8585_p0, %p8584_p13 }
 0x45c   :  { %p8587_p2 = pnand %p8586_p1, %p8580_p12 }
 0x4fe   :  { %v7215_v22 = vpop.f32.mrb[56].mxu1 }
 0x4ff   :  { %v7216_v25 = vpop.f32.mrb[57].mxu1 }
 0x500   :  { %v7217_v32 = vadd.f32 %v7216_v25, %v7215_v22  ;;  %v7218_v35 = vpop.f32.mrb[58].mxu1 }
 0x501   :  { %v7219_v23 = vpop.f32.mrb[59].mxu1 }
 0x502   :  { %v7220_v44 = vadd.f32 %v7219_v23, %v7218_v35  ;;  %v6177_v5 = vadd.f32 %v7217_v32, %v6129_v33 }
 0x504   :  { %v6180_v30 = vadd.f32 %v7220_v44, %v6132_v43 }
 0x506   :  { %v7221_v39 = vpop.f32.mrb[60].mxu1 }
 0x507   :  { %v7222_v45 = vpop.f32.mrb[61].mxu1 }
 0x508   :  { %v7223_v53 = vadd.f32 %v7222_v45, %v7221_v39  ;;  %v7224_v58 = vpop.f32.mrb[62].mxu1 }
 0x509   :  { %v7225_v28 = vpop.f32.mrb[63].mxu1 }
 0x50a   :  { %v6185_v59 = vadd.f32 %v7223_v53, %v6137_v38 }
 0x51e   :  { %v7255_v36 = vpop.f32.mrb[64].mxu1 }
 0x51f   :  { %v6233_v61 = vadd.f32 %v7255_v36, %v6185_v59  ;;  %v6224_v63 = vpop.f32.mrb[65].mxu1 }
 0x520   :  { %v6225_v60 = vadd.f32 %v6224_v63, %v6177_v5  ;;  %v7256_v0 = vpop.f32.mrb[66].mxu1 }
 0x521   :  { %8463 = vlog2.f32 %v6233_v61  ;;  %v6227_v47 = vpop.f32.mrb[67].mxu1 }
 0x522   :  { %8465 = vlog2.f32 %v6225_v60  ;;  %v6228_v57 = vadd.f32 %v6227_v47, %v6180_v30 }
 0x524   :  { %8467 = vlog2.f32 %v6228_v57 }
 0x52b   :  { %v8464_v1 = vpop.eup %8463 }
 0x52c   :  { %v8466_v48 = vpop.eup %8465  ;;  %v6243_v2 = vmul.f32 0.6931472, %v8464_v1 }
 0x52d   :  { %v6239_v3 = vmul.f32 0.6931472, %v8466_v48 }
 0x52e   :  { %v8468_v4 = vpop.eup %8467  ;;  %v6246_v62 = vmul.f32 4.3429446, %v6243_v2 }
 0x52f   :  { %v6244_v6 = vmul.f32 4.3429446, %v6239_v3  ;;  %v6241_v31 = vmul.f32 0.6931472, %v8468_v4 }
 0x530   :  { %6249 = vst [vmem:[#allocation10 + $0x10] sm:$0xff] %v6246_v62 }
 0x531   :  { %6247 = vst [vmem:[#allocation10] sm:$0xff] %v6244_v6  ;;  %v6245_v7 = vmul.f32 4.3429446, %v6241_v31 }
 0x533   :  { %6248 = vst [vmem:[#allocation10 + $0x8] sm:$0xff] %v6245_v7 }
 0x534   :  { %8590 = shalt.err (!%p8587_p2)
}
 0x535   :  { %s8591_s10 = scalar_lea.hbm %s8971_s4, 384 }
 0x536   :  { %p8592_p3 = scmp.ne.s32.totalorder %s8971_s4, %s8591_s10  ;;  %p8595_p4 = scmp.lt.u32.totalorder %s8591_s10, %s8971_s4 }
 0x538   :  { %p8597_p5 = pnand %p8595_p4, %p8592_p3 }
 0x53a   :  { %8600 = shalt.err (!%p8597_p5)
}
 0x53b   :  { %6274 = dma.vmem_to_hbm [thread:$0]  %s6269_s6, 384, %s8971_s4, [#allocation4], %s8622_s28, %s8622_s28, %s8623_s29  }
 0x53c   :  { %8607 = dma.done.wait [#allocation4], 384  }
 0x53d   :  { %8608 = vsyncadd [#allocation4], 4294966912 }
 0x53e   :  { %8609 = dma.done.wait [#allocation12], 384  }
 0x53f   :  { %8610 = vsyncadd [#allocation12], 4294966912 }
 0x540   :  { %6293 = vsyncpa [#allocation3], 1 }
 0x541   :  { %6294 = vsyncpa [#allocation6], 1 }
 0x542   :  { %6295 = vsyncpa [#allocation9], 1 }
 0x543   :  { %6296 = vsyncpa [#allocation4], 1 }
 0x544   :  { %6297 = vsyncpa [#allocation12], 1 }

</bundles_post_ra>
